<compile_context>
chip_gen: v7x
topology: tpu7x:2x2x1
jax: 0.10.0
libtpu: 0.0.40
codegen_flags: <defaults>
</compile_context>

<pallas_src>
import functools
import math

import numpy as np
import jax
import jax.numpy as jnp
from jax.experimental import pallas as pl
from jax.experimental.pallas import tpu as pltpu


def _sh_code_kernel(x_ref, w_ref, c_ref, o_ref, *, chunk):
    """One grid step over a tile of (row-folded) dataset rows.

    x_ref: (BLK, F*D)            folded input rows
    w_ref: (F*D, K_pad*F*NBIT)   fused block-diagonal weight (grid-resident)
    c_ref: (1,   K_pad*F*NBIT)   fused bias
    o_ref: (BLK, F*NBIT)         folded SH codes
    """
    group = o_ref.shape[-1]            # F*NBIT lanes per output group
    width = w_ref.shape[-1]            # K_pad * group
    rows = x_ref.shape[0]
    n_chunks = rows // chunk           # static (host guarantees divisibility)

    def process(r0):
        xs = x_ref[pl.ds(r0, chunk), :]
        arg = jnp.dot(xs, w_ref[...], preferred_element_type=jnp.float32) + c_ref[...]
        p = jnp.cos(arg)               # lane-dense trig slab: (chunk, width)
        # Product over the K_pad harmonic groups (lane stride = group):
        # 1) halve with split-multiplies while wider than one vreg row (128 lanes)...
        w = width
        while w > group and w > 128:   # static trace-time loop
            half = w // 2
            p = p[:, :half] * p[:, half:]
            w = half
        # 2) ...finish with a roll butterfly (XLU rotate — free slot — + VPU multiply).
        shift = w // 2
        while shift >= group:          # static trace-time loop
            p = p * pltpu.roll(p, shift=shift, axis=1)
            shift //= 2
        o_ref[pl.ds(r0, chunk), :] = p[:, :group]

    if n_chunks == 1:
        process(0)
    else:
        # Inner sub-chunk loop keeps the (chunk, width) temporaries near the vreg file
        # instead of materializing one (BLK, width) slab in VMEM.
        @pl.loop(0, n_chunks)
        def _(t):
            process(pl.multiple_of(t * chunk, chunk))


def _fuse_sh_params(mean_, components_, explained_variance_, whiten, mn, R, modes):
    """Host-side (concrete, float64) fusion of all SHLoss eval parameters.

    Lane layout l = k*(F*NBIT) + r*NBIT + i.  With folded input x2[m, r*D+d] = x[F*m+r, d]:
        (x2 @ W2 + c2)[m, l] = x_pca_final[F*m+r, j_{i,k}] * omegas[i, j_{i,k}]
    (zero for padded k, so cos = 1), hence cos(.) followed by a product over k yields the
    SH code v[F*m+r, i].
    """
    comp = np.asarray(components_, dtype=np.float64)            # (NBIT, D)
    nbit, D = comp.shape
    var = np.asarray(explained_variance_, dtype=np.float64)
    mean_np = np.asarray(mean_, dtype=np.float64)
    mn_np = np.asarray(mn, dtype=np.float64)
    R_np = np.asarray(R, dtype=np.float64)
    modes_np = np.asarray(modes, dtype=np.float64)

    invstd = (1.0 / np.sqrt(var)) if whiten else np.ones(nbit)
    compT_scaled = comp.T * invstd[None, :]                     # (D, NBIT)
    bias = mean_np @ compT_scaled + mn_np                       # (NBIT,)

    # Sparse harmonic structure: only nonzero modes matter (cos(0) = 1 is a no-op factor).
    K = int(max(1, (modes_np != 0).sum(axis=1).max()))
    K_pad = 1 << (K - 1).bit_length()                           # power of two for the tree
    F = max(1, 128 // (K_pad * nbit))                           # rows folded into lanes
    group = F * nbit
    width = K_pad * group

    jidx = np.zeros((nbit, K_pad), dtype=np.int64)
    osel = np.zeros((nbit, K_pad), dtype=np.float64)
    for i in range(nbit):
        js = np.nonzero(modes_np[i])[0]
        jidx[i, : len(js)] = js
        osel[i, : len(js)] = modes_np[i, js] * (math.pi / R_np[js])

    # W_dki[d,k,i] = compT_scaled[d, j_{i,k}] * omega_{i,k};  c_ki[k,i] = -bias[j]*omega
    W_dki = np.transpose(compT_scaled[:, jidx] * osel[None, :, :], (0, 2, 1))   # (D,K,NBIT)
    c_ki = -np.transpose(bias[jidx] * osel, (1, 0))                             # (K,NBIT)

    # Block-diagonal row fold: W2[(r,d), (k,s,i)] = [r==s] * W_dki[d,k,i]
    W2 = np.einsum("rs,dki->rdksi", np.eye(F), W_dki).reshape(F * D, width)
    c2 = np.tile(c_ki[:, None, :], (1, F, 1)).reshape(1, width)
    return (jnp.asarray(W2, jnp.float32), jnp.asarray(c2, jnp.float32), F, K_pad, nbit, D)


def sh_loss_forward(x, mean_, components_, explained_variance_, whiten, mn, R, modes,
                    *, block_fold=512, chunk=256):
    """Eval-mode SHLoss.forward (sh_code).  x: (N, D) -> (N, NBIT) float32.

    `block_fold` / `chunk` are in *folded* rows (F input rows each on the fast path).
    NOTE: the SH parameters are concrete module buffers; their fusion runs on the host,
    so do not jit this wrapper with traced parameters.
    """
    N, D = x.shape
    f32 = jnp.float32

    W2, c2, F, K_pad, nbit, D_w = _fuse_sh_params(
        mean_, components_, explained_variance_, whiten, mn, R, modes)
    assert D_w == D
    group = F * nbit
    width = K_pad * group

    # ----- tile geometry (folded rows); pad N so every grid step is full -----
    nf_needed = -(-N // F)
    block_fold = max(8, (block_fold // 8) * 8)
    block_fold = min(block_fold, max(8, ((nf_needed + 7) // 8) * 8))
    chunk_eff = max(8, (min(chunk, block_fold) // 8) * 8)
    while block_fold % chunk_eff:
        chunk_eff -= 8
    nf_pad = -(-nf_needed // block_fold) * block_fold
    n_pad = nf_pad * F

    x_f = x.astype(f32)
    if n_pad != N:
        x_f = jnp.concatenate([x_f, jnp.zeros((n_pad - N, D), f32)], axis=0)
    x2 = x_f.reshape(nf_pad, F * D)          # contiguous row fold — no data shuffle

    cost = pl.CostEstimate(
        flops=int(2 * nf_pad * (F * D) * width),
        transcendentals=int(nf_pad * width),
        bytes_accessed=int(4 * (nf_pad * F * D + nf_pad * group + F * D * width + width)),
    )

    out2 = pl.pallas_call(
        functools.partial(_sh_code_kernel, chunk=chunk_eff),
        out_shape=jax.ShapeDtypeStruct((nf_pad, group), f32),
        grid_spec=pltpu.PrefetchScalarGridSpec(
            num_scalar_prefetch=0,
            grid=(nf_pad // block_fold,),
            in_specs=[
                pl.BlockSpec((block_fold, F * D), lambda i: (i, 0)),   # folded x tile
                pl.BlockSpec((F * D, width), lambda i: (0, 0)),        # resident fused W
                pl.BlockSpec((1, width), lambda i: (0, 0)),            # resident fused c
            ],
            out_specs=pl.BlockSpec((block_fold, group), lambda i: (i, 0)),
        ),
        compiler_params=pltpu.CompilerParams(
            dimension_semantics=("parallel",)),
        cost_estimate=cost,
    )(x2, W2, c2)

    return out2.reshape(n_pad, nbit)[:N]


def sh_loss_reference(x, mean_, components_, explained_variance_, whiten, mn, R, modes):
    """Pure-JAX reference mirroring the PyTorch sh_code()."""
    xc = x - mean_.reshape(1, -1)
    x_pca = xc @ components_.T
    if whiten:
        x_pca = x_pca / jnp.sqrt(explained_variance_).reshape(1, -1)
    x_pca = x_pca - mn.reshape(1, -1)
    omegas = modes * (math.pi / R).reshape(1, -1)
    ys = jnp.sin(x_pca[:, None, :] * omegas[None, :, :] + math.pi / 2)
    return jnp.prod(ys, axis=2)


def _build_sh_modes(x_pca_np, nbit):
    """Replicates SHLoss training-mode construction of (mn, R, modes) in numpy."""
    eps = 1e-7
    mn = x_pca_np.min(axis=0) - eps
    mx = x_pca_np.max(axis=0) + eps
    R = mx - mn
    max_mode = np.ceil((nbit + 1) * R / R.max()).astype(np.int64)
    n_modes = int(max_mode.sum() - len(max_mode) + 1)
    modes = np.ones((n_modes, nbit))
    m = 0
    for i in range(nbit):
        modes[m + 1: m + int(max_mode[i]), i] = np.arange(1, int(max_mode[i])) + 1
        m += int(max_mode[i]) - 1
    modes -= 1
    omegas = modes * (np.pi / R)[None, :]
    eig_val = -(omegas ** 2).sum(1)
    ii = np.argsort(-eig_val)
    return mn, R, modes[ii[1: nbit + 1], :]


if __name__ == "__main__":
    # TODO(synk): the training branch (sklearn PCA.fit, tqdm mode search, quantization
    # loss) is host-side setup with no Pallas equivalent; only the eval-mode sh_code hot
    # path runs as a kernel.  _build_sh_modes reproduces its mode construction so the
    # demo modes have the real SH structure (one nonzero harmonic per bit).
    N, D, NBIT = 8192, 32, 16
    key = jax.random.PRNGKey(0)
    kx, kmean, kcomp, kvar = jax.random.split(key, 4)

    x = jax.random.normal(kx, (N, D), jnp.float32)

    # Synthetic "fitted" PCA parameters.
    mean_ = jax.random.normal(kmean, (D,), jnp.float32) * 0.1
    components_ = jax.random.normal(kcomp, (NBIT, D), jnp.float32)
    components_ = components_ / jnp.linalg.norm(components_, axis=1, keepdims=True)
    explained_variance_ = jax.random.uniform(kvar, (NBIT,), jnp.float32, 0.5, 2.0)
    whiten = True

    # (mn, R, modes) built exactly as SHLoss training builds them from x_pca.
    x_pca_np = np.asarray(
        ((x - mean_[None, :]) @ components_.T) / jnp.sqrt(explained_variance_)[None, :])
    mn_np, R_np, modes_np = _build_sh_modes(x_pca_np.astype(np.float64), NBIT)
    mn = jnp.asarray(mn_np, jnp.float32)
    R = jnp.asarray(R_np, jnp.float32)
    modes = jnp.asarray(modes_np, jnp.float32)

    # Fast path: real SH modes (K=1) -> 8-row lane fold, 512 folded rows (4096 input
    # rows) per grid step, grid of 2 with "parallel" semantics (both v7x TCs busy).
    v = sh_loss_forward(x, mean_, components_, explained_variance_, whiten, mn, R, modes,
                        block_fold=512, chunk=256)
    v = jax.block_until_ready(v)
    v_ref = sh_loss_reference(x, mean_, components_, explained_variance_, whiten, mn, R, modes)
    assert v.shape == (N, NBIT)
    np.testing.assert_allclose(np.asarray(v), np.asarray(v_ref), rtol=1e-3, atol=1e-3)

    # General path: dense random modes (K_pad=16, no row fold, 256-lane product tree)
    # and a non-multiple N exercising the padded tail + the inner sub-chunk loop.
    N2 = 2048 - 24
    kx2, kmodes2, kR2, kmn2 = jax.random.split(jax.random.PRNGKey(1), 4)
    x_b = jax.random.normal(kx2, (N2, D), jnp.float32)
    modes2 = jax.random.randint(kmodes2, (NBIT, NBIT), 0, 4).astype(jnp.float32)
    R2 = jax.random.uniform(kR2, (NBIT,), jnp.float32, 1.0, 3.0)
    mn2 = jax.random.uniform(kmn2, (NBIT,), jnp.float32, -1.0, 0.0)
    v2 = sh_loss_forward(x_b, mean_, components_, explained_variance_, whiten, mn2, R2,
                         modes2, block_fold=512, chunk=256)
    v2 = jax.block_until_ready(v2)
    v2_ref = sh_loss_reference(x_b, mean_, components_, explained_variance_, whiten,
                               mn2, R2, modes2)
    np.testing.assert_allclose(np.asarray(v2), np.asarray(v2_ref), rtol=1e-3, atol=1e-3)

    print("KERNEL_OK")
</pallas_src>

<mosaic_0001>
module attributes {stable_mosaic.version = 11 : i64} {
  func.func @_sh_code_kernel(%arg0: i32, %arg1: memref<512x256xf32, #tpu.memory_space<vmem>>, %arg2: memref<256x128xf32, #tpu.memory_space<vmem>>, %arg3: memref<1x128xf32, #tpu.memory_space<vmem>>, %arg4: memref<512x128xf32, #tpu.memory_space<vmem>>) attributes {dimension_semantics = [#tpu.dimension_semantics<parallel>], iteration_bounds = array<i64: 2>, scalar_prefetch = 0 : i64, scratch_operands = 0 : i64, tpu.core_type = #tpu.core_type<tc>, window_params = [{transform_indices = @transform_0, window_bounds = array<i64: 512, 256>}, {pipeline_mode = #tpu.pipeline_mode<synchronous>, transform_indices = @transform_1, window_bounds = array<i64: 256, 128>}, {pipeline_mode = #tpu.pipeline_mode<synchronous>, transform_indices = @transform_2, window_bounds = array<i64: 1, 128>}, {transform_indices = @transform_3, window_bounds = array<i64: 512, 128>}]} {
    %c0_i32 = arith.constant 0 : i32
    %c2_i32 = arith.constant 2 : i32
    %0 = arith.addi %c0_i32, %c2_i32 : i32
    %c1_i32 = arith.constant 1 : i32
    scf.for %arg5 = %c0_i32 to %0 step %c1_i32  : i32 {
      %c1_i32_1 = arith.constant 1 : i32
      %1 = arith.muli %arg5, %c1_i32_1 : i32
      %c0_i32_2 = arith.constant 0 : i32
      %2 = arith.addi %c0_i32_2, %1 : i32
      %c256_i32 = arith.constant 256 : i32
      %3 = arith.muli %2, %c256_i32 : i32
      %4 = tpu.assume_multiple %3, 256 : i32
      %5 = arith.index_cast %4 : i32 to index
      %c0 = arith.constant 0 : index
      %6 = vector.load %arg1[%5, %c0] : memref<512x256xf32, #tpu.memory_space<vmem>>, vector<256x256xf32>
      %c0_3 = arith.constant 0 : index
      %c0_4 = arith.constant 0 : index
      %7 = vector.load %arg2[%c0_3, %c0_4] : memref<256x128xf32, #tpu.memory_space<vmem>>, vector<256x128xf32>
      %cst = arith.constant dense<0.000000e+00> : vector<256x128xf32>
      %8 = tpu.matmul %6, %7, %cst {dimension_numbers = #tpu.dot_dimension_numbers<[1], [0], [0], [1], [0, 0, 1, 1], [], []>} : vector<256x256xf32>, vector<256x128xf32>, vector<256x128xf32> -> vector<256x128xf32>
      %c0_5 = arith.constant 0 : index
      %c0_6 = arith.constant 0 : index
      %9 = vector.load %arg3[%c0_5, %c0_6] : memref<1x128xf32, #tpu.memory_space<vmem>>, vector<1x128xf32>
      %10 = vector.broadcast %9 : vector<1x128xf32> to vector<256x128xf32>
      %11 = arith.addf %8, %10 : vector<256x128xf32>
      %12 = math.cos %11 : vector<256x128xf32>
      %13 = arith.index_cast %4 : i32 to index
      %c0_7 = arith.constant 0 : index
      %14 = vector.load %arg4[%13, %c0_7] : memref<512x128xf32, #tpu.memory_space<vmem>>, vector<256x128xf32>
      tpu.vector_store %arg4[%13, %c0_7], %12 {strides = array<i32>} : memref<512x128xf32, #tpu.memory_space<vmem>>, vector<256x128xf32>,
    }
    %c2_i32_0 = arith.constant 2 : i32
    return
  }
  func.func @transform_0(%arg0: i32) -> (i32, i32) {
    %c0_i32 = arith.constant 0 : i32
    %c0_i32_0 = arith.constant 0 : i32
    return %arg0, %c0_i32 : i32, i32
  }
  func.func @transform_1(%arg0: i32) -> (i32, i32) {
    %c0_i32 = arith.constant 0 : i32
    %c0_i32_0 = arith.constant 0 : i32
    %c0_i32_1 = arith.constant 0 : i32
    return %c0_i32, %c0_i32_0 : i32, i32
  }
  func.func @transform_2(%arg0: i32) -> (i32, i32) {
    %c0_i32 = arith.constant 0 : i32
    %c0_i32_0 = arith.constant 0 : i32
    %c0_i32_1 = arith.constant 0 : i32
    return %c0_i32, %c0_i32_0 : i32, i32
  }
  func.func @transform_3(%arg0: i32) -> (i32, i32) {
    %c0_i32 = arith.constant 0 : i32
    %c0_i32_0 = arith.constant 0 : i32
    return %arg0, %c0_i32 : i32, i32
  }
}

</mosaic_0001>

<bundles_post_ra>
// kernel: tpu_custom_call.1
= control target key start
LH: loop header
LB: loop body
LE: loop exit
PB: predicated region body
PF: predicated region fallthrough
CT: control target
= control target key end

     0   :  { %8 = vsyncpa [#allocation3], 0  ;;  %s7748_s0 = inlined_call_operand.hbm [shape: f32[1024,256], index: 0, kind: input, shape index: {}]   ;;  %s7749_s1 = inlined_call_operand.hbm [shape: f32[256,128], index: 1, kind: input, shape index: {}]   ;;  %s7750_s2 = inlined_call_operand.vmem [shape: f32[1,128], index: 2, kind: input, shape index: {}]   ;;  %s7751_s3 = inlined_call_operand.hbm [shape: f32[1024,128], index: 3, kind: output, shape index: {}]  }
   0x1   :  { %10 = vsyncpa [#allocation3 + $0x1], 0 }
   0x2   :  { %11 = vsyncpa [#allocation6], 0 }
   0x3   :  { %12 = vsyncpa [#allocation4], 0 }
   0x4   :  { %14 = vsyncpa [#allocation4 + $0x1], 0  ;;  %s4728_s12 = smov 0   ;;  %s4730_s13 = smov 0  }
   0x5   :  { %s4732_s14 = smov 0   ;;  %s4734_s15 = smov 0  }
   0x6 LB: > { %s4749_s16 = sadd.s32 4294967295, %s4686_s15   ;;  %s3982_s17 = sadd.s32 4294967294, %s4686_s15   ;;  %s4686_s15 = sphi %s4734_s15, %s7833_s15   ;;  %s4682_s14 = sphi %s4732_s14, %s7832_s14   ;;  %s4678_s13 = sphi %s4730_s13, %s7831_s13   ;;  %s4674_s12 = sphi %s4728_s12, %s7830_s12  }
   0x7   : > { %p40_p0 = scmp.ne.s32.totalorder %s4678_s13, %s4674_s12  ;;  %p7752_p1 = scmp.eq.s32.totalorder %s4749_s16, 0 }
   0x8   : > { %p112_p3 = scmp.eq.s32.totalorder %s3982_s17, 1  ;;  %p3983_p5 = scmp.ge.s32.totalorder %s4686_s15, 1 }
   0x9   : > { %p4758_p4 = por %p7752_p1, %p40_p0  ;;  %p119_p7 = scmp.lt.s32.totalorder %s4686_s15, 3 }
   0xa   : > { %p4763_p6 = por %p112_p3, %p40_p0  ;;  %s4692_s21 = smov [#allocation5]  }
   0xb   : > { %s7755_s18 = scalar_select %p4758_p4, 1, 0 }
   0xc   : > { %s7756_s19 = scalar_select %p4763_p6, 1, 0 }
   0xd   : > { %p4768_p8 = pnand %p3983_p5, %p119_p7  ;;  %s131_s22 = sshll.u32 %s4692_s21, 4  ;;  %s4772_s22 = int_to_ptr.vmem [resolvable:$true] %s131_s22 }
   0xe   : > { %s4784_s24 = sadd.s32 1, %s4686_s15   ;;  %s27_s25 = sadd.s32 1, %s4682_s14 }
   0xf   : > { %s7757_s20 = scalar_select %p4768_p8, 1, 0 }
  0x10   : > { %p4351_p9 = pneg %p4768_p8  ;;  %s24_s26 = ssub.s32 %s4686_s15, %s4784_s24 }
  0x11   : > { %s4554_s29 = scalar_lea.hbm %s7749_s1, 4096 }
  0x12   : > { %p4779_p11 = pnand %p4351_p9, %p7752_p1  ;;  %p4555_p12 = scmp.ne.s32.totalorder %s7749_s1, %s4554_s29 }
  0x13   : > { %p4561_p5 = scmp.lt.u32.totalorder %s4554_s29, %s7749_s1 }
  0x14   : > { %p4556_p13 = pneg %p4779_p11 }
  0x16   : > { %p4557_p0 = pnand %p4556_p13, %p4555_p12 }
  0x18   : > { %p4558_p3 = pneg %p4557_p0 }
  0x1a   : > { %p4563_p7 = pnand %p4561_p5, %p4558_p3 }
  0x1c   : > { %4566 = shalt.err (!%p4563_p7)
}
  0x1d   : > { %s4567_s7 = scalar_lea.vmem %s4772_s22, 4096  ;;  %p4575_p2 = scmp.lt.s32.totalorder %s4772_s22, %s4772_s22 }
  0x1e   : > { %p4568_p9 = scmp.ne.s32.totalorder %s4772_s22, %s4567_s7  ;;  %p4576_p6 = scmp.lt.s32.totalorder %s4567_s7, %s4567_s7 }
  0x20   : > { %p4570_p10 = pnand %p4568_p9, %p4556_p13  ;;  %p4577_p4 = por %p4576_p6, %p4575_p2 }
  0x22   : > { %p4571_p1 = pneg %p4570_p10 }
  0x24   : > { %p4578_p8 = pnand %p4577_p4, %p4571_p1 }
  0x26   : > { %4581 = shalt.err (!%p4578_p8)
}
  0x27   : > { %s4693_s8 = smov 128   ;;  %s4694_s9 = smov 8  }
  0x28   : > { %4354 = dma.hbm_to_vmem [thread:$0]  (!%p4779_p11), %s7749_s1, 4096, %s4772_s22, [#allocation6], %s4693_s8, %s4693_s8, %s4694_s9  }
  0x29   : > { %p25_p2 = scmp.eq.s32.totalorder %s24_s26, 0  ;;  %p34_p1 = scmp.ne.s32.totalorder %s4682_s14, %s4678_s13 }
  0x2a   : > { %p35_p4 = scmp.eq.s32.totalorder %s4686_s15, 0  ;;  %p4364_p6 = scmp.lt.s32.totalorder %s4686_s15, 2 }
  0x2b   : > { %s4815_s17 = scalar_select %p25_p2, %s4682_s14, %s27_s25  }
  0x2c   : > { %p36_p8 = por %p35_p4, %p34_p1  ;;  %p7759_p10 = scmp.eq.s32.totalorder %s4749_s16, 1 }
  0x2d   : > { %s148_s27 = sand.u32 1, %s4682_s14   ;;  %s4132_s28 = sshll.u32 %s4686_s15, 14 }
  0x2e   : > { %p4819_p12 = por %p7759_p10, %p34_p1  ;;  %s3986_s29 = sshll.u32 %s148_s27, 10 }
  0x2f   : > { %s4828_s4 = scalar_lea.hbm %s7748_s0, %s4132_s28  ;;  %s152_s22 = scalar_lea.vmem [#allocation2], %s3986_s29 }
  0x30   : > { %s160_s25 = sshll.u32 %s152_s22, 4  ;;  %p4830_p11 = pnand %p4364_p6, %p36_p8  ;;  %s4834_s25 = int_to_ptr.vmem [resolvable:$true] %s160_s25 }
  0x31   : > { %s4836_s5 = scalar_lea.sflag [#allocation3], %s148_s27  ;;  %s4582_s6 = scalar_lea.hbm %s4828_s4, 16384 }
  0x32   : > { %p4583_p13 = scmp.ne.s32.totalorder %s4828_s4, %s4582_s6  ;;  %p4584_p0 = pneg %p4830_p11 }
  0x33   : > { %s4587_s9 = scalar_lea.hbm %s7748_s0, 32768  ;;  %p4588_p7 = scmp.lt.u32.totalorder %s4828_s4, %s7748_s0 }
  0x34   : > { %p4585_p3 = pnand %p4584_p0, %p4583_p13  ;;  %p4589_p9 = scmp.lt.u32.totalorder %s4587_s9, %s4582_s6 }
  0x35   : > { %p4591_p1 = scmp.lt.u32.totalorder %s4582_s6, %s4828_s4 }
  0x36   : > { %p4586_p5 = pneg %p4585_p3  ;;  %p4590_p2 = por %p4589_p9, %p4588_p7 }
  0x38   : > { %p4592_p4 = por %p4591_p1, %p4590_p2 }
  0x3a   : > { %p4593_p6 = pnand %p4592_p4, %p4586_p5 }
  0x3c   : > { %4596 = shalt.err (!%p4593_p6)
}
  0x3d   : > { %s4597_s27 = scalar_lea.vmem %s4834_s25, 16384  ;;  %s4695_s28 = smov [#allocation2]  }
  0x3e   : > { %p4598_p8 = scmp.ne.s32.totalorder %s4834_s25, %s4597_s27  ;;  %s4602_s29 = sshll.u32 %s4695_s28, 4  ;;  %s4603_s29 = int_to_ptr.vmem [resolvable:$false] %s4602_s29 }
  0x3f   : > { %s4604_s23 = scalar_lea.vmem %s4603_s29, 32768  ;;  %p4605_p3 = scmp.lt.s32.totalorder %s4834_s25, %s4603_s29 }
  0x40   : > { %p4600_p10 = pnand %p4598_p8, %p4584_p0  ;;  %p4606_p7 = scmp.lt.s32.totalorder %s4604_s23, %s4597_s27 }
  0x42   : > { %p4601_p13 = pneg %p4600_p10  ;;  %p4607_p9 = por %p4606_p7, %p4605_p3 }
  0x44   : > { %p4608_p2 = pnand %p4607_p9, %p4601_p13 }
  0x46   : > { %4611 = shalt.err (!%p4608_p2)
}
  0x47   : > { %s4696_s30 = smov 256   ;;  %s4697_s22 = smov 16  }
  0x48   : > { %4358 = dma.hbm_to_vmem [thread:$0]  (!%p4830_p11), %s4828_s4, 16384, %s4834_s25, %s4836_s5, %s4696_s30, %s4696_s30, %s4697_s22  }
  0x49   : > { %p7762_p0 = scmp.ne.s32.totalorder %s7757_s20, 0 }
  0x4a   : > { %s4867_s6 = sand.u32 (!%p7762_p0), 1, %s4678_s13   ;;  %p7763_p5 = scmp.ne.s32.totalorder (!%p7762_p0), %s7755_s18, 0 }
  0x4b   : > { %172 = sbr.rel (%p7762_p0) target bundleno = 1203 (0x4b3), region = 32  ;;  %s3991_s7 = sshll.u32 (!%p7762_p0), %s4867_s6, 10 }
  0x4c   : > { %s175_s8 = scalar_lea.sflag (!%p7762_p0), [#allocation3], %s4867_s6  ;;  %s4871_s9 = scalar_lea.vmem (!%p7762_p0), [#allocation2], %s3991_s7 }
  0x52   : > { %4661 = dma.done.wait (%p7763_p5), %s175_s8, 16384  }
  0x53   : > { %4663 = vsyncadd (%p7763_p5), %s175_s8, 4294950912  ;;  %p7764_p11 = scmp.eq.s32.totalorder %s4749_s16, 0 }
  0x55   : > { %4665 = dma.done.wait (%p7764_p11), [#allocation6], 4096   ;;  %p7765_p1 = pmov %p7764_p11 }
  0x56   : > { %s3993_s20 = sshll.u32 %s4867_s6, 9  ;;  %s4884_s25 = smov 0  }
  0x57   : > { %4667 = vsyncadd (%p7765_p1), [#allocation6], 4294963200  ;;  %s4882_s4 = scalar_lea.vmem [#allocation7], %s3993_s20 }
  0x58 LB: >> { %v283_v0 = vld [vmem:[#allocation5] sm:$0xff]  ;;  %v284_v1 = vld [vmem:[#allocation5 + $0x8] sm:$0xff]  ;;  %v285_v2 = vld [vmem:[#allocation5 + $0x10] sm:$0xff]  ;;  %v4698_v3 = vmov 0.0|0.0   ;;  %s3994_s18 = sshll.u32 %s4690_s25, 8  ;;  %s212_s25 = sadd.s32 1, %s4690_s25   ;;  %s4690_s25 = sphi %s4884_s25, %s212_s25  }
  0x59   : >> { %4135 = vmatprep.subr.bf16.mxu0 %v4698_v3  ;;  %4183 = vmatprep.subr.bf16.mxu1 %v4698_v3  ;;  %v4136_v4 = vpack.c.bf16 %v284_v1, %v283_v0  ;;  %v286_v5 = vld [vmem:[#allocation5 + $0x18] sm:$0xff]  ;;  %s214_s26 = sshra.s32 %s3994_s18, 3  ;;  %v287_v7 = vld [vmem:[#allocation5 + $0x20] sm:$0xff]  ;;  %v288_v8 = vld [vmem:[#allocation5 + $0x28] sm:$0xff]  ;;  %s5306_s28 = scalar_lea.vmem %s4882_s4, %s3994_s18 [#allocation7] }
  0x5a   : >> { %v4139_v6 = vpack.c.bf16 %v286_v5, %v285_v2  ;;  %s4133_s5 = sshll.u32 %s214_s26, 4  ;;  %v4142_v9 = vpack.c.bf16 %v288_v8, %v287_v7  ;;  %v289_v10 = vld [vmem:[#allocation5 + $0x30] sm:$0xff]  ;;  %v290_v11 = vld [vmem:[#allocation5 + $0x38] sm:$0xff]  ;;  %v291_v15 = vld [vmem:[#allocation5 + $0x40] sm:$0xff]  ;;  %p209_p4 = scmp.ge.s32.totalorder %s212_s25, 2  }
  0x5b   : >> { %4137 = vmatpush1.bf16.msra.mxu0 %v4136_v4  ;;  %4199 = vmatpush1.bf16.msra.mxu1 %v4136_v4  ;;  %s4897_s10 = scalar_lea.vmem %s4871_s9, %s4133_s5 [#allocation2]  ;;  %v4145_v13 = vpack.c.bf16 %v290_v11, %v289_v10  ;;  %v292_v16 = vld [vmem:[#allocation5 + $0x48] sm:$0xff]  ;;  %v293_v18 = vld [vmem:[#allocation5 + $0x50] sm:$0xff]  ;;  %v294_v19 = vld [vmem:[#allocation5 + $0x58] sm:$0xff]  ;;  %s3890_s23 = sshll.u32 (%p209_p4), %s4882_s4, 4  ;;  %s7704_s23 = int_to_ptr.vmem [resolvable:$true] %s3890_s23 }
  0x5c   : >> { %4138 = vmatprep.subr.bf16.mxu0 %v4698_v3  ;;  %4184 = vmatprep.subr.bf16.mxu1 %v4698_v3  ;;  %v220_v12 = vld [vmem:[%s4897_s10 + $0x8] sm:$0xff]  ;;  %v4148_v17 = vpack.c.bf16 %v292_v16, %v291_v15  ;;  %v4151_v20 = vpack.c.bf16 %v294_v19, %v293_v18  ;;  %v295_v21 = vld [vmem:[#allocation5 + $0x60] sm:$0xff]  ;;  %v297_v24 = vld [vmem:[#allocation5 + $0x70] sm:$0xff]  ;;  %s4612_s30 = scalar_lea.vmem (%p209_p4), %s7704_s23, 8192  ;;  %s4705_s9 = smov (%p209_p4), [#allocation7]  }
  0x5d   : >> { %v252_v14 = vld [vmem:[%s4897_s10 + $0x108] sm:$0xff]  ;;  %386 = vmatprep.mubr.f32.mxu0 %v220_v12  ;;  %v298_v25 = vld [vmem:[#allocation5 + $0x78] sm:$0xff]  ;;  %v299_v27 = vld [vmem:[#allocation5 + $0x80] sm:$0xff]  ;;  %p4613_p6 = scmp.ne.s32.totalorder (%p209_p4), %s7704_s23, %s4612_s30  ;;  %s4616_s25 = sshll.u32 (%p209_p4), %s4705_s9, 4  ;;  %s4617_s25 = int_to_ptr.vmem [resolvable:$false] %s4616_s25 }
  0x5e   : >> { %466 = vmatprep.mubr.f32.mxu1 %v252_v14  ;;  %v296_v22 = vld [vmem:[#allocation5 + $0x68] sm:$0xff]  ;;  %v4157_v26 = vpack.c.bf16 %v298_v25, %v297_v24  ;;  %v301_v30 = vld [vmem:[#allocation5 + $0x90] sm:$0xff]  ;;  %v302_v31 = vld [vmem:[#allocation5 + $0x98] sm:$0xff]  ;;  %p4619_p13 = scmp.lt.s32.totalorder (%p209_p4), %s7704_s23, %s4617_s25 }
  0x5f   : >> { %4140 = vmatpush1.bf16.msra.mxu0 %v4139_v6  ;;  %4200 = vmatpush1.bf16.msra.mxu1 %v4139_v6  ;;  %v4154_v23 = vpack.c.bf16 %v296_v22, %v295_v21  ;;  %v300_v28 = vld [vmem:[#allocation5 + $0x88] sm:$0xff]  ;;  %v4163_v32 = vpack.c.bf16 %v302_v31, %v301_v30  ;;  %v303_v33 = vld [vmem:[#allocation5 + $0xa0] sm:$0xff]  ;;  %v305_v36 = vld [vmem:[#allocation5 + $0xb0] sm:$0xff]  ;;  %p4614_p8 = pnand (%p209_p4), %p4613_p6, %p4819_p12 }
  0x60   : >> { %4141 = vmatprep.subr.bf16.mxu0 %v4698_v3  ;;  %4185 = vmatprep.subr.bf16.mxu1 %v4698_v3  ;;  %v4160_v29 = vpack.c.bf16 %v300_v28, %v299_v27  ;;  %v304_v34 = vld [vmem:[#allocation5 + $0xa8] sm:$0xff]  ;;  %v306_v37 = vld [vmem:[#allocation5 + $0xb8] sm:$0xff]  ;;  %v307_v39 = vld [vmem:[#allocation5 + $0xc0] sm:$0xff] }
  0x61   : >> { %v4166_v35 = vpack.c.bf16 %v304_v34, %v303_v33  ;;  %v4169_v38 = vpack.c.bf16 %v306_v37, %v305_v36  ;;  %v308_v40 = vld [vmem:[#allocation5 + $0xc8] sm:$0xff]  ;;  %v309_v42 = vld [vmem:[#allocation5 + $0xd0] sm:$0xff]  ;;  %v310_v43 = vld [vmem:[#allocation5 + $0xd8] sm:$0xff]  ;;  %p4615_p10 = pneg (%p209_p4), %p4614_p8 }
  0x62   : >> { %v4172_v41 = vpack.c.bf16 %v308_v40, %v307_v39  ;;  %v4175_v44 = vpack.c.bf16 %v310_v43, %v309_v42  ;;  %v311_v45 = vld [vmem:[#allocation5 + $0xe0] sm:$0xff]  ;;  %v312_v46 = vld [vmem:[#allocation5 + $0xe8] sm:$0xff]  ;;  %v313_v48 = vld [vmem:[#allocation5 + $0xf0] sm:$0xff] }
  0x63   : >> { %4143 = vmatpush1.bf16.msra.mxu0 %v4142_v9  ;;  %4201 = vmatpush1.bf16.msra.mxu1 %v4142_v9  ;;  %v4178_v47 = vpack.c.bf16 %v312_v46, %v311_v45  ;;  %v314_v49 = vld [vmem:[#allocation5 + $0xf8] sm:$0xff]  ;;  %v219_v51 = vld [vmem:[%s4897_s10] sm:$0xff]  ;;  %v221_v55 = vld [vmem:[%s4897_s10 + $0x10] sm:$0xff] }
  0x64   : >> { %4144 = vmatprep.subr.bf16.mxu0 %v4698_v3  ;;  %4186 = vmatprep.subr.bf16.mxu1 %v4698_v3  ;;  %v4181_v50 = vpack.c.bf16 %v314_v49, %v313_v48  ;;  %v251_v52 = vld [vmem:[%s4897_s10 + $0x100] sm:$0xff]  ;;  %v222_v53 = vld [vmem:[%s4897_s10 + $0x18] sm:$0xff]  ;;  %v253_v56 = vld [vmem:[%s4897_s10 + $0x110] sm:$0xff] }
  0x65   : >> { %v254_v54 = vld [vmem:[%s4897_s10 + $0x118] sm:$0xff]  ;;  %v224_v57 = vld [vmem:[%s4897_s10 + $0x28] sm:$0xff]  ;;  %v223_v59 = vld [vmem:[%s4897_s10 + $0x20] sm:$0xff] }
  0x66   : >> { %v256_v58 = vld [vmem:[%s4897_s10 + $0x128] sm:$0xff]  ;;  %v255_v60 = vld [vmem:[%s4897_s10 + $0x120] sm:$0xff]  ;;  %v226_v61 = vld [vmem:[%s4897_s10 + $0x38] sm:$0xff] }
  0x67   : >> { %4146 = vmatpush1.bf16.msra.mxu0 %v4145_v13  ;;  %4202 = vmatpush1.bf16.msra.mxu1 %v4145_v13  ;;  %v258_v62 = vld [vmem:[%s4897_s10 + $0x138] sm:$0xff]  ;;  %v225_v63 = vld [vmem:[%s4897_s10 + $0x30] sm:$0xff]  ;;  %v228_v1 = vld [vmem:[%s4897_s10 + $0x48] sm:$0xff] }
  0x68   : >> { %4147 = vmatprep.subr.bf16.mxu0 %v4698_v3  ;;  %4187 = vmatprep.subr.bf16.mxu1 %v4698_v3  ;;  %v257_v0 = vld [vmem:[%s4897_s10 + $0x130] sm:$0xff]  ;;  %v260_v2 = vld [vmem:[%s4897_s10 + $0x148] sm:$0xff]  ;;  %v259_v4 = vld [vmem:[%s4897_s10 + $0x140] sm:$0xff] }
  0x69   : >> { %v230_v5 = vld [vmem:[%s4897_s10 + $0x58] sm:$0xff]  ;;  %v229_v7 = vld [vmem:[%s4897_s10 + $0x50] sm:$0xff]  ;;  %v232_v9 = vld [vmem:[%s4897_s10 + $0x68] sm:$0xff] }
  0x6a   : >> { %v262_v6 = vld [vmem:[%s4897_s10 + $0x158] sm:$0xff]  ;;  %v261_v8 = vld [vmem:[%s4897_s10 + $0x150] sm:$0xff]  ;;  %v264_v10 = vld [vmem:[%s4897_s10 + $0x168] sm:$0xff] }
  0x6b   : >> { %4149 = vmatpush1.bf16.msra.mxu0 %v4148_v17  ;;  %4203 = vmatpush1.bf16.msra.mxu1 %v4148_v17  ;;  %v231_v11 = vld [vmem:[%s4897_s10 + $0x60] sm:$0xff]  ;;  %v234_v13 = vld [vmem:[%s4897_s10 + $0x78] sm:$0xff]  ;;  %v233_v15 = vld [vmem:[%s4897_s10 + $0x70] sm:$0xff] }
  0x6c   : >> { %4150 = vmatprep.subr.bf16.mxu0 %v4698_v3  ;;  %4188 = vmatprep.subr.bf16.mxu1 %v4698_v3  ;;  %v263_v12 = vld [vmem:[%s4897_s10 + $0x160] sm:$0xff]  ;;  %v266_v14 = vld [vmem:[%s4897_s10 + $0x178] sm:$0xff]  ;;  %v265_v16 = vld [vmem:[%s4897_s10 + $0x170] sm:$0xff] }
  0x6d   : >> { %v236_v17 = vld [vmem:[%s4897_s10 + $0x88] sm:$0xff]  ;;  %v235_v19 = vld [vmem:[%s4897_s10 + $0x80] sm:$0xff]  ;;  %v238_v21 = vld [vmem:[%s4897_s10 + $0x98] sm:$0xff] }
  0x6e   : >> { %v268_v18 = vld [vmem:[%s4897_s10 + $0x188] sm:$0xff]  ;;  %v270_v22 = vld [vmem:[%s4897_s10 + $0x198] sm:$0xff]  ;;  %v269_v24 = vld [vmem:[%s4897_s10 + $0x190] sm:$0xff] }
  0x6f   : >> { %4152 = vmatpush1.bf16.msra.mxu0 %v4151_v20  ;;  %4204 = vmatpush1.bf16.msra.mxu1 %v4151_v20  ;;  %v267_v20 = vld [vmem:[%s4897_s10 + $0x180] sm:$0xff]  ;;  %v240_v25 = vld [vmem:[%s4897_s10 + $0xa8] sm:$0xff]  ;;  %v274_v30 = vld [vmem:[%s4897_s10 + $0x1b8] sm:$0xff] }
  0x70   : >> { %4153 = vmatprep.subr.bf16.mxu0 %v4698_v3  ;;  %4189 = vmatprep.subr.bf16.mxu1 %v4698_v3  ;;  %v239_v27 = vld [vmem:[%s4897_s10 + $0xa0] sm:$0xff]  ;;  %v241_v31 = vld [vmem:[%s4897_s10 + $0xb0] sm:$0xff]  ;;  %v244_v33 = vld [vmem:[%s4897_s10 + $0xc8] sm:$0xff] }
  0x71   : >> { %v271_v28 = vld [vmem:[%s4897_s10 + $0x1a0] sm:$0xff]  ;;  %v276_v34 = vld [vmem:[%s4897_s10 + $0x1c8] sm:$0xff]  ;;  %v246_v37 = vld [vmem:[%s4897_s10 + $0xd8] sm:$0xff] }
  0x72   : >> { %v275_v36 = vld [vmem:[%s4897_s10 + $0x1c0] sm:$0xff]  ;;  %v245_v39 = vld [vmem:[%s4897_s10 + $0xd0] sm:$0xff]  ;;  %v280_v42 = vld [vmem:[%s4897_s10 + $0x1e8] sm:$0xff] }
  0x73   : >> { %4155 = vmatpush1.bf16.msra.mxu0 %v4154_v23  ;;  %4205 = vmatpush1.bf16.msra.mxu1 %v4154_v23  ;;  %v237_v23 = vld [vmem:[%s4897_s10 + $0x90] sm:$0xff]  ;;  %v247_v43 = vld [vmem:[%s4897_s10 + $0xe0] sm:$0xff]  ;;  %v250_v45 = vld [vmem:[%s4897_s10 + $0xf8] sm:$0xff] }
  0x74   : >> { %4156 = vmatprep.subr.bf16.mxu0 %v4698_v3  ;;  %4190 = vmatprep.subr.bf16.mxu1 %v4698_v3  ;;  %v277_v40 = vld [vmem:[%s4897_s10 + $0x1d0] sm:$0xff]  ;;  %v282_v46 = vld [vmem:[%s4897_s10 + $0x1f8] sm:$0xff]  ;;  %v4994_v49 = vld [vmem:[%s7750_s2] ss:$0 sm:$0xff] }
  0x75   : >> { %v281_v48 = vld [vmem:[%s4897_s10 + $0x1f0] sm:$0xff] }
  0x77   : >> { %4158 = vmatpush1.bf16.msra.mxu0 %v4157_v26  ;;  %4206 = vmatpush1.bf16.msra.mxu1 %v4157_v26  ;;  %v272_v26 = vld [vmem:[%s4897_s10 + $0x1a8] sm:$0xff] }
  0x78   : >> { %4159 = vmatprep.subr.bf16.mxu0 %v4698_v3  ;;  %4191 = vmatprep.subr.bf16.mxu1 %v4698_v3 }
  0x7b   : >> { %4161 = vmatpush1.bf16.msra.mxu0 %v4160_v29  ;;  %4207 = vmatpush1.bf16.msra.mxu1 %v4160_v29  ;;  %v242_v29 = vld [vmem:[%s4897_s10 + $0xb8] sm:$0xff] }
  0x7c   : >> { %4162 = vmatprep.subr.bf16.mxu0 %v4698_v3  ;;  %4192 = vmatprep.subr.bf16.mxu1 %v4698_v3 }
  0x7f   : >> { %4164 = vmatpush1.bf16.msra.mxu0 %v4163_v32  ;;  %4208 = vmatpush1.bf16.msra.mxu1 %v4163_v32  ;;  %v273_v32 = vld [vmem:[%s4897_s10 + $0x1b0] sm:$0xff] }
  0x80   : >> { %4165 = vmatprep.subr.bf16.mxu0 %v4698_v3  ;;  %4193 = vmatprep.subr.bf16.mxu1 %v4698_v3 }
  0x83   : >> { %4167 = vmatpush1.bf16.msra.mxu0 %v4166_v35  ;;  %4209 = vmatpush1.bf16.msra.mxu1 %v4166_v35  ;;  %v243_v35 = vld [vmem:[%s4897_s10 + $0xc0] sm:$0xff] }
  0x84   : >> { %4168 = vmatprep.subr.bf16.mxu0 %v4698_v3  ;;  %4194 = vmatprep.subr.bf16.mxu1 %v4698_v3 }
  0x87   : >> { %4170 = vmatpush1.bf16.msra.mxu0 %v4169_v38  ;;  %4210 = vmatpush1.bf16.msra.mxu1 %v4169_v38  ;;  %v278_v38 = vld [vmem:[%s4897_s10 + $0x1d8] sm:$0xff] }
  0x88   : >> { %4171 = vmatprep.subr.bf16.mxu0 %v4698_v3  ;;  %4195 = vmatprep.subr.bf16.mxu1 %v4698_v3 }
  0x8b   : >> { %4173 = vmatpush1.bf16.msra.mxu0 %v4172_v41  ;;  %4211 = vmatpush1.bf16.msra.mxu1 %v4172_v41  ;;  %v248_v41 = vld [vmem:[%s4897_s10 + $0xe8] sm:$0xff] }
  0x8c   : >> { %4174 = vmatprep.subr.bf16.mxu0 %v4698_v3  ;;  %4196 = vmatprep.subr.bf16.mxu1 %v4698_v3 }
  0x8f   : >> { %4176 = vmatpush1.bf16.msra.mxu0 %v4175_v44  ;;  %4212 = vmatpush1.bf16.msra.mxu1 %v4175_v44  ;;  %v279_v44 = vld [vmem:[%s4897_s10 + $0x1e0] sm:$0xff] }
  0x90   : >> { %4177 = vmatprep.subr.bf16.mxu0 %v4698_v3  ;;  %4197 = vmatprep.subr.bf16.mxu1 %v4698_v3 }
  0x93   : >> { %4179 = vmatpush1.bf16.msra.mxu0 %v4178_v47  ;;  %4213 = vmatpush1.bf16.msra.mxu1 %v4178_v47  ;;  %v249_v47 = vld [vmem:[%s4897_s10 + $0xf0] sm:$0xff] }
  0x94   : >> { %4180 = vmatprep.subr.bf16.mxu0 %v4698_v3  ;;  %4198 = vmatprep.subr.bf16.mxu1 %v4698_v3  ;;  %v227_v3 = vld [vmem:[%s4897_s10 + $0x40] sm:$0xff]  ;;  %s4134_s10 = sshll.u32 (%p209_p4), %s4749_s16, 13  ;;  %s4618_s16 = scalar_lea.vmem (%p209_p4), %s4617_s25, 16384 }
  0x95   : > { %s7701_s29 = scalar_lea.hbm (%p209_p4), %s7751_s3, %s4134_s10  ;;  %p4620_p3 = scmp.lt.s32.totalorder (%p209_p4), %s4618_s16, %s4612_s30 }
  0x97   : >> { %4182 = vmatpush1.bf16.msra.mxu0 %v4181_v50  ;;  %4214 = vmatpush1.bf16.msra.mxu1 %v4181_v50  ;;  %p4621_p7 = por (%p209_p4), %p4620_p3, %p4619_p13 }
  0x99   : > { %p4622_p9 = pnand (%p209_p4), %p4621_p7, %p4615_p10 }
  0x9a   : >> { %387 = vmatmul.mubr.f32.vlgmr.msra.gmra.mrb[0].mxu0 %v219_v51  ;;  %467 = vmatmul.mubr.f32.vlgmr.msra.gmra.mrb[0].mxu1 %v251_v52 }
  0x9b   : >> { %391 = vmatprep.mubr.f32.mxu0 %v222_v53  ;;  %471 = vmatprep.mubr.f32.mxu1 %v254_v54 }
  0x9e   : >> { %392 = vmatmul.mubr.f32.gmra.mrb[2].mxu0 %v221_v55  ;;  %472 = vmatmul.mubr.f32.gmra.mrb[2].mxu1 %v253_v56 }
  0x9f   : >> { %396 = vmatprep.mubr.f32.mxu0 %v224_v57  ;;  %476 = vmatprep.mubr.f32.mxu1 %v256_v58 }
  0xa2   : >> { %397 = vmatmul.mubr.f32.gmra.mrb[4].mxu0 %v223_v59  ;;  %477 = vmatmul.mubr.f32.gmra.mrb[4].mxu1 %v255_v60 }
  0xa3   : >> { %401 = vmatprep.mubr.f32.mxu0 %v226_v61  ;;  %481 = vmatprep.mubr.f32.mxu1 %v258_v62 }
  0xa6   : >> { %402 = vmatmul.mubr.f32.gmra.mrb[6].mxu0 %v225_v63  ;;  %482 = vmatmul.mubr.f32.gmra.mrb[6].mxu1 %v257_v0 }
  0xa7   : >> { %406 = vmatprep.mubr.f32.mxu0 %v228_v1  ;;  %486 = vmatprep.mubr.f32.mxu1 %v260_v2 }
  0xaa   : >> { %407 = vmatmul.mubr.f32.gmra.mrb[8].mxu0 %v227_v3  ;;  %487 = vmatmul.mubr.f32.gmra.mrb[8].mxu1 %v259_v4 }
  0xab   : >> { %411 = vmatprep.mubr.f32.mxu0 %v230_v5  ;;  %491 = vmatprep.mubr.f32.mxu1 %v262_v6 }
  0xae   : >> { %412 = vmatmul.mubr.f32.gmra.mrb[10].mxu0 %v229_v7  ;;  %492 = vmatmul.mubr.f32.gmra.mrb[10].mxu1 %v261_v8 }
  0xaf   : >> { %416 = vmatprep.mubr.f32.mxu0 %v232_v9  ;;  %496 = vmatprep.mubr.f32.mxu1 %v264_v10 }
  0xb2   : >> { %417 = vmatmul.mubr.f32.gmra.mrb[12].mxu0 %v231_v11  ;;  %497 = vmatmul.mubr.f32.gmra.mrb[12].mxu1 %v263_v12 }
  0xb3   : >> { %421 = vmatprep.mubr.f32.mxu0 %v234_v13  ;;  %501 = vmatprep.mubr.f32.mxu1 %v266_v14 }
  0xb6   : >> { %422 = vmatmul.mubr.f32.gmra.mrb[14].mxu0 %v233_v15  ;;  %502 = vmatmul.mubr.f32.gmra.mrb[14].mxu1 %v265_v16 }
  0xb7   : >> { %426 = vmatprep.mubr.f32.mxu0 %v236_v17  ;;  %506 = vmatprep.mubr.f32.mxu1 %v268_v18 }
  0xba   : >> { %427 = vmatmul.mubr.f32.gmra.mrb[16].mxu0 %v235_v19  ;;  %507 = vmatmul.mubr.f32.gmra.mrb[16].mxu1 %v267_v20 }
  0xbb   : >> { %431 = vmatprep.mubr.f32.mxu0 %v238_v21  ;;  %511 = vmatprep.mubr.f32.mxu1 %v270_v22 }
  0xbe   : >> { %432 = vmatmul.mubr.f32.gmra.mrb[18].mxu0 %v237_v23  ;;  %512 = vmatmul.mubr.f32.gmra.mrb[18].mxu1 %v269_v24 }
  0xbf   : >> { %436 = vmatprep.mubr.f32.mxu0 %v240_v25  ;;  %516 = vmatprep.mubr.f32.mxu1 %v272_v26 }
  0xc2   : >> { %437 = vmatmul.mubr.f32.gmra.mrb[20].mxu0 %v239_v27  ;;  %517 = vmatmul.mubr.f32.gmra.mrb[20].mxu1 %v271_v28 }
  0xc3   : >> { %441 = vmatprep.mubr.f32.mxu0 %v242_v29  ;;  %521 = vmatprep.mubr.f32.mxu1 %v274_v30 }
  0xc6   : >> { %442 = vmatmul.mubr.f32.gmra.mrb[22].mxu0 %v241_v31  ;;  %522 = vmatmul.mubr.f32.gmra.mrb[22].mxu1 %v273_v32 }
  0xc7   : >> { %446 = vmatprep.mubr.f32.mxu0 %v244_v33  ;;  %526 = vmatprep.mubr.f32.mxu1 %v276_v34  ;;  %v4699_v33 = vmov 683565275  }
  0xca   : >> { %447 = vmatmul.mubr.f32.gmra.mrb[24].mxu0 %v243_v35  ;;  %527 = vmatmul.mubr.f32.gmra.mrb[24].mxu1 %v275_v36 }
  0xcb   : >> { %451 = vmatprep.mubr.f32.mxu0 %v246_v37  ;;  %531 = vmatprep.mubr.f32.mxu1 %v278_v38  ;;  %v4700_v37 = vmov 2475754826  }
  0xce   : >> { %452 = vmatmul.mubr.f32.gmra.mrb[26].mxu0 %v245_v39  ;;  %532 = vmatmul.mubr.f32.gmra.mrb[26].mxu1 %v277_v40  ;;  %v4701_v39 = vmov 2131351028  }
  0xcf   : >> { %456 = vmatprep.mubr.f32.mxu0 %v248_v41  ;;  %536 = vmatprep.mubr.f32.mxu1 %v280_v42  ;;  %v4702_v41 = vmov 2102212464  }
  0xd2   : >> { %457 = vmatmul.mubr.f32.gmra.mrb[28].mxu0 %v247_v43  ;;  %537 = vmatmul.mubr.f32.gmra.mrb[28].mxu1 %v279_v44  ;;  %v4703_v43 = vmov 920167782  }
  0xd3   : >> { %461 = vmatprep.mubr.f32.mxu0 %v250_v45  ;;  %541 = vmatprep.mubr.f32.mxu1 %v282_v46 }
  0xd6   : >> { %462 = vmatmul.mubr.f32.gmra.mrb[30].mxu0 %v249_v47  ;;  %542 = vmatmul.mubr.f32.gmra.mrb[30].mxu1 %v281_v48 }
 0x16d   : >> { %v388_v50 = vpop.f32.mrb[0].mxu0  ;;  %v468_v51 = vpop.f32.mrb[0].mxu1 }
 0x16e   : >> { %v4997_v52 = vadd.f32 %v4994_v49, %v388_v50  ;;  %v5000_v53 = vadd.f32 %v4994_v49, %v468_v51  ;;  %v390_v54 = vpop.f32.mrb[1].mxu0  ;;  %v470_v55 = vpop.f32.mrb[1].mxu1  ;;  %v4704_v51 = vmov 1326507024  }
 0x170   : >> { %v547_v56 = vand.u32 2147483647, %v4997_v52  ;;  %v550_v57 = vand.u32 2139095040, %v4997_v52  ;;  %v2195_v58 = vand.u32 2147483647, %v5000_v53  ;;  %v2198_v59 = vand.u32 2139095040, %v5000_v53 }
 0x171   : >> { %v393_v60 = vpop.f32.mrb[2].mxu0  ;;  %v473_v61 = vpop.f32.mrb[2].mxu1  ;;  %vm549_vm13 = vcmp.lt.s32.totalorder %v4997_v52, 0 }
 0x172   : >> { %v551_v62 = vshrl.u32 %v550_v57, 23  ;;  %v554_v63 = vand.u32 8388607, %v547_v56  ;;  %v5009_v0 = vadd.f32 %v4994_v49, %v393_v60  ;;  %v395_v1 = vpop.f32.mrb[3].mxu0  ;;  %v2199_v2 = vshrl.u32 %v2198_v59, 23  ;;  %v475_v4 = vpop.f32.mrb[3].mxu1 }
 0x173   : >> { %v2202_v3 = vand.u32 8388607, %v2195_v58  ;;  %v5022_v24 = vadd.f32 %v4994_v49, %v473_v61 }
 0x174   : >> { %v3998_v5 = vadd.s32 4294967169, %v551_v62  ;;  %v4062_v6 = vadd.s32 4294967169, %v2199_v2  ;;  %v653_v7 = vand.u32 2139095040, %v5009_v0  ;;  %v555_v10 = vor.u32 8388608, %v554_v63 }
 0x175   : >> { %v5014_v8 = vpop.f32.mrb[4].mxu0  ;;  %v5016_v9 = vpop.f32.mrb[4].mxu1  ;;  %v2203_v12 = vor.u32 8388608, %v2202_v3  ;;  %v650_v14 = vand.u32 2147483647, %v5009_v0 }
 0x176   : >> { %v557_v11 = vadd.s32 1, %v3998_v5  ;;  %v2205_v13 = vadd.s32 1, %v4062_v6  ;;  %v654_v15 = vshrl.u32 %v653_v7, 23  ;;  %v400_v16 = vpop.f32.mrb[5].mxu0  ;;  %v480_v17 = vpop.f32.mrb[5].mxu1  ;;  %v5026_v27 = vshll.u32 %v555_v10, 8 }
 0x177   : >> { %v5030_v29 = vshll.u32 %v2203_v12, 8  ;;  %v5034_v30 = vand.u32 8388607, %v650_v14 }
 0x178   : >> { %vm558_vm0 = vcmp.gt.s32.totalorder %v557_v11, 0  ;;  %vm2206_vm1 = vcmp.gt.s32.totalorder %v2205_v13, 0  ;;  %v4002_v19 = vadd.s32 4294967169, %v654_v15 }
 0x179   : >> { %v559_v18 = vsel %vm558_vm0, %v557_v11, 0  ;;  %v5019_v20 = vpop.f32.mrb[6].mxu0  ;;  %v2207_v23 = vsel %vm2206_vm1, %v2205_v13, 0  ;;  %v5024_v25 = vpop.f32.mrb[6].mxu1 }
 0x17a   : >> { %v560_v21 = vshrl.u32 %v559_v18, 5  ;;  %v561_v22 = vand.u32 31, %v559_v18  ;;  %v405_v26 = vpop.f32.mrb[7].mxu0  ;;  %v5028_v28 = vshrl.u32 %v2207_v23, 5  ;;  %v485_v31 = vpop.f32.mrb[7].mxu1  ;;  %v2209_v35 = vand.u32 31, %v2207_v23 }
 0x17b   : >> { %v5037_v36 = vadd.s32 1, %v4002_v19 }
 0x17c   : >> { %v562_v32 = vsub.s32 32, %v561_v22  ;;  %v564_v34 = vshll.u32 %v4699_v33, %v561_v22  ;;  %v567_v38 = vshll.u32 %v4700_v37, %v561_v22  ;;  %v570_v40 = vshll.u32 %v4701_v39, %v561_v22 }
 0x17d   : >> { %v573_v42 = vshll.u32 %v4702_v41, %v561_v22  ;;  %v576_v44 = vshll.u32 %v4703_v43, %v561_v22  ;;  %vm579_vm2 = vcmp.lt.s32.totalorder %v560_v21, 1  ;;  %vm580_vm3 = vcmp.lt.s32.totalorder %v560_v21, 2 }
 0x17e   : >> { %v565_v45 = vshrl.u32 %v4700_v37, %v562_v32  ;;  %v568_v46 = vshrl.u32 %v4701_v39, %v562_v32  ;;  %v571_v47 = vshrl.u32 %v4702_v41, %v562_v32  ;;  %v563_v48 = vshrl.u32 %v4699_v33, %v562_v32 }
 0x17f   : >> { %v574_v50 = vshrl.u32 %v4703_v43, %v562_v32  ;;  %v577_v54 = vshrl.u32 %v4704_v51, %v562_v32  ;;  %v2210_v60 = vsub.s32 32, %v2209_v35  ;;  %vm581_vm4 = vcmp.lt.s32.totalorder %v560_v21, 3 }
 0x180   : >> { %v566_v55 = vor.u32 %v565_v45, %v564_v34  ;;  %v569_v57 = vor.u32 %v568_v46, %v567_v38  ;;  %v572_v59 = vor.u32 %v571_v47, %v570_v40  ;;  %vm582_vm5 = vcmp.lt.s32.totalorder %v560_v21, 4 }
 0x181   : >> { %v575_v61 = vor.u32 %v574_v50, %v573_v42  ;;  %v578_v62 = vor.u32 %v577_v54, %v576_v44  ;;  %v2212_v7 = vshll.u32 %v4699_v33, %v2209_v35  ;;  %v2213_v12 = vshrl.u32 %v4700_v37, %v2210_v60 }
 0x182   : >> { %v583_v63 = vsel %vm579_vm2, %v563_v48, %v566_v55  ;;  %v584_v1 = vsel %vm582_vm5, %v572_v59, 2102212464  ;;  %v587_v2 = vsel %vm579_vm2, %v566_v55, %v569_v57  ;;  %v591_v3 = vsel %vm579_vm2, %v569_v57, %v572_v59 }
 0x183   : >> { %v585_v4 = vsel %vm581_vm4, %v569_v57, %v584_v1  ;;  %v588_v5 = vsel %vm582_vm5, %v575_v61, 920167782  ;;  %v592_v6 = vsel %vm582_vm5, %v578_v62, 1326507024  ;;  %v2215_v13 = vshll.u32 %v4700_v37, %v2209_v35 }
 0x184   : >> { %v589_v10 = vsel %vm581_vm4, %v572_v59, %v588_v5  ;;  %v593_v11 = vsel %vm581_vm4, %v575_v61, %v592_v6  ;;  %v586_v15 = vsel %vm580_vm3, %v583_v63, %v585_v4  ;;  %v2216_v18 = vshrl.u32 %v4701_v39, %v2210_v60 }
 0x185   : >> { %v590_v16 = vsel %vm580_vm3, %v587_v2, %v589_v10  ;;  %v594_v17 = vsel %vm580_vm3, %v591_v3, %v593_v11  ;;  %v2214_v31 = vor.u32 %v2213_v12, %v2212_v7  ;;  %v2218_v34 = vshll.u32 %v4701_v39, %v2209_v35  ;;  %v5092_v10 = vpop.f32.mrb[8].mxu0 }
 0x186   : >> { %v5060_v19 = vmul.u32.u64.low %v5026_v27, %v594_v17  ;;  %v5061_v22 = vmul.u32.u64.high %v5026_v27, %v594_v17, %v5060_v19  ;;  %v5064_v23 = vmul.u32.u64.low %v5026_v27, %v590_v16  ;;  %v5065_v26 = vmul.u32.u64.high %v5026_v27, %v590_v16, %v5064_v23 }
 0x187   : >> { %v2217_v32 = vor.u32 %v2216_v18, %v2215_v13  ;;  %v2219_v38 = vshrl.u32 %v4702_v41, %v2210_v60  ;;  %v2211_v40 = vshrl.u32 %v4699_v33, %v2210_v60  ;;  %v2221_v21 = vshll.u32 %v4702_v41, %v2209_v35 }
 0x188   : >> { %v2222_v42 = vshrl.u32 %v4703_v43, %v2210_v60  ;;  %v2225_v44 = vshrl.u32 %v4704_v51, %v2210_v60  ;;  %v602_v45 = vmul.u32 %v5026_v27, %v586_v15  ;;  %v2224_v47 = vshll.u32 %v4703_v43, %v2209_v35  ;;  %v410_v15 = vpop.f32.mrb[9].mxu0 }
 0x189   : >> { %v2220_v46 = vor.u32 %v2219_v38, %v2218_v34  ;;  %vm2227_vm6 = vcmp.lt.s32.totalorder %v5028_v28, 1  ;;  %vm604_vm7 = vc.u32 %v5061_v22, %v5064_v23  ;;  %v605_v48 = vadd.s32 1, %v5065_v26 }
 0x18a   : >> { %v2223_v50 = vor.u32 %v2222_v42, %v2221_v21  ;;  %vm2228_vm8 = vcmp.lt.s32.totalorder %v5028_v28, 2  ;;  %v2226_v54 = vor.u32 %v2225_v44, %v2224_v47  ;;  %vm2229_vm9 = vcmp.lt.s32.totalorder %v5028_v28, 3 }
 0x18b   : >> { %vm2230_vm10 = vcmp.lt.s32.totalorder %v5028_v28, 4  ;;  %v2235_v55 = vsel %vm2227_vm6, %v2214_v31, %v2217_v32  ;;  %v606_v27 = vsel %vm604_vm7, %v605_v48, %v5065_v26  ;;  %v2239_v35 = vsel %vm2227_vm6, %v2217_v32, %v2220_v46 }
 0x18c   : >> { %v2232_v57 = vsel %vm2230_vm10, %v2220_v46, 2102212464  ;;  %v2236_v59 = vsel %vm2230_vm10, %v2223_v50, 920167782  ;;  %v607_v60 = vadd.s32 %v606_v27, %v602_v45  ;;  %v2231_v61 = vsel %vm2227_vm6, %v2211_v40, %v2214_v31 }
 0x18d   : >> { %v2237_v62 = vsel %vm2229_vm9, %v2220_v46, %v2236_v59  ;;  %v2240_v63 = vsel %vm2230_vm10, %v2226_v54, 1326507024  ;;  %v2233_v1 = vsel %vm2229_vm9, %v2217_v32, %v2232_v57  ;;  %vm661_vm11 = vcmp.gt.s32.totalorder %v5037_v36, 0 }
 0x18e   : >> { %v2238_v2 = vsel %vm2228_vm8, %v2235_v55, %v2237_v62  ;;  %v2241_v3 = vsel %vm2229_vm9, %v2223_v50, %v2240_v63  ;;  %v608_v4 = vadd.s32 536870912, %v607_v60  ;;  %v662_v13 = vsel %vm661_vm11, %v5037_v36, 0 }
 0x18f   : >> { %v2242_v5 = vsel %vm2228_vm8, %v2239_v35, %v2241_v3  ;;  %v5088_v6 = vmul.u32.u64.low %v5030_v29, %v2238_v2  ;;  %v5089_v7 = vmul.u32.u64.high %v5030_v29, %v2238_v2, %v5088_v6  ;;  %v2234_v17 = vsel %vm2228_vm8, %v2231_v61, %v2233_v1 }
 0x190   : >> { %v5095_v11 = vmul.u32.u64.low %v5030_v29, %v2242_v5  ;;  %v5096_v12 = vmul.u32.u64.high %v5030_v29, %v2242_v5, %v5095_v11  ;;  %v5099_v16 = vshrl.u32 %v608_v4, 30  ;;  %v664_v18 = vand.u32 31, %v662_v13 }
 0x191   : >> { %v2301_v19 = vand.u32 2139095040, %v5022_v24  ;;  %v2253_v31 = vadd.s32 1, %v5089_v7  ;;  %v658_v32 = vor.u32 8388608, %v5034_v30  ;;  %v2250_v38 = vmul.u32 %v5030_v29, %v2234_v17 }
 0x192   : >> { %v610_v26 = vshll.u32 %v5099_v16, 30  ;;  %v665_v34 = vsub.s32 32, %v664_v18  ;;  %vm2252_vm12 = vc.u32 %v5096_v12, %v5088_v6  ;;  %v2298_v46 = vand.u32 2147483647, %v5022_v24 }
 0x193   : >> { %v2254_v40 = vsel %vm2252_vm12, %v2253_v31, %v5089_v7  ;;  %v2302_v28 = vshrl.u32 %v2301_v19, 23  ;;  %v5112_v45 = vshll.u32 %v658_v32, 8  ;;  %v603_v30 = vadd.s32 %v5064_v23, %v5061_v22 }
 0x194   : >> { %v611_v36 = vsub.s32 %v607_v60, %v610_v26  ;;  %v2255_v21 = vadd.s32 %v2254_v40, %v2250_v38  ;;  %v668_v44 = vshrl.u32 %v4700_v37, %v665_v34  ;;  %v5116_v48 = vshrl.u32 %v662_v13, 5 }
 0x195   : >> { %v671_v29 = vshrl.u32 %v4701_v39, %v665_v34  ;;  %v667_v54 = vshll.u32 %v4699_v33, %v664_v18  ;;  %v674_v55 = vshrl.u32 %v4702_v41, %v665_v34  ;;  %v4066_v27 = vadd.s32 4294967169, %v2302_v28 }
 0x196   : >> { %v613_v42 = vsub.s32 0, %v611_v36  ;;  %v2256_v47 = vadd.s32 536870912, %v2255_v21  ;;  %v670_v59 = vshll.u32 %v4700_v37, %v664_v18  ;;  %v676_v35 = vshll.u32 %v4702_v41, %v664_v18 }
 0x197   : >> { %v677_v60 = vshrl.u32 %v4703_v43, %v665_v34  ;;  %v669_v23 = vor.u32 %v668_v44, %v667_v54  ;;  %v673_v61 = vshll.u32 %v4701_v39, %v664_v18  ;;  %v5129_v62 = vand.u32 8388607, %v2298_v46 }
 0x198   : >> { %v3999_v50 = vmin.u32 %v613_v42, %v611_v36  ;;  %v5121_v57 = vshrl.u32 %v2256_v47, 30  ;;  %v672_v1 = vor.u32 %v671_v29, %v670_v59  ;;  %v680_v3 = vshrl.u32 %v4704_v51, %v665_v34 }
 0x199   : >> { %v678_v2 = vor.u32 %v677_v60, %v676_v35  ;;  %v633_v5 = vsub.s32 4, %v5099_v16  ;;  %v675_v7 = vor.u32 %v674_v55, %v673_v61  ;;  %v5136_v11 = vadd.f32 %v4994_v49, %v5014_v8 }
 0x19a   : >> { %v615_v22 = vclz %v3999_v50  ;;  %v2258_v63 = vshll.u32 %v5121_v57, 30  ;;  %v666_v15 = vshrl.u32 %v4699_v33, %v665_v34  ;;  %v679_v17 = vshll.u32 %v4703_v43, %v664_v18 }
 0x19b   : >> { %vm685_vm14 = vcmp.lt.s32.totalorder %v5116_v48, 4  ;;  %vm682_vm0 = vcmp.lt.s32.totalorder %v5116_v48, 1  ;;  %vm684_vm1 = vcmp.lt.s32.totalorder %v5116_v48, 3  ;;  %vm5153_vm2 = vcmp.le.f32.partialorder %v547_v56, 0.7853982 }
 0x19c   : >> { %v4000_v4 = vadd.s32 4294967294, %v615_v22  ;;  %v5139_v13 = vsub.s32 %v2255_v21, %v2258_v63  ;;  %v691_v19 = vsel %vm685_vm14, %v678_v2, 920167782  ;;  %v681_v31 = vor.u32 %v680_v3, %v679_v17 }
 0x19d   : >> { %v690_v32 = vsel %vm682_vm0, %v669_v23, %v672_v1  ;;  %vm683_vm3 = vcmp.lt.s32.totalorder %v5116_v48, 2  ;;  %v692_v40 = vsel %vm684_vm1, %v675_v7, %v691_v19  ;;  %v686_v42 = vsel %vm682_vm0, %v666_v15, %v669_v23  ;;  %v5181_v23 = vpop.f32.mrb[8].mxu1 }
 0x19e   : >> { %vm4001_vm15 = vcmp.lt.s32.totalorder %v4000_v4, 0  ;;  %v2261_v26 = vsub.s32 0, %v5139_v13  ;;  %v687_v44 = vsel %vm685_vm14, %v675_v7, 2102212464  ;;  %v693_v29 = vsel %vm683_vm3, %v690_v32, %v692_v40 }
 0x19f   : >> { %v618_v8 = vsel %vm4001_vm15, 0, %v4000_v4  ;;  %v694_v50 = vsel %vm682_vm0, %v672_v1, %v675_v7  ;;  %v5172_v55 = vmul.u32.u64.low %v5112_v45, %v693_v29  ;;  %v5173_v59 = vmul.u32.u64.high %v5112_v45, %v693_v29, %v5172_v55  ;;  %v490_v7 = vpop.f32.mrb[9].mxu1 }
 0x1a0   : >> { %v619_v34 = vsub.s32 32, %v618_v8  ;;  %v623_v38 = vsub.s32 4294967266, %v618_v8  ;;  %v620_v28 = vshll.u32 %v611_v36, %v618_v8  ;;  %v4063_v21 = vmin.u32 %v2261_v26, %v5139_v13 }
 0x1a1   : >> { %v695_v36 = vsel %vm685_vm14, %v681_v31, 1326507024  ;;  %vm2197_vm4 = vcmp.lt.s32.totalorder %v5000_v53, 0  ;;  %v2251_v61 = vadd.s32 %v5088_v6, %v5096_v12  ;;  %v2308_v4 = vadd.s32 1, %v4066_v27 }
 0x1a2   : >> { %v621_v56 = vshrl.u32 %v603_v30, %v619_v34  ;;  %v624_v47 = vadd.s32 127, %v623_v38  ;;  %v2263_v54 = vclz %v4063_v21  ;;  %v688_v30 = vsel %vm684_vm1, %v672_v1, %v687_v44 }
 0x1a3   : >> { %v696_v22 = vsel %vm684_vm1, %v678_v2, %v695_v36  ;;  %v634_v17 = vsel %vm549_vm13, %v633_v5, %v5099_v16  ;;  %v689_v2 = vsel %vm683_vm3, %v686_v42, %v688_v30  ;;  %v708_v6 = vadd.s32 1, %v5173_v59 }
 0x1a4   : >> { %v622_v35 = vor.u32 %v621_v56, %v620_v28  ;;  %v625_v60 = vshll.u32 %v624_v47, 23  ;;  %v4064_v63 = vadd.s32 4294967294, %v2263_v54  ;;  %v697_v3 = vsel %vm683_vm3, %v694_v50, %v696_v22 }
 0x1a5   : >> { %v5191_v1 = vmul.u32.u64.low %v5112_v45, %v697_v3  ;;  %v5192_v19 = vmul.u32.u64.high %v5112_v45, %v697_v3, %v5191_v1  ;;  %vm2309_vm6 = vcmp.gt.s32.totalorder %v2308_v4, 0  ;;  %v636_v31 = vsel %vm5153_vm2, 0, %v634_v17 }
 0x1a6   : >> { %v626_v15 = vor.u32 4788187, %v625_v60  ;;  %vm4065_vm5 = vcmp.lt.s32.totalorder %v4064_v63, 0  ;;  %v629_v8 = vcvt.s32.f32 %v622_v35  ;;  %v2310_v26 = vsel %vm2309_vm6, %v2308_v4, 0 }
 0x1a7   : >> { %v2266_v27 = vsel %vm4065_vm5, 0, %v4064_v63  ;;  %v2281_v5 = vsub.s32 4, %v5121_v57  ;;  %v705_v38 = vmul.u32 %v5112_v45, %v689_v2  ;;  %vm707_vm7 = vc.u32 %v5192_v19, %v5172_v55 }
 0x1a8   : >> { %v627_v12 = vand.u32 2147483647, %v626_v15  ;;  %v2267_v32 = vsub.s32 32, %v2266_v27  ;;  %v2271_v16 = vsub.s32 4294967266, %v2266_v27  ;;  %v2312_v48 = vand.u32 31, %v2310_v26 }
 0x1a9   : >> { %vm5205_vm8 = vcmp.le.f32.partialorder %v2195_v58, 0.7853982  ;;  %v2268_v28 = vshll.u32 %v5139_v13, %v2266_v27  ;;  %v709_v44 = vsel %vm707_vm7, %v708_v6, %v5173_v59  ;;  %v5211_v47 = vand.u32 3, %v636_v31 }
 0x1aa   : >> { %v630_v34 = vmul.f32 %v629_v8, %v627_v12  ;;  %v2269_v21 = vshrl.u32 %v2251_v61, %v2267_v32  ;;  %v2272_v42 = vadd.s32 127, %v2271_v16  ;;  %v710_v45 = vadd.s32 %v709_v44, %v705_v38 }
 0x1ab   : >> { %v2313_v29 = vsub.s32 32, %v2312_v48  ;;  %v5216_v58 = vsel %vm2197_vm4, %v2281_v5, %v5121_v57  ;;  %v2306_v36 = vor.u32 8388608, %v5129_v62  ;;  %v5221_v60 = vshrl.u32 %v2310_v26, 5 }
 0x1ac   : >> { %v631_v56 = vxor.u32 2147483648, %v630_v34  ;;  %v2270_v50 = vor.u32 %v2269_v21, %v2268_v28  ;;  %v2273_v54 = vshll.u32 %v2272_v42, 23  ;;  %v711_v35 = vadd.s32 536870912, %v710_v45 }
 0x1ad   : >> { %v2315_v59 = vshll.u32 %v4699_v33, %v2312_v48  ;;  %v2316_v61 = vshrl.u32 %v4700_v37, %v2313_v29  ;;  %v2319_v57 = vshrl.u32 %v4701_v39, %v2313_v29  ;;  %v2321_v62 = vshll.u32 %v4701_v39, %v2312_v48 }
 0x1ae   : >> { %v632_v13 = vsel %vm549_vm13, %v631_v56, %v630_v34  ;;  %v2274_v22 = vor.u32 4788187, %v2273_v54  ;;  %v5229_v63 = vshrl.u32 %v711_v35, 30  ;;  %v2322_v3 = vshrl.u32 %v4702_v41, %v2313_v29 }
 0x1af   : >> { %v635_v30 = vsel %vm5153_vm2, %v4997_v52, %v632_v13  ;;  %v2277_v7 = vcvt.s32.f32 %v2270_v50  ;;  %v2318_v15 = vshll.u32 %v4700_v37, %v2312_v48  ;;  %v2324_v1 = vshll.u32 %v4702_v41, %v2312_v48 }
 0x1b0   : >> { %4421 = vcosq.f32 %v635_v30  ;;  %v2275_v4 = vand.u32 2147483647, %v2274_v22  ;;  %v713_v18 = vshll.u32 %v5229_v63, 30  ;;  %v2323_v17 = vor.u32 %v2322_v3, %v2321_v62 }
 0x1b1   : >> { %4423 = vsinq.f32 %v635_v30  ;;  %v2325_v2 = vshrl.u32 %v4703_v43, %v2313_v29  ;;  %v2317_v12 = vor.u32 %v2316_v61, %v2315_v59  ;;  %v2320_v8 = vor.u32 %v2319_v57, %v2318_v15 }
 0x1b2   : >> { %v2278_v6 = vmul.f32 %v2277_v7, %v2275_v4  ;;  %v2328_v27 = vshrl.u32 %v4704_v51, %v2313_v29  ;;  %vm645_vm9 = vcmp.eq.s32.totalorder %v5211_v47, 2  ;;  %v2284_v26 = vsel %vm5205_vm8, 0, %v5216_v58 }
 0x1b3   : >> { %v5242_v31 = vsub.s32 %v710_v45, %v713_v18  ;;  %v2326_v32 = vor.u32 %v2325_v2, %v2324_v1  ;;  %vm642_vm10 = vcmp.eq.s32.totalorder %v5211_v47, 0  ;;  %v2327_v5 = vshll.u32 %v4703_v43, %v2312_v48 }
 0x1b4   : >> { %v2279_v16 = vxor.u32 2147483648, %v2278_v6  ;;  %vm2333_vm11 = vcmp.lt.s32.totalorder %v5221_v60, 4  ;;  %v5247_v34 = vshll.u32 %v2306_v36, 8  ;;  %vm641_vm12 = vcmp.lt.s32.totalorder %v5211_v47, 2 }
 0x1b5   : >> { %v716_v38 = vsub.s32 0, %v5242_v31  ;;  %v2314_v28 = vshrl.u32 %v4699_v33, %v2313_v29  ;;  %vm2330_vm13 = vcmp.lt.s32.totalorder %v5221_v60, 1  ;;  %v2335_v21 = vsel %vm2333_vm11, %v2323_v17, 2102212464 }
 0x1b6   : >> { %vm639_vm14 = vweird.f32 %v4997_v52  ;;  %v2280_v48 = vsel %vm2197_vm4, %v2279_v16, %v2278_v6  ;;  %v2329_v42 = vor.u32 %v2328_v27, %v2327_v5  ;;  %v2338_v44 = vsel %vm2330_vm13, %v2317_v12, %v2320_v8 }
 0x1b7   : >> { %v2339_v56 = vsel %vm2333_vm11, %v2326_v32, 920167782  ;;  %v2283_v45 = vsel %vm5205_vm8, %v5000_v53, %v2280_v48  ;;  %v4003_v29 = vmin.u32 %v716_v38, %v5242_v31  ;;  %vm2331_vm15 = vcmp.lt.s32.totalorder %v5221_v60, 2 }
 0x1b8   : >> { %vm2332_vm0 = vcmp.lt.s32.totalorder %v5221_v60, 3  ;;  %4425 = vcosq.f32 %v2283_v45  ;;  %v2334_v50 = vsel %vm2330_vm13, %v2314_v28, %v2317_v12  ;;  %vm652_vm1 = vcmp.lt.s32.totalorder %v5009_v0, 0  ;;  %v5321_v28 = vpop.f32.mrb[10].mxu0 }
 0x1b9   : >> { %v2336_v54 = vsel %vm2332_vm0, %v2320_v8, %v2335_v21  ;;  %v2340_v58 = vsel %vm2332_vm0, %v2323_v17, %v2339_v56  ;;  %4427 = vsinq.f32 %v2283_v45  ;;  %v718_v40 = vclz %v4003_v29  ;;  %v415_v52 = vpop.f32.mrb[11].mxu0 }
 0x1ba   : >> { %v4422_v36 = vpop.eup %4421  ;;  %v2341_v13 = vsel %vm2331_vm15, %v2338_v44, %v2340_v58  ;;  %v2342_v35 = vsel %vm2330_vm13, %v2320_v8, %v2323_v17  ;;  %v2343_v22 = vsel %vm2333_vm11, %v2329_v42, 1326507024  ;;  %v2288_v3 = vand.u32 3, %v2284_v26 }
 0x1bb   : >> { %v4424_v59 = vpop.eup %4423  ;;  %v646_v30 = vxor.u32 2147483648, %v4422_v36  ;;  %v5282_v61 = vmul.u32.u64.low %v5247_v34, %v2341_v13  ;;  %v5283_v57 = vmul.u32.u64.high %v5247_v34, %v2341_v13, %v5282_v61  ;;  %v4004_v4 = vadd.s32 4294967294, %v718_v40 }
 0x1bc   : >> { %v643_v62 = vxor.u32 2147483648, %v4424_v59  ;;  %v2344_v7 = vsel %vm2332_vm0, %v2326_v32, %v2343_v22  ;;  %vm5292_vm2 = vcmp.le.f32.partialorder %v650_v14, 0.7853982  ;;  %v736_v17 = vsub.s32 4, %v5229_v63 }
 0x1bd   : >> { %v647_v15 = vsel %vm645_vm9, %v646_v30, %v4424_v59  ;;  %v2337_v1 = vsel %vm2331_vm15, %v2334_v50, %v2336_v54  ;;  %v2345_v2 = vsel %vm2331_vm15, %v2342_v35, %v2344_v7  ;;  %vm4005_vm3 = vcmp.lt.s32.totalorder %v4004_v4, 0 }
 0x1be   : >> { %v644_v6 = vsel %vm642_vm10, %v4422_v36, %v643_v62  ;;  %v5309_v14 = vmul.u32.u64.low %v5247_v34, %v2345_v2  ;;  %v5310_v12 = vmul.u32.u64.high %v5247_v34, %v2345_v2, %v5309_v14  ;;  %v721_v27 = vsel %vm4005_vm3, 0, %v4004_v4 }
 0x1bf   : >> { %v648_v8 = vsel %vm641_vm12, %v644_v6, %v647_v15  ;;  %v2356_v26 = vadd.s32 1, %v5283_v57  ;;  %v756_v60 = vand.u32 2139095040, %v5136_v11  ;;  %vm2287_vm4 = vweird.f32 %v5000_v53 }
 0x1c0   : >> { %v649_v32 = vsel %vm639_vm14, nan, %v648_v8  ;;  %v706_v16 = vadd.s32 %v5172_v55, %v5192_v19  ;;  %v722_v5 = vsub.s32 32, %v721_v27  ;;  %v726_v38 = vsub.s32 4294967266, %v721_v27 }
 0x1c1   : >> { %3844 = vst [vmem:[%s5306_s28] sm:$0xff] %v649_v32  ;;  %vm2289_vm5 = vcmp.lt.s32.totalorder %v2288_v3, 2  ;;  %v2353_v47 = vmul.u32 %v5247_v34, %v2337_v1  ;;  %v757_v21 = vshrl.u32 %v756_v60, 23  ;;  %v5327_v48 = vadd.f32 %v4994_v49, %v5016_v9 }
 0x1c2   : >> { %v723_v42 = vshll.u32 %v5242_v31, %v721_v27  ;;  %v724_v44 = vshrl.u32 %v706_v16, %v722_v5  ;;  %v727_v56 = vadd.s32 127, %v726_v38  ;;  %vm2355_vm6 = vc.u32 %v5310_v12, %v5282_v61  ;;  %v4426_v55 = vpop.eup %4425 }
 0x1c3   : >> { %v737_v19 = vsel %vm652_vm1, %v736_v17, %v5229_v63  ;;  %v2357_v34 = vsel %vm2355_vm6, %v2356_v26, %v5283_v57  ;;  %v753_v45 = vand.u32 2147483647, %v5136_v11  ;;  %v4006_v29 = vadd.s32 4294967169, %v757_v21  ;;  %v4428_v49 = vpop.eup %4427 }
 0x1c4   : >> { %v2294_v9 = vxor.u32 2147483648, %v4426_v55  ;;  %v725_v50 = vor.u32 %v724_v44, %v723_v42  ;;  %v728_v54 = vshll.u32 %v727_v56, 23  ;;  %v2358_v31 = vadd.s32 %v2357_v34, %v2353_v47 }
 0x1c5   : >> { %vm2290_vm7 = vcmp.eq.s32.totalorder %v2288_v3, 0  ;;  %v2291_v58 = vxor.u32 2147483648, %v4428_v49  ;;  %vm2293_vm8 = vcmp.eq.s32.totalorder %v2288_v3, 2  ;;  %v763_v36 = vadd.s32 1, %v4006_v29 }
 0x1c6   : >> { %v2295_v40 = vsel %vm2293_vm8, %v2294_v9, %v4428_v49  ;;  %v729_v13 = vor.u32 4788187, %v728_v54  ;;  %v739_v63 = vsel %vm5292_vm2, 0, %v737_v19  ;;  %v2359_v35 = vadd.s32 536870912, %v2358_v31 }
 0x1c7   : >> { %v2292_v59 = vsel %vm2290_vm7, %v4426_v55, %v2291_v58  ;;  %v732_v30 = vcvt.s32.f32 %v725_v50  ;;  %v760_v22 = vand.u32 8388607, %v753_v45  ;;  %vm764_vm9 = vcmp.gt.s32.totalorder %v763_v36, 0 }
 0x1c8   : >> { %v2296_v57 = vsel %vm2289_vm5, %v2292_v59, %v2295_v40  ;;  %v730_v62 = vand.u32 2147483647, %v729_v13  ;;  %v5342_v4 = vshrl.u32 %v2359_v35, 30  ;;  %v765_v7 = vsel %vm764_vm9, %v763_v36, 0 }
 0x1c9   : >> { %v2297_v15 = vsel %vm2287_vm4, nan, %v2296_v57  ;;  %v767_v17 = vand.u32 31, %v765_v7  ;;  %v5348_v6 = vand.u32 3, %v739_v63  ;;  %v2401_v8 = vand.u32 2147483647, %v5327_v48 }
 0x1ca   : >> { %3860 = vst [vmem:[%s5306_s28 + $0x80] sm:$0xff] %v2297_v15  ;;  %v733_v1 = vmul.f32 %v732_v30, %v730_v62  ;;  %v2361_v2 = vshll.u32 %v5342_v4, 30  ;;  %v761_v26 = vor.u32 8388608, %v760_v22  ;;  %v2404_v60 = vand.u32 2139095040, %v5327_v48 }
 0x1cb   : >> { %v768_v14 = vsub.s32 32, %v767_v17  ;;  %v5354_v32 = vshrl.u32 %v765_v7, 5  ;;  %v770_v53 = vshll.u32 %v4699_v33, %v767_v17  ;;  %v773_v21 = vshll.u32 %v4700_v37, %v767_v17 }
 0x1cc   : >> { %v734_v27 = vxor.u32 2147483648, %v733_v1  ;;  %v5351_v3 = vsub.s32 %v2358_v31, %v2361_v2  ;;  %v776_v44 = vshll.u32 %v4701_v39, %v767_v17  ;;  %v779_v56 = vshll.u32 %v4702_v41, %v767_v17 }
 0x1cd   : >> { %v771_v16 = vshrl.u32 %v4700_v37, %v768_v14  ;;  %v774_v5 = vshrl.u32 %v4701_v39, %v768_v14  ;;  %v777_v52 = vshrl.u32 %v4702_v41, %v768_v14  ;;  %v780_v55 = vshrl.u32 %v4703_v43, %v768_v14 }
 0x1ce   : >> { %v735_v38 = vsel %vm652_vm1, %v734_v27, %v733_v1  ;;  %v2364_v47 = vsub.s32 0, %v5351_v3  ;;  %v2354_v49 = vadd.s32 %v5282_v61, %v5310_v12  ;;  %v782_v18 = vshll.u32 %v4703_v43, %v767_v17  ;;  %v5396_v1 = vpop.f32.mrb[10].mxu1 }
 0x1cf   : >> { %v738_v42 = vsel %vm5292_vm2, %v5009_v0, %v735_v38  ;;  %v772_v34 = vor.u32 %v771_v16, %v770_v53  ;;  %v775_v29 = vor.u32 %v774_v5, %v773_v21  ;;  %v778_v9 = vor.u32 %v777_v52, %v776_v44 }
 0x1d0   : >> { %4429 = vcosq.f32 %v738_v42  ;;  %v4067_v19 = vmin.u32 %v2364_v47, %v5351_v3  ;;  %v781_v50 = vor.u32 %v780_v55, %v779_v56  ;;  %v783_v31 = vshrl.u32 %v4704_v51, %v768_v14 }
 0x1d1   : >> { %4431 = vsinq.f32 %v738_v42  ;;  %v2405_v58 = vshrl.u32 %v2404_v60, 23  ;;  %v769_v36 = vshrl.u32 %v4699_v33, %v768_v14  ;;  %vm785_vm10 = vcmp.lt.s32.totalorder %v5354_v32, 1  ;;  %v495_v60 = vpop.f32.mrb[11].mxu1 }
 0x1d2   : >> { %v2366_v54 = vclz %v4067_v19  ;;  %vm786_vm11 = vcmp.lt.s32.totalorder %v5354_v32, 2  ;;  %v801_v40 = vshll.u32 %v761_v26, 8  ;;  %v784_v63 = vor.u32 %v783_v31, %v782_v18 }
 0x1d3   : >> { %vm788_vm12 = vcmp.lt.s32.totalorder %v5354_v32, 4  ;;  %v793_v61 = vsel %vm785_vm10, %v772_v34, %v775_v29  ;;  %vm745_vm13 = vcmp.eq.s32.totalorder %v5348_v6, 0  ;;  %vm787_vm14 = vcmp.lt.s32.totalorder %v5354_v32, 3 }
 0x1d4   : >> { %v4068_v13 = vadd.s32 4294967294, %v2366_v54  ;;  %v790_v12 = vsel %vm788_vm12, %v778_v9, 2102212464  ;;  %v794_v35 = vsel %vm788_vm12, %v781_v50, 920167782  ;;  %v797_v59 = vsel %vm785_vm10, %v775_v29, %v778_v9 }
 0x1d5   : >> { %vm744_vm15 = vcmp.lt.s32.totalorder %v5348_v6, 2  ;;  %vm2300_vm0 = vcmp.lt.s32.totalorder %v5022_v24, 0  ;;  %v795_v30 = vsel %vm787_vm14, %v778_v9, %v794_v35  ;;  %v798_v22 = vsel %vm788_vm12, %v784_v63, 1326507024 }
 0x1d6   : >> { %vm4069_vm1 = vcmp.lt.s32.totalorder %v4068_v13, 0  ;;  %v4070_v57 = vadd.s32 4294967169, %v2405_v58  ;;  %vm742_vm2 = vweird.f32 %v5009_v0  ;;  %v789_v7 = vsel %vm785_vm10, %v769_v36, %v772_v34 }
 0x1d7   : >> { %v2369_v62 = vsel %vm4069_vm1, 0, %v4068_v13  ;;  %v796_v15 = vsel %vm786_vm11, %v793_v61, %v795_v30  ;;  %v799_v17 = vsel %vm787_vm14, %v781_v50, %v798_v22  ;;  %v791_v27 = vsel %vm787_vm14, %v775_v29, %v790_v12 }
 0x1d8   : >> { %v2370_v2 = vsub.s32 32, %v2369_v62  ;;  %v2374_v14 = vsub.s32 4294967266, %v2369_v62  ;;  %v800_v26 = vsel %vm786_vm11, %v797_v59, %v799_v17  ;;  %v2371_v21 = vshll.u32 %v5351_v3, %v2369_v62 }
 0x1d9   : >> { %v5402_v53 = vmul.u32.u64.low %v801_v40, %v800_v26  ;;  %v5403_v16 = vmul.u32.u64.high %v801_v40, %v800_v26, %v5402_v53  ;;  %v5405_v5 = vmul.u32.u64.low %v801_v40, %v796_v15  ;;  %v5406_v38 = vmul.u32.u64.high %v801_v40, %v796_v15, %v5405_v5 }
 0x1da   : >> { %v4430_v47 = vpop.eup %4429  ;;  %v2372_v52 = vshrl.u32 %v2354_v49, %v2370_v2  ;;  %v2375_v42 = vadd.s32 127, %v2374_v14  ;;  %v2411_v44 = vadd.s32 1, %v4070_v57  ;;  %vm748_vm3 = vcmp.eq.s32.totalorder %v5348_v6, 2 }
 0x1db   : >> { %v4432_v56 = vpop.eup %4431  ;;  %v749_v55 = vxor.u32 2147483648, %v4430_v47  ;;  %v2384_v19 = vsub.s32 4, %v5342_v4  ;;  %v792_v34 = vsel %vm786_vm11, %v789_v7, %v791_v27  ;;  %vm810_vm5 = vc.u32 %v5403_v16, %v5405_v5 }
 0x1dc   : >> { %v746_v29 = vxor.u32 2147483648, %v4432_v56  ;;  %v2373_v9 = vor.u32 %v2372_v52, %v2371_v21  ;;  %v2376_v50 = vshll.u32 %v2375_v42, 23  ;;  %vm2412_vm4 = vcmp.gt.s32.totalorder %v2411_v44, 0 }
 0x1dd   : >> { %v750_v54 = vsel %vm748_vm3, %v749_v55, %v4432_v56  ;;  %v811_v3 = vadd.s32 1, %v5406_v38  ;;  %v2408_v49 = vand.u32 8388607, %v2401_v8  ;;  %v808_v32 = vmul.u32 %v801_v40, %v792_v34 }
 0x1de   : >> { %v747_v18 = vsel %vm745_vm13, %v4430_v47, %v746_v29  ;;  %v2377_v31 = vor.u32 4788187, %v2376_v50  ;;  %v2413_v58 = vsel %vm2412_vm4, %v2411_v44, 0  ;;  %v2385_v13 = vsel %vm2300_vm0, %v2384_v19, %v5342_v4 }
 0x1df   : >> { %v751_v36 = vsel %vm744_vm15, %v747_v18, %v750_v54  ;;  %v812_v63 = vsel %vm810_vm5, %v811_v3, %v5406_v38  ;;  %v2415_v61 = vand.u32 31, %v2413_v58  ;;  %v2380_v59 = vcvt.s32.f32 %v2373_v9 }
 0x1e0   : >> { %v752_v12 = vsel %vm742_vm2, nan, %v751_v36  ;;  %v2378_v35 = vand.u32 2147483647, %v2377_v31  ;;  %v813_v30 = vadd.s32 %v812_v63, %v808_v32  ;;  %vm5432_vm6 = vcmp.le.f32.partialorder %v2298_v46, 0.7853982 }
 0x1e1   : >> { %3845 = vst [vmem:[%s5306_s28 + $0x8] sm:$0xff] %v752_v12  ;;  %v2409_v6 = vor.u32 8388608, %v2408_v49  ;;  %v2416_v22 = vsub.s32 32, %v2415_v61  ;;  %v2387_v4 = vsel %vm5432_vm6, 0, %v2385_v13  ;;  %v2418_v0 = vshll.u32 %v4699_v33, %v2415_v61  ;;  %v5468_v13 = vld [vmem:[%s7750_s2] ss:$0 sm:$0xff] }
 0x1e2   : >> { %v2381_v57 = vmul.f32 %v2380_v59, %v2378_v35  ;;  %v814_v62 = vadd.s32 536870912, %v813_v30  ;;  %v2424_v17 = vshll.u32 %v4701_v39, %v2415_v61  ;;  %v2414_v60 = vshrl.u32 %v2413_v58, 5 }
 0x1e3   : >> { %v2419_v7 = vshrl.u32 %v4700_v37, %v2416_v22  ;;  %v2422_v15 = vshrl.u32 %v4701_v39, %v2416_v22  ;;  %v2425_v46 = vshrl.u32 %v4702_v41, %v2416_v22  ;;  %v2428_v27 = vshrl.u32 %v4703_v43, %v2416_v22 }
 0x1e4   : >> { %v2382_v2 = vxor.u32 2147483648, %v2381_v57  ;;  %v5443_v14 = vshrl.u32 %v814_v62, 30  ;;  %v2431_v26 = vshrl.u32 %v4704_v51, %v2416_v22  ;;  %v2421_v53 = vshll.u32 %v4700_v37, %v2415_v61 }
 0x1e5   : >> { %v2427_v38 = vshll.u32 %v4702_v41, %v2415_v61  ;;  %v2430_v47 = vshll.u32 %v4703_v43, %v2415_v61  ;;  %v2420_v42 = vor.u32 %v2419_v7, %v2418_v0  ;;  %v2426_v44 = vor.u32 %v2425_v46, %v2424_v17  ;;  %v5490_v17 = vpop.f32.mrb[12].mxu0 }
 0x1e6   : >> { %v2383_v21 = vsel %vm2300_vm0, %v2382_v2, %v2381_v57  ;;  %v816_v52 = vshll.u32 %v5443_v14, 30  ;;  %v2423_v55 = vor.u32 %v2422_v15, %v2421_v53  ;;  %v5458_v9 = vand.u32 3, %v2387_v4  ;;  %v420_v2 = vpop.f32.mrb[13].mxu0 }
 0x1e7   : >> { %v2386_v56 = vsel %vm5432_vm6, %v5022_v24, %v2383_v21  ;;  %v2429_v19 = vor.u32 %v2428_v27, %v2427_v38  ;;  %v2432_v34 = vor.u32 %v2431_v26, %v2430_v47  ;;  %vm2436_vm7 = vcmp.lt.s32.totalorder %v2414_v60, 4 }
 0x1e8   : >> { %4433 = vcosq.f32 %v2386_v56  ;;  %v5456_v29 = vsub.s32 %v813_v30, %v816_v52  ;;  %v5460_v50 = vshll.u32 %v2409_v6, 8  ;;  %v2417_v3 = vshrl.u32 %v4699_v33, %v2416_v22 }
 0x1e9   : >> { %4435 = vsinq.f32 %v2386_v56  ;;  %vm2433_vm8 = vcmp.lt.s32.totalorder %v2414_v60, 1  ;;  %v2438_v49 = vsel %vm2436_vm7, %v2426_v44, 2102212464  ;;  %v2442_v31 = vsel %vm2436_vm7, %v2429_v19, 920167782 }
 0x1ea   : >> { %v819_v54 = vsub.s32 0, %v5456_v29  ;;  %v2441_v18 = vsel %vm2433_vm8, %v2420_v42, %v2423_v55  ;;  %v2445_v32 = vsel %vm2433_vm8, %v2423_v55, %v2426_v44  ;;  %v2446_v58 = vsel %vm2436_vm7, %v2432_v34, 1326507024 }
 0x1eb   : >> { %vm2434_vm9 = vcmp.lt.s32.totalorder %v2414_v60, 2  ;;  %vm2435_vm10 = vcmp.lt.s32.totalorder %v2414_v60, 3  ;;  %v5472_v63 = vadd.f32 %v5468_v13, %v5019_v20  ;;  %v2437_v61 = vsel %vm2433_vm8, %v2417_v3, %v2420_v42 }
 0x1ec   : >> { %v4007_v36 = vmin.u32 %v819_v54, %v5456_v29  ;;  %v2439_v12 = vsel %vm2435_vm10, %v2423_v55, %v2438_v49  ;;  %v2443_v35 = vsel %vm2435_vm10, %v2426_v44, %v2442_v31  ;;  %v2447_v59 = vsel %vm2435_vm10, %v2429_v19, %v2446_v58 }
 0x1ed   : >> { %v839_v40 = vsub.s32 4, %v5443_v14  ;;  %v2444_v6 = vsel %vm2434_vm9, %v2441_v18, %v2443_v35  ;;  %v2448_v22 = vsel %vm2434_vm9, %v2445_v32, %v2447_v59  ;;  %vm2390_vm11 = vweird.f32 %v5022_v24 }
 0x1ee   : >> { %v821_v30 = vclz %v4007_v36  ;;  %v5479_v57 = vmul.u32.u64.low %v5460_v50, %v2448_v22  ;;  %v5480_v4 = vmul.u32.u64.high %v5460_v50, %v2448_v22, %v5479_v57  ;;  %vm755_vm12 = vcmp.lt.s32.totalorder %v5136_v11, 0 }
 0x1ef   : >> { %v5483_v20 = vmul.u32.u64.low %v5460_v50, %v2444_v6  ;;  %v5484_v62 = vmul.u32.u64.high %v5460_v50, %v2444_v6, %v5483_v20  ;;  %v2440_v7 = vsel %vm2434_vm9, %v2437_v61, %v2439_v12  ;;  %v859_v15 = vand.u32 2139095040, %v5472_v63 }
 0x1f0   : >> { %v4008_v0 = vadd.s32 4294967294, %v821_v30  ;;  %vm2392_vm13 = vcmp.lt.s32.totalorder %v5458_v9, 2  ;;  %vm2393_vm14 = vcmp.eq.s32.totalorder %v5458_v9, 0  ;;  %vm2396_vm15 = vcmp.eq.s32.totalorder %v5458_v9, 2 }
 0x1f1   : >> { %v5497_v46 = vadd.f32 %v5468_v13, %v5024_v25  ;;  %v809_v26 = vadd.s32 %v5405_v5, %v5403_v16  ;;  %v856_v60 = vand.u32 2147483647, %v5472_v63  ;;  %v860_v53 = vshrl.u32 %v859_v15, 23 }
 0x1f2   : >> { %v4434_v27 = vpop.eup %4433  ;;  %vm4009_vm0 = vcmp.lt.s32.totalorder %v4008_v0, 0  ;;  %v840_v52 = vsel %vm755_vm12, %v839_v40, %v5443_v14  ;;  %v2456_v42 = vmul.u32 %v5460_v50, %v2440_v7  ;;  %vm2458_vm1 = vc.u32 %v5480_v4, %v5483_v20 }
 0x1f3   : >> { %v4436_v38 = vpop.eup %4435  ;;  %v2397_v47 = vxor.u32 2147483648, %v4434_v27  ;;  %v824_v21 = vsel %vm4009_vm0, 0, %v4008_v0  ;;  %v2459_v5 = vadd.s32 1, %v5484_v62  ;;  %v4010_v55 = vadd.s32 4294967169, %v860_v53 }
 0x1f4   : >> { %v2394_v25 = vxor.u32 2147483648, %v4436_v38  ;;  %v825_v44 = vsub.s32 32, %v824_v21  ;;  %v829_v56 = vsub.s32 4294967266, %v824_v21  ;;  %v2507_v19 = vand.u32 2139095040, %v5497_v46 }
 0x1f5   : >> { %v2398_v16 = vsel %vm2396_vm15, %v2397_v47, %v4436_v38  ;;  %v826_v34 = vshll.u32 %v5456_v29, %v824_v21  ;;  %vm5519_vm2 = vcmp.le.f32.partialorder %v753_v45, 0.7853982  ;;  %v2460_v18 = vsel %vm2458_vm1, %v2459_v5, %v5484_v62 }
 0x1f6   : >> { %v2395_v14 = vsel %vm2393_vm14, %v4434_v27, %v2394_v25  ;;  %v827_v50 = vshrl.u32 %v809_v26, %v825_v44  ;;  %v830_v54 = vadd.s32 127, %v829_v56  ;;  %v866_v31 = vadd.s32 1, %v4010_v55 }
 0x1f7   : >> { %v2399_v3 = vsel %vm2392_vm13, %v2395_v14, %v2398_v16  ;;  %v2461_v29 = vadd.s32 %v2460_v18, %v2456_v42  ;;  %v842_v9 = vsel %vm5519_vm2, 0, %v840_v52  ;;  %v863_v61 = vand.u32 8388607, %v856_v60 }
 0x1f8   : >> { %v2400_v32 = vsel %vm2390_vm11, nan, %v2399_v3  ;;  %v828_v58 = vor.u32 %v827_v50, %v826_v34  ;;  %v831_v36 = vshll.u32 %v830_v54, 23  ;;  %vm867_vm3 = vcmp.gt.s32.totalorder %v866_v31, 0 }
 0x1f9   : >> { %3861 = vst [vmem:[%s5306_s28 + $0x88] sm:$0xff] %v2400_v32  ;;  %v2462_v12 = vadd.s32 536870912, %v2461_v29  ;;  %v868_v35 = vsel %vm867_vm3, %v866_v31, 0  ;;  %v2508_v59 = vshrl.u32 %v2507_v19, 23  ;;  %v5533_v22 = vand.u32 3, %v842_v9  ;;  %v5561_v9 = vpop.f32.mrb[12].mxu1 }
 0x1fa   : >> { %v832_v45 = vor.u32 4788187, %v831_v36  ;;  %v870_v30 = vand.u32 31, %v868_v35  ;;  %v835_v6 = vcvt.s32.f32 %v828_v58  ;;  %v864_v57 = vor.u32 8388608, %v863_v61 }
 0x1fb   : >> { %v5531_v24 = vshrl.u32 %v2462_v12, 30  ;;  %v2504_v0 = vand.u32 2147483647, %v5497_v46  ;;  %v4074_v27 = vadd.s32 4294967169, %v2508_v59  ;;  %v869_v44 = vshrl.u32 %v868_v35, 5  ;;  %v500_v59 = vpop.f32.mrb[13].mxu1 }
 0x1fc   : >> { %v833_v40 = vand.u32 2147483647, %v832_v45  ;;  %v871_v62 = vsub.s32 32, %v870_v30  ;;  %v873_v2 = vshll.u32 %v4699_v33, %v870_v30  ;;  %v876_v53 = vshll.u32 %v4700_v37, %v870_v30 }
 0x1fd   : >> { %v2464_v15 = vshll.u32 %v5531_v24, 30  ;;  %v879_v42 = vshll.u32 %v4701_v39, %v870_v30  ;;  %v882_v16 = vshll.u32 %v4702_v41, %v870_v30  ;;  %v5547_v5 = vshll.u32 %v864_v57, 8 }
 0x1fe   : >> { %v836_v7 = vmul.f32 %v835_v6, %v833_v40  ;;  %v874_v26 = vshrl.u32 %v4700_v37, %v871_v62  ;;  %v877_v38 = vshrl.u32 %v4701_v39, %v871_v62  ;;  %v880_v47 = vshrl.u32 %v4702_v41, %v871_v62 }
 0x1ff   : >> { %v5542_v52 = vsub.s32 %v2461_v29, %v2464_v15  ;;  %v883_v25 = vshrl.u32 %v4703_v43, %v871_v62  ;;  %v885_v3 = vshll.u32 %v4703_v43, %v870_v30  ;;  %v886_v18 = vshrl.u32 %v4704_v51, %v871_v62 }
 0x200   : >> { %v837_v21 = vxor.u32 2147483648, %v836_v7  ;;  %v875_v56 = vor.u32 %v874_v26, %v873_v2  ;;  %v878_v14 = vor.u32 %v877_v38, %v876_v53  ;;  %v881_v34 = vor.u32 %v880_v47, %v879_v42 }
 0x201   : >> { %v2467_v19 = vsub.s32 0, %v5542_v52  ;;  %v884_v54 = vor.u32 %v883_v25, %v882_v16  ;;  %vm2403_vm4 = vcmp.lt.s32.totalorder %v5327_v48, 0  ;;  %v2487_v32 = vsub.s32 4, %v5531_v24 }
 0x202   : >> { %v838_v55 = vsel %vm755_vm12, %v837_v21, %v836_v7  ;;  %v2514_v58 = vadd.s32 1, %v4074_v27  ;;  %v872_v36 = vshrl.u32 %v4699_v33, %v871_v62  ;;  %v887_v29 = vor.u32 %v886_v18, %v885_v3 }
 0x203   : >> { %v841_v50 = vsel %vm5519_vm2, %v5136_v11, %v838_v55  ;;  %v4071_v31 = vmin.u32 %v2467_v19, %v5542_v52  ;;  %vm888_vm5 = vcmp.lt.s32.totalorder %v869_v44, 1  ;;  %vm889_vm6 = vcmp.lt.s32.totalorder %v869_v44, 2 }
 0x204   : >> { %4437 = vcosq.f32 %v841_v50  ;;  %vm890_vm7 = vcmp.lt.s32.totalorder %v869_v44, 3  ;;  %vm891_vm8 = vcmp.lt.s32.totalorder %v869_v44, 4  ;;  %v896_v45 = vsel %vm888_vm5, %v875_v56, %v878_v14 }
 0x205   : >> { %4439 = vsinq.f32 %v841_v50  ;;  %v2469_v49 = vclz %v4071_v31  ;;  %v893_v61 = vsel %vm891_vm8, %v881_v34, 2102212464  ;;  %v897_v12 = vsel %vm891_vm8, %v884_v54, 920167782 }
 0x206   : >> { %v900_v35 = vsel %vm888_vm5, %v878_v14, %v881_v34  ;;  %v892_v40 = vsel %vm888_vm5, %v872_v36, %v875_v56  ;;  %v898_v6 = vsel %vm890_vm7, %v881_v34, %v897_v12  ;;  %v901_v57 = vsel %vm891_vm8, %v887_v29, 1326507024 }
 0x207   : >> { %v4072_v30 = vadd.s32 4294967294, %v2469_v49  ;;  %vm5565_vm9 = vcmp.le.f32.partialorder %v2401_v8, 0.7853982  ;;  %v894_v7 = vsel %vm890_vm7, %v878_v14, %v893_v61  ;;  %v899_v15 = vsel %vm889_vm6, %v896_v45, %v898_v6 }
 0x208   : >> { %v902_v2 = vsel %vm890_vm7, %v884_v54, %v901_v57  ;;  %vm2515_vm10 = vcmp.gt.s32.totalorder %v2514_v58, 0  ;;  %vm847_vm11 = vcmp.lt.s32.totalorder %v5533_v22, 2  ;;  %vm845_vm13 = vweird.f32 %v5136_v11 }
 0x209   : >> { %vm4073_vm12 = vcmp.lt.s32.totalorder %v4072_v30, 0  ;;  %v903_v27 = vsel %vm889_vm6, %v900_v35, %v902_v2  ;;  %v5573_v26 = vmul.u32.u64.low %v5547_v5, %v899_v15  ;;  %v5574_v53 = vmul.u32.u64.high %v5547_v5, %v899_v15, %v5573_v26 }
 0x20a   : >> { %v2457_v8 = vadd.s32 %v5483_v20, %v5480_v4  ;;  %v2472_v38 = vsel %vm4073_vm12, 0, %v4072_v30  ;;  %v5581_v47 = vmul.u32.u64.low %v5547_v5, %v903_v27  ;;  %v5582_v21 = vmul.u32.u64.high %v5547_v5, %v903_v27, %v5581_v47 }
 0x20b   : >> { %v2473_v42 = vsub.s32 32, %v2472_v38  ;;  %v2477_v25 = vsub.s32 4294967266, %v2472_v38  ;;  %v895_v56 = vsel %vm889_vm6, %v892_v40, %v894_v7  ;;  %v2516_v16 = vsel %vm2515_vm10, %v2514_v58, 0 }
 0x20c   : >> { %vm851_vm14 = vcmp.eq.s32.totalorder %v5533_v22, 2  ;;  %v2488_v55 = vsel %vm2403_vm4, %v2487_v32, %v5531_v24  ;;  %v2511_v19 = vand.u32 8388607, %v2504_v0  ;;  %v2518_v4 = vand.u32 31, %v2516_v16 }
 0x20d   : >> { %v2474_v14 = vshll.u32 %v5542_v52, %v2472_v38  ;;  %v2475_v34 = vshrl.u32 %v2457_v8, %v2473_v42  ;;  %v2478_v50 = vadd.s32 127, %v2477_v25  ;;  %v914_v54 = vadd.s32 1, %v5574_v53 }
 0x20e   : >> { %v4438_v20 = vpop.eup %4437  ;;  %v911_v18 = vmul.u32 %v5547_v5, %v895_v56  ;;  %vm913_vm15 = vc.u32 %v5582_v21, %v5573_v26  ;;  %v2519_v31 = vsub.s32 32, %v2518_v4  ;;  %vm848_vm0 = vcmp.eq.s32.totalorder %v5533_v22, 0 }
 0x20f   : >> { %v4440_v44 = vpop.eup %4439  ;;  %v852_v3 = vxor.u32 2147483648, %v4438_v20  ;;  %v2476_v32 = vor.u32 %v2475_v34, %v2474_v14  ;;  %v2479_v58 = vshll.u32 %v2478_v50, 23  ;;  %v915_v36 = vsel %vm913_vm15, %v914_v54, %v5574_v53 }
 0x210   : >> { %v849_v24 = vxor.u32 2147483648, %v4440_v44  ;;  %v916_v29 = vadd.s32 %v915_v36, %v911_v18  ;;  %v5602_v49 = vadd.f32 %v5468_v13, %v5092_v10  ;;  %v2490_v45 = vsel %vm5565_vm9, 0, %v2488_v55 }
 0x211   : >> { %v853_v52 = vsel %vm851_vm14, %v852_v3, %v4440_v44  ;;  %v2480_v61 = vor.u32 4788187, %v2479_v58  ;;  %v2512_v12 = vor.u32 8388608, %v2511_v19  ;;  %v2522_v30 = vshrl.u32 %v4700_v37, %v2519_v31 }
 0x212   : >> { %v850_v5 = vsel %vm848_vm0, %v4438_v20, %v849_v24  ;;  %v917_v59 = vadd.s32 536870912, %v916_v29  ;;  %v2525_v40 = vshrl.u32 %v4701_v39, %v2519_v31  ;;  %v2483_v10 = vcvt.s32.f32 %v2476_v32 }
 0x213   : >> { %v854_v35 = vsel %vm847_vm11, %v850_v5, %v853_v52  ;;  %v2481_v57 = vand.u32 2147483647, %v2480_v61  ;;  %v2521_v7 = vshll.u32 %v4699_v33, %v2518_v4  ;;  %v2524_v2 = vshll.u32 %v4700_v37, %v2518_v4 }
 0x214   : >> { %v855_v6 = vsel %vm845_vm13, nan, %v854_v35  ;;  %v5614_v15 = vshrl.u32 %v917_v59, 30  ;;  %v2527_v22 = vshll.u32 %v4701_v39, %v2518_v4  ;;  %v2528_v27 = vshrl.u32 %v4702_v41, %v2519_v31 }
 0x215   : >> { %3846 = vst [vmem:[%s5306_s28 + $0x10] sm:$0xff] %v855_v6  ;;  %v2484_v53 = vmul.f32 %v2483_v10, %v2481_v57  ;;  %v2530_v8 = vshll.u32 %v4702_v41, %v2518_v4  ;;  %v2531_v38 = vshrl.u32 %v4703_v43, %v2519_v31  ;;  %v2534_v11 = vshrl.u32 %v4704_v51, %v2519_v31 }
 0x216   : >> { %v919_v47 = vshll.u32 %v5614_v15, 30  ;;  %v2517_v42 = vshrl.u32 %v2516_v16, 5  ;;  %v2523_v25 = vor.u32 %v2522_v30, %v2521_v7  ;;  %v2526_v56 = vor.u32 %v2525_v40, %v2524_v2 }
 0x217   : >> { %v2485_v55 = vxor.u32 2147483648, %v2484_v53  ;;  %v2529_v19 = vor.u32 %v2528_v27, %v2527_v22  ;;  %v2532_v20 = vor.u32 %v2531_v38, %v2530_v8  ;;  %v2533_v14 = vshll.u32 %v4703_v43, %v2518_v4  ;;  %v5660_v8 = vpop.f32.mrb[14].mxu0 }
 0x218   : >> { %v5624_v34 = vand.u32 3, %v2490_v45  ;;  %v5626_v50 = vsub.s32 %v916_v29, %v919_v47  ;;  %v5628_v54 = vshll.u32 %v2512_v12, 8  ;;  %v959_v44 = vand.u32 2147483647, %v5602_v49 }
 0x219   : >> { %v2486_v3 = vsel %vm2403_vm4, %v2485_v55, %v2484_v53  ;;  %v2520_v16 = vshrl.u32 %v4699_v33, %v2519_v31  ;;  %v2535_v18 = vor.u32 %v2534_v11, %v2533_v14  ;;  %v962_v24 = vand.u32 2139095040, %v5602_v49  ;;  %v425_v11 = vpop.f32.mrb[15].mxu0 }
 0x21a   : >> { %v2489_v4 = vsel %vm5565_vm9, %v5327_v48, %v2486_v3  ;;  %v922_v32 = vsub.s32 0, %v5626_v50  ;;  %vm2536_vm1 = vcmp.lt.s32.totalorder %v2517_v42, 1  ;;  %vm2539_vm2 = vcmp.lt.s32.totalorder %v2517_v42, 4 }
 0x21b   : >> { %4441 = vcosq.f32 %v2489_v4  ;;  %v2541_v58 = vsel %vm2539_vm2, %v2529_v19, 2102212464  ;;  %v2544_v36 = vsel %vm2536_vm1, %v2523_v25, %v2526_v56  ;;  %v2545_v52 = vsel %vm2539_vm2, %v2532_v20, 920167782 }
 0x21c   : >> { %4443 = vsinq.f32 %v2489_v4  ;;  %v4011_v29 = vmin.u32 %v922_v32, %v5626_v50  ;;  %vm2537_vm3 = vcmp.lt.s32.totalorder %v2517_v42, 2  ;;  %vm2538_vm4 = vcmp.lt.s32.totalorder %v2517_v42, 3 }
 0x21d   : >> { %v2540_v31 = vsel %vm2536_vm1, %v2520_v16, %v2523_v25  ;;  %v2546_v5 = vsel %vm2538_vm4, %v2529_v19, %v2545_v52  ;;  %v2548_v61 = vsel %vm2536_vm1, %v2526_v56, %v2529_v19  ;;  %v2549_v45 = vsel %vm2539_vm2, %v2535_v18, 1326507024 }
 0x21e   : >> { %v924_v12 = vclz %v4011_v29  ;;  %v2542_v62 = vsel %vm2538_vm4, %v2526_v56, %v2541_v58  ;;  %v2547_v35 = vsel %vm2537_vm3, %v2544_v36, %v2546_v5  ;;  %v2550_v59 = vsel %vm2538_vm4, %v2532_v20, %v2549_v45 }
 0x21f   : >> { %v2551_v30 = vsel %vm2537_vm3, %v2548_v61, %v2550_v59  ;;  %v5643_v40 = vmul.u32.u64.low %v5628_v54, %v2547_v35  ;;  %v5644_v6 = vmul.u32.u64.high %v5628_v54, %v2547_v35, %v5643_v40  ;;  %v963_v57 = vshrl.u32 %v962_v24, 23 }
 0x220   : >> { %v4012_v10 = vadd.s32 4294967294, %v924_v12  ;;  %v942_v7 = vsub.s32 4, %v5614_v15  ;;  %v5649_v2 = vmul.u32.u64.low %v5628_v54, %v2551_v30  ;;  %v5650_v22 = vmul.u32.u64.high %v5628_v54, %v2551_v30, %v5649_v2 }
 0x221   : >> { %vm2495_vm5 = vcmp.lt.s32.totalorder %v5624_v34, 2  ;;  %vm5655_vm6 = vcmp.le.f32.partialorder %v856_v60, 0.7853982  ;;  %vm858_vm7 = vcmp.lt.s32.totalorder %v5472_v63, 0  ;;  %v4014_v53 = vadd.s32 4294967169, %v963_v57 }
 0x222   : >> { %vm2496_vm8 = vcmp.eq.s32.totalorder %v5624_v34, 0  ;;  %vm2499_vm9 = vcmp.eq.s32.totalorder %v5624_v34, 2  ;;  %vm4013_vm10 = vcmp.lt.s32.totalorder %v4012_v10, 0  ;;  %v2543_v38 = vsel %vm2537_vm3, %v2540_v31, %v2542_v62 }
 0x223   : >> { %v927_v47 = vsel %vm4013_vm10, 0, %v4012_v10  ;;  %v2562_v25 = vadd.s32 1, %v5644_v6  ;;  %v966_v60 = vand.u32 8388607, %v959_v44  ;;  %v969_v56 = vadd.s32 1, %v4014_v53 }
 0x224   : >> { %v912_v55 = vadd.s32 %v5573_v26, %v5582_v21  ;;  %v928_v19 = vsub.s32 32, %v927_v47  ;;  %v932_v20 = vsub.s32 4294967266, %v927_v47  ;;  %v943_v14 = vsel %vm858_vm7, %v942_v7, %v5614_v15 }
 0x225   : >> { %v4442_v3 = vpop.eup %4441  ;;  %v929_v42 = vshll.u32 %v5626_v50, %v927_v47  ;;  %v2559_v16 = vmul.u32 %v5628_v54, %v2543_v38  ;;  %vm2561_vm11 = vc.u32 %v5650_v22, %v5643_v40  ;;  %vm970_vm12 = vcmp.gt.s32.totalorder %v969_v56, 0 }
 0x226   : >> { %v4444_v18 = vpop.eup %4443  ;;  %v2500_v24 = vxor.u32 2147483648, %v4442_v3  ;;  %v930_v4 = vshrl.u32 %v912_v55, %v928_v19  ;;  %v933_v32 = vadd.s32 127, %v932_v20  ;;  %v2563_v26 = vsel %vm2561_vm11, %v2562_v25, %v5644_v6 }
 0x227   : >> { %v2497_v21 = vxor.u32 2147483648, %v4444_v18  ;;  %v945_v58 = vsel %vm5655_vm6, 0, %v943_v14  ;;  %v2564_v15 = vadd.s32 %v2563_v26, %v2559_v16  ;;  %v971_v36 = vsel %vm970_vm12, %v969_v56, 0 }
 0x228   : >> { %v2501_v50 = vsel %vm2499_vm9, %v2500_v24, %v4444_v18  ;;  %v931_v54 = vor.u32 %v930_v4, %v929_v42  ;;  %v934_v52 = vshll.u32 %v933_v32, 23  ;;  %v5684_v29 = vadd.f32 %v5468_v13, %v5181_v23 }
 0x229   : >> { %v2498_v31 = vsel %vm2496_vm8, %v4442_v3, %v2497_v21  ;;  %v2565_v5 = vadd.s32 536870912, %v2564_v15  ;;  %v967_v61 = vor.u32 8388608, %v966_v60  ;;  %v973_v45 = vand.u32 31, %v971_v36 }
 0x22a   : >> { %vm2493_vm13 = vweird.f32 %v5327_v48  ;;  %v2502_v12 = vsel %vm2495_vm5, %v2498_v31, %v2501_v50  ;;  %v935_v62 = vor.u32 4788187, %v934_v52  ;;  %v938_v23 = vcvt.s32.f32 %v931_v54 }
 0x22b   : >> { %v2503_v35 = vsel %vm2493_vm13, nan, %v2502_v12  ;;  %v5691_v59 = vshrl.u32 %v2565_v5, 30  ;;  %v974_v30 = vsub.s32 32, %v973_v45  ;;  %v5694_v57 = vand.u32 3, %v945_v58 }
 0x22c   : >> { %3862 = vst [vmem:[%s5306_s28 + $0x90] sm:$0xff] %v2503_v35  ;;  %v936_v6 = vand.u32 2147483647, %v935_v62  ;;  %v2610_v10 = vand.u32 2139095040, %v5684_v29  ;;  %v5699_v48 = vshll.u32 %v967_v61, 8  ;;  %v972_v60 = vshrl.u32 %v971_v36, 5 }
 0x22d   : >> { %v2567_v7 = vshll.u32 %v5691_v59, 30  ;;  %v977_v2 = vshrl.u32 %v4700_v37, %v974_v30  ;;  %v2607_v34 = vand.u32 2147483647, %v5684_v29  ;;  %v980_v38 = vshrl.u32 %v4701_v39, %v974_v30 }
 0x22e   : >> { %v939_v53 = vmul.f32 %v938_v23, %v936_v6  ;;  %v983_v11 = vshrl.u32 %v4702_v41, %v974_v30  ;;  %v986_v47 = vshrl.u32 %v4703_v43, %v974_v30  ;;  %v976_v56 = vshll.u32 %v4699_v33, %v973_v45 }
 0x22f   : >> { %v5705_v25 = vsub.s32 %v2564_v15, %v2567_v7  ;;  %v979_v55 = vshll.u32 %v4700_v37, %v973_v45  ;;  %v982_v20 = vshll.u32 %v4701_v39, %v973_v45  ;;  %v985_v14 = vshll.u32 %v4702_v41, %v973_v45  ;;  %v5729_v7 = vpop.f32.mrb[14].mxu1 }
 0x230   : >> { %v940_v19 = vxor.u32 2147483648, %v939_v53  ;;  %v2611_v3 = vshrl.u32 %v2610_v10, 23  ;;  %v978_v16 = vor.u32 %v977_v2, %v976_v56  ;;  %v989_v24 = vshrl.u32 %v4704_v51, %v974_v30 }
 0x231   : >> { %v2570_v42 = vsub.s32 0, %v5705_v25  ;;  %v981_v18 = vor.u32 %v980_v38, %v979_v55  ;;  %v984_v32 = vor.u32 %v983_v11, %v982_v20  ;;  %v987_v26 = vor.u32 %v986_v47, %v985_v14  ;;  %v505_v11 = vpop.f32.mrb[15].mxu1 }
 0x232   : >> { %v941_v4 = vsel %vm858_vm7, %v940_v19, %v939_v53  ;;  %v988_v21 = vshll.u32 %v4703_v43, %v973_v45  ;;  %v2590_v36 = vsub.s32 4, %v5691_v59  ;;  %vm991_vm14 = vcmp.lt.s32.totalorder %v972_v60, 1 }
 0x233   : >> { %v944_v58 = vsel %vm5655_vm6, %v5472_v63, %v941_v4  ;;  %v4075_v15 = vmin.u32 %v2570_v42, %v5705_v25  ;;  %v975_v50 = vshrl.u32 %v4699_v33, %v974_v30  ;;  %vm993_vm15 = vcmp.lt.s32.totalorder %v972_v60, 3 }
 0x234   : >> { %4445 = vcosq.f32 %v944_v58  ;;  %v990_v54 = vor.u32 %v989_v24, %v988_v21  ;;  %vm994_vm0 = vcmp.lt.s32.totalorder %v972_v60, 4  ;;  %v999_v31 = vsel %vm991_vm14, %v978_v16, %v981_v18 }
 0x235   : >> { %4447 = vsinq.f32 %v944_v58  ;;  %v2572_v52 = vclz %v4075_v15  ;;  %v996_v5 = vsel %vm994_vm0, %v984_v32, 2102212464  ;;  %v1000_v61 = vsel %vm994_vm0, %v987_v26, 920167782 }
 0x236   : >> { %v1003_v27 = vsel %vm991_vm14, %v981_v18, %v984_v32  ;;  %v1004_v45 = vsel %vm994_vm0, %v990_v54, 1326507024  ;;  %vm992_vm1 = vcmp.lt.s32.totalorder %v972_v60, 2  ;;  %v1001_v62 = vsel %vm993_vm15, %v984_v32, %v1000_v61 }
 0x237   : >> { %v4076_v12 = vadd.s32 4294967294, %v2572_v52  ;;  %v1005_v35 = vsel %vm993_vm15, %v987_v26, %v1004_v45  ;;  %v995_v30 = vsel %vm991_vm14, %v975_v50, %v978_v16  ;;  %v1002_v6 = vsel %vm992_vm1, %v999_v31, %v1001_v62 }
 0x238   : >> { %v1006_v23 = vsel %vm992_vm1, %v1003_v27, %v1005_v35  ;;  %v4078_v10 = vadd.s32 4294967169, %v2611_v3  ;;  %v997_v2 = vsel %vm993_vm15, %v981_v18, %v996_v5  ;;  %vm948_vm3 = vweird.f32 %v5472_v63 }
 0x239   : >> { %vm4077_vm2 = vcmp.lt.s32.totalorder %v4076_v12, 0  ;;  %v5733_v53 = vmul.u32.u64.low %v5699_v48, %v1006_v23  ;;  %v5734_v38 = vmul.u32.u64.high %v5699_v48, %v1006_v23, %v5733_v53  ;;  %vm2506_vm4 = vcmp.lt.s32.totalorder %v5497_v46, 0 }
 0x23a   : >> { %v2575_v47 = vsel %vm4077_vm2, 0, %v4076_v12  ;;  %v5737_v56 = vmul.u32.u64.low %v5699_v48, %v1002_v6  ;;  %v5738_v55 = vmul.u32.u64.high %v5699_v48, %v1002_v6, %v5737_v56  ;;  %v2617_v19 = vadd.s32 1, %v4078_v10 }
 0x23b   : >> { %v2560_v20 = vadd.s32 %v5643_v40, %v5650_v22  ;;  %v2576_v14 = vsub.s32 32, %v2575_v47  ;;  %v2580_v3 = vsub.s32 4294967266, %v2575_v47  ;;  %vm950_vm5 = vcmp.lt.s32.totalorder %v5694_v57, 2 }
 0x23c   : >> { %vm5748_vm6 = vcmp.le.f32.partialorder %v2504_v0, 0.7853982  ;;  %v998_v16 = vsel %vm992_vm1, %v995_v30, %v997_v2  ;;  %vm2618_vm7 = vcmp.gt.s32.totalorder %v2617_v19, 0  ;;  %v2577_v18 = vshll.u32 %v5705_v25, %v2575_v47 }
 0x23d   : >> { %v2578_v24 = vshrl.u32 %v2560_v20, %v2576_v14  ;;  %v2581_v4 = vadd.s32 127, %v2580_v3  ;;  %vm1016_vm8 = vc.u32 %v5734_v38, %v5737_v56  ;;  %v2591_v22 = vsel %vm2506_vm4, %v2590_v36, %v5691_v59 }
 0x23e   : >> { %v4446_v40 = vpop.eup %4445  ;;  %v1017_v0 = vadd.s32 1, %v5738_v55  ;;  %v2614_v32 = vand.u32 8388607, %v2607_v34  ;;  %v2619_v60 = vsel %vm2618_vm7, %v2617_v19, 0  ;;  %v1014_v15 = vmul.u32 %v5699_v48, %v998_v16 }
 0x23f   : >> { %v4448_v26 = vpop.eup %4447  ;;  %v955_v21 = vxor.u32 2147483648, %v4446_v40  ;;  %v2579_v58 = vor.u32 %v2578_v24, %v2577_v18  ;;  %v2582_v25 = vshll.u32 %v2581_v4, 23  ;;  %vm954_vm9 = vcmp.eq.s32.totalorder %v5694_v57, 2 }
 0x240   : >> { %v952_v50 = vxor.u32 2147483648, %v4448_v26  ;;  %v1018_v54 = vsel %vm1016_vm8, %v1017_v0, %v5738_v55  ;;  %v2621_v52 = vand.u32 31, %v2619_v60  ;;  %vm951_vm10 = vcmp.eq.s32.totalorder %v5694_v57, 0 }
 0x241   : >> { %v956_v59 = vsel %vm954_vm9, %v955_v21, %v4448_v26  ;;  %v2583_v36 = vor.u32 4788187, %v2582_v25  ;;  %v1019_v31 = vadd.s32 %v1018_v54, %v1014_v15  ;;  %v2593_v61 = vsel %vm5748_vm6, 0, %v2591_v22 }
 0x242   : >> { %v953_v5 = vsel %vm951_vm10, %v4446_v40, %v952_v50  ;;  %v2615_v27 = vor.u32 8388608, %v2614_v32  ;;  %v2622_v45 = vsub.s32 32, %v2621_v52  ;;  %v2586_v62 = vcvt.s32.f32 %v2579_v58 }
 0x243   : >> { %v957_v48 = vsel %vm950_vm5, %v953_v5, %v956_v59  ;;  %v2584_v12 = vand.u32 2147483647, %v2583_v36  ;;  %v1020_v35 = vadd.s32 536870912, %v1019_v31  ;;  %v2624_v6 = vshll.u32 %v4699_v33, %v2621_v52 }
 0x244   : >> { %v958_v30 = vsel %vm948_vm3, nan, %v957_v48  ;;  %v2625_v23 = vshrl.u32 %v4700_v37, %v2622_v45  ;;  %v2628_v10 = vshrl.u32 %v4701_v39, %v2622_v45  ;;  %v2627_v11 = vshll.u32 %v4700_v37, %v2621_v52 }
 0x245   : >> { %3847 = vst [vmem:[%s5306_s28 + $0x18] sm:$0xff] %v958_v30  ;;  %v2587_v2 = vmul.f32 %v2586_v62, %v2584_v12  ;;  %v5776_v53 = vshrl.u32 %v1020_v35, 30  ;;  %v2631_v57 = vshrl.u32 %v4702_v41, %v2622_v45  ;;  %v2620_v47 = vshrl.u32 %v2619_v60, 5 }
 0x246   : >> { %v2630_v55 = vshll.u32 %v4701_v39, %v2621_v52  ;;  %v2633_v63 = vshll.u32 %v4702_v41, %v2621_v52  ;;  %v2634_v19 = vshrl.u32 %v4703_v43, %v2622_v45  ;;  %v2626_v3 = vor.u32 %v2625_v23, %v2624_v6 }
 0x247   : >> { %v2588_v20 = vxor.u32 2147483648, %v2587_v2  ;;  %v1022_v14 = vshll.u32 %v5776_v53, 30  ;;  %v2629_v16 = vor.u32 %v2628_v10, %v2627_v11  ;;  %v2636_v4 = vshll.u32 %v4703_v43, %v2621_v52  ;;  %v5813_v11 = vpop.f32.mrb[16].mxu0 }
 0x248   : >> { %v2632_v18 = vor.u32 %v2631_v57, %v2630_v55  ;;  %v2635_v24 = vor.u32 %v2634_v19, %v2633_v63  ;;  %v2637_v40 = vshrl.u32 %v4704_v51, %v2622_v45  ;;  %v5788_v0 = vand.u32 3, %v2593_v61  ;;  %v430_v63 = vpop.f32.mrb[17].mxu0 }
 0x249   : >> { %v2589_v22 = vsel %vm2506_vm4, %v2588_v20, %v2587_v2  ;;  %v5790_v32 = vsub.s32 %v1019_v31, %v1022_v14  ;;  %v5794_v60 = vadd.f32 %v5468_v13, %v5321_v28  ;;  %v2623_v21 = vshrl.u32 %v4699_v33, %v2622_v45 }
 0x24a   : >> { %v2592_v26 = vsel %vm5748_vm6, %v5497_v46, %v2589_v22  ;;  %v2638_v58 = vor.u32 %v2637_v40, %v2636_v4  ;;  %v2655_v25 = vshll.u32 %v2615_v27, 8  ;;  %vm2639_vm11 = vcmp.lt.s32.totalorder %v2620_v47, 1 }
 0x24b   : >> { %4449 = vcosq.f32 %v2592_v26  ;;  %v1025_v15 = vsub.s32 0, %v5790_v32  ;;  %vm2642_vm12 = vcmp.lt.s32.totalorder %v2620_v47, 4  ;;  %v2647_v54 = vsel %vm2639_vm11, %v2626_v3, %v2629_v16 }
 0x24c   : >> { %4451 = vsinq.f32 %v2592_v26  ;;  %v2644_v50 = vsel %vm2642_vm12, %v2632_v18, 2102212464  ;;  %v2648_v52 = vsel %vm2642_vm12, %v2635_v24, 920167782  ;;  %vm2640_vm13 = vcmp.lt.s32.totalorder %v2620_v47, 2 }
 0x24d   : >> { %v4015_v28 = vmin.u32 %v1025_v15, %v5790_v32  ;;  %vm2641_vm14 = vcmp.lt.s32.totalorder %v2620_v47, 3  ;;  %v1065_v42 = vand.u32 2139095040, %v5794_v60  ;;  %v2643_v59 = vsel %vm2639_vm11, %v2623_v21, %v2626_v3 }
 0x24e   : >> { %v2649_v36 = vsel %vm2641_vm14, %v2632_v18, %v2648_v52  ;;  %v2651_v31 = vsel %vm2639_vm11, %v2629_v16, %v2632_v18  ;;  %v2652_v5 = vsel %vm2642_vm12, %v2638_v58, 1326507024  ;;  %v2645_v27 = vsel %vm2641_vm14, %v2629_v16, %v2644_v50 }
 0x24f   : >> { %v1027_v61 = vclz %v4015_v28  ;;  %v2650_v45 = vsel %vm2640_vm13, %v2647_v54, %v2649_v36  ;;  %v2653_v48 = vsel %vm2641_vm14, %v2635_v24, %v2652_v5  ;;  %v1045_v12 = vsub.s32 4, %v5776_v53 }
 0x250   : >> { %v2654_v62 = vsel %vm2640_vm13, %v2651_v31, %v2653_v48  ;;  %v5806_v35 = vmul.u32.u64.low %v2655_v25, %v2650_v45  ;;  %v5807_v30 = vmul.u32.u64.high %v2655_v25, %v2650_v45, %v5806_v35  ;;  %v1066_v2 = vshrl.u32 %v1065_v42, 23 }
 0x251   : >> { %v4016_v6 = vadd.s32 4294967294, %v1027_v61  ;;  %v5810_v23 = vmul.u32.u64.low %v2655_v25, %v2654_v62  ;;  %v5811_v10 = vmul.u32.u64.high %v2655_v25, %v2654_v62, %v5810_v23  ;;  %vm2596_vm15 = vweird.f32 %v5497_v46 }
 0x252   : >> { %vm2598_vm0 = vcmp.lt.s32.totalorder %v5788_v0, 2  ;;  %vm961_vm1 = vcmp.lt.s32.totalorder %v5602_v49, 0  ;;  %v2646_v57 = vsel %vm2640_vm13, %v2643_v59, %v2645_v27  ;;  %v5821_v55 = vadd.f32 %v5468_v13, %v5396_v1 }
 0x253   : >> { %vm2599_vm2 = vcmp.eq.s32.totalorder %v5788_v0, 0  ;;  %vm2602_vm3 = vcmp.eq.s32.totalorder %v5788_v0, 2  ;;  %vm4017_vm4 = vcmp.lt.s32.totalorder %v4016_v6, 0  ;;  %v4018_v19 = vadd.s32 4294967169, %v1066_v2 }
 0x254   : >> { %v1015_v20 = vadd.s32 %v5737_v56, %v5734_v38  ;;  %v1030_v14 = vsel %vm4017_vm4, 0, %v4016_v6  ;;  %v2665_v3 = vadd.s32 1, %v5807_v30  ;;  %v1062_v47 = vand.u32 2147483647, %v5794_v60 }
 0x255   : >> { %v4450_v16 = vpop.eup %4449  ;;  %v1031_v18 = vsub.s32 32, %v1030_v14  ;;  %v1035_v24 = vsub.s32 4294967266, %v1030_v14  ;;  %v1046_v1 = vsel %vm961_vm1, %v1045_v12, %v5776_v53  ;;  %v2662_v4 = vmul.u32 %v2655_v25, %v2646_v57 }
 0x256   : >> { %v4452_v40 = vpop.eup %4451  ;;  %v2603_v22 = vxor.u32 2147483648, %v4450_v16  ;;  %v1032_v26 = vshll.u32 %v5790_v32, %v1030_v14  ;;  %vm2664_vm5 = vc.u32 %v5811_v10, %v5806_v35  ;;  %v1072_v38 = vadd.s32 1, %v4018_v19 }
 0x257   : >> { %v2600_v56 = vxor.u32 2147483648, %v4452_v40  ;;  %v1033_v21 = vshrl.u32 %v1015_v20, %v1031_v18  ;;  %v1036_v58 = vadd.s32 127, %v1035_v24  ;;  %v2666_v15 = vsel %vm2664_vm5, %v2665_v3, %v5807_v30 }
 0x258   : >> { %v2604_v50 = vsel %vm2602_vm3, %v2603_v22, %v4452_v40  ;;  %v2667_v54 = vadd.s32 %v2666_v15, %v2662_v4  ;;  %v1069_v53 = vand.u32 8388607, %v1062_v47  ;;  %vm1073_vm6 = vcmp.gt.s32.totalorder %v1072_v38, 0 }
 0x259   : >> { %v2601_v32 = vsel %vm2599_vm2, %v4450_v16, %v2600_v56  ;;  %v1034_v25 = vor.u32 %v1033_v21, %v1032_v26  ;;  %v1037_v52 = vshll.u32 %v1036_v58, 23  ;;  %v1074_v28 = vsel %vm1073_vm6, %v1072_v38, 0 }
 0x25a   : >> { %v2605_v42 = vsel %vm2598_vm0, %v2601_v32, %v2604_v50  ;;  %v2668_v59 = vadd.s32 536870912, %v2667_v54  ;;  %v1076_v36 = vand.u32 31, %v1074_v28  ;;  %v2713_v31 = vand.u32 2139095040, %v5821_v55 }
 0x25b   : >> { %v2606_v5 = vsel %vm2596_vm15, nan, %v2605_v42  ;;  %v1038_v61 = vor.u32 4788187, %v1037_v52  ;;  %vm5850_vm7 = vcmp.le.f32.partialorder %v959_v44, 0.7853982  ;;  %v5858_v0 = vadd.f32 %v5468_v13, %v5490_v17 }
 0x25c   : >> { %3863 = vst [vmem:[%s5306_s28 + $0x98] sm:$0xff] %v2606_v5  ;;  %v5854_v45 = vshrl.u32 %v2668_v59, 30  ;;  %v1077_v48 = vsub.s32 32, %v1076_v36  ;;  %v1041_v62 = vcvt.s32.f32 %v1034_v25  ;;  %v1048_v46 = vsel %vm5850_vm7, 0, %v1046_v1 }
 0x25d   : >> { %v1039_v12 = vand.u32 2147483647, %v1038_v61  ;;  %v1070_v30 = vor.u32 8388608, %v1069_v53  ;;  %v1079_v44 = vshll.u32 %v4699_v33, %v1076_v36  ;;  %v2714_v2 = vshrl.u32 %v2713_v31, 23  ;;  %v5889_v31 = vpop.f32.mrb[16].mxu1 }
 0x25e   : >> { %v2670_v6 = vshll.u32 %v5854_v45, 30  ;;  %v1080_v23 = vshrl.u32 %v4700_v37, %v1077_v48  ;;  %v1083_v63 = vshrl.u32 %v4701_v39, %v1077_v48  ;;  %v1086_v19 = vshrl.u32 %v4702_v41, %v1077_v48 }
 0x25f   : >> { %v1042_v57 = vmul.f32 %v1041_v62, %v1039_v12  ;;  %v1089_v13 = vshrl.u32 %v4703_v43, %v1077_v48  ;;  %v1082_v20 = vshll.u32 %v4700_v37, %v1076_v36  ;;  %v1085_v14 = vshll.u32 %v4701_v39, %v1076_v36  ;;  %v510_v12 = vpop.f32.mrb[17].mxu1 }
 0x260   : >> { %v5868_v17 = vsub.s32 %v2667_v54, %v2670_v6  ;;  %v1092_v3 = vshrl.u32 %v4704_v51, %v1077_v48  ;;  %v1075_v18 = vshrl.u32 %v1074_v28, 5  ;;  %v1088_v24 = vshll.u32 %v4702_v41, %v1076_v36 }
 0x261   : >> { %v1043_v16 = vxor.u32 2147483648, %v1042_v57  ;;  %v1091_v1 = vshll.u32 %v4703_v43, %v1076_v36  ;;  %v1081_v40 = vor.u32 %v1080_v23, %v1079_v44  ;;  %v1084_v22 = vor.u32 %v1083_v63, %v1082_v20 }
 0x262   : >> { %v2673_v4 = vsub.s32 0, %v5868_v17  ;;  %v1087_v26 = vor.u32 %v1086_v19, %v1085_v14  ;;  %v5878_v56 = vand.u32 3, %v1048_v46  ;;  %v1090_v21 = vor.u32 %v1089_v13, %v1088_v24 }
 0x263   : >> { %v1044_v38 = vsel %vm961_vm1, %v1043_v16, %v1042_v57  ;;  %v1093_v58 = vor.u32 %v1092_v3, %v1091_v1  ;;  %v5884_v54 = vshll.u32 %v1070_v30, 8  ;;  %v4082_v53 = vadd.s32 4294967169, %v2714_v2 }
 0x264   : >> { %v1047_v15 = vsel %vm5850_vm7, %v5602_v49, %v1044_v38  ;;  %v4079_v50 = vmin.u32 %v2673_v4, %v5868_v17  ;;  %v1078_v32 = vshrl.u32 %v4699_v33, %v1077_v48  ;;  %vm1094_vm8 = vcmp.lt.s32.totalorder %v1075_v18, 1 }
 0x265   : >> { %4453 = vcosq.f32 %v1047_v15  ;;  %vm1097_vm9 = vcmp.lt.s32.totalorder %v1075_v18, 4  ;;  %v1102_v28 = vsel %vm1094_vm8, %v1081_v40, %v1084_v22  ;;  %vm1096_vm10 = vcmp.lt.s32.totalorder %v1075_v18, 3 }
 0x266   : >> { %4455 = vsinq.f32 %v1047_v15  ;;  %v2675_v25 = vclz %v4079_v50  ;;  %v1099_v52 = vsel %vm1097_vm9, %v1087_v26, 2102212464  ;;  %v1103_v42 = vsel %vm1097_vm9, %v1090_v21, 920167782 }
 0x267   : >> { %v1106_v59 = vsel %vm1094_vm8, %v1084_v22, %v1087_v26  ;;  %v1107_v36 = vsel %vm1097_vm9, %v1093_v58, 1326507024  ;;  %vm1095_vm11 = vcmp.lt.s32.totalorder %v1075_v18, 2  ;;  %v1104_v61 = vsel %vm1096_vm10, %v1087_v26, %v1103_v42 }
 0x268   : >> { %v4080_v5 = vadd.s32 4294967294, %v2675_v25  ;;  %v1108_v27 = vsel %vm1096_vm10, %v1090_v21, %v1107_v36  ;;  %v1098_v48 = vsel %vm1094_vm8, %v1078_v32, %v1081_v40  ;;  %v1100_v62 = vsel %vm1096_vm10, %v1084_v22, %v1099_v52 }
 0x269   : >> { %v1105_v46 = vsel %vm1095_vm11, %v1102_v28, %v1104_v61  ;;  %v1109_v30 = vsel %vm1095_vm11, %v1106_v59, %v1108_v27  ;;  %vm5896_vm12 = vcmp.le.f32.partialorder %v2607_v34, 0.7853982  ;;  %v2720_v2 = vadd.s32 1, %v4082_v53 }
 0x26a   : >> { %vm4081_vm13 = vcmp.lt.s32.totalorder %v4080_v5, 0  ;;  %v5901_v44 = vmul.u32.u64.low %v5884_v54, %v1109_v30  ;;  %v5902_v23 = vmul.u32.u64.high %v5884_v54, %v1109_v30, %v5901_v44  ;;  %v2693_v63 = vsub.s32 4, %v5854_v45 }
 0x26b   : >> { %v2678_v57 = vsel %vm4081_vm13, 0, %v4080_v5  ;;  %v5906_v19 = vmul.u32.u64.low %v5884_v54, %v1105_v46  ;;  %v5907_v13 = vmul.u32.u64.high %v5884_v54, %v1105_v46, %v5906_v19  ;;  %vm1051_vm14 = vweird.f32 %v5602_v49 }
 0x26c   : >> { %v2663_v34 = vadd.s32 %v5806_v35, %v5811_v10  ;;  %v2679_v20 = vsub.s32 32, %v2678_v57  ;;  %v2683_v14 = vsub.s32 4294967266, %v2678_v57  ;;  %vm2721_vm15 = vcmp.gt.s32.totalorder %v2720_v2, 0 }
 0x26d   : >> { %vm1053_vm0 = vcmp.lt.s32.totalorder %v5878_v56, 2  ;;  %vm2609_vm1 = vcmp.lt.s32.totalorder %v5684_v29, 0  ;;  %v1101_v3 = vsel %vm1095_vm11, %v1098_v48, %v1100_v62  ;;  %v2722_v16 = vsel %vm2721_vm15, %v2720_v2, 0 }
 0x26e   : >> { %v2680_v24 = vshll.u32 %v5868_v17, %v2678_v57  ;;  %v2681_v1 = vshrl.u32 %v2663_v34, %v2679_v20  ;;  %v2684_v4 = vadd.s32 127, %v2683_v14  ;;  %vm1119_vm2 = vc.u32 %v5902_v23, %v5906_v19 }
 0x26f   : >> { %v4454_v40 = vpop.eup %4453  ;;  %v2694_v35 = vsel %vm2609_vm1, %v2693_v63, %v5854_v45  ;;  %v1120_v10 = vadd.s32 1, %v5907_v13  ;;  %v2710_v22 = vand.u32 2147483647, %v5821_v55  ;;  %v2724_v26 = vand.u32 31, %v2722_v16 }
 0x270   : >> { %v4456_v18 = vpop.eup %4455  ;;  %v1058_v38 = vxor.u32 2147483648, %v4454_v40  ;;  %v2682_v21 = vor.u32 %v2681_v1, %v2680_v24  ;;  %v2685_v58 = vshll.u32 %v2684_v4, 23  ;;  %v1117_v17 = vmul.u32 %v5884_v54, %v1101_v3 }
 0x271   : >> { %v1055_v15 = vxor.u32 2147483648, %v4456_v18  ;;  %vm1057_vm3 = vcmp.eq.s32.totalorder %v5878_v56, 2  ;;  %v1121_v50 = vsel %vm1119_vm2, %v1120_v10, %v5907_v13  ;;  %v2725_v53 = vsub.s32 32, %v2724_v26 }
 0x272   : >> { %vm1054_vm4 = vcmp.eq.s32.totalorder %v5878_v56, 0  ;;  %v1059_v45 = vsel %vm1057_vm3, %v1058_v38, %v4456_v18  ;;  %v2686_v32 = vor.u32 4788187, %v2685_v58  ;;  %v1122_v25 = vadd.s32 %v1121_v50, %v1117_v17 }
 0x273   : >> { %v1056_v52 = vsel %vm1054_vm4, %v4454_v40, %v1055_v15  ;;  %v2696_v28 = vsel %vm5896_vm12, 0, %v2694_v35  ;;  %v2717_v42 = vand.u32 8388607, %v2710_v22  ;;  %v5932_v54 = vshrl.u32 %v2722_v16, 5 }
 0x274   : >> { %v1060_v59 = vsel %vm1053_vm0, %v1056_v52, %v1059_v45  ;;  %v2687_v36 = vand.u32 2147483647, %v2686_v32  ;;  %v2689_v5 = vcvt.s32.f32 %v2682_v21  ;;  %v1123_v61 = vadd.s32 536870912, %v1122_v25 }
 0x275   : >> { %v1061_v27 = vsel %vm1051_vm14, nan, %v1060_v59  ;;  %v2728_v12 = vshrl.u32 %v4700_v37, %v2725_v53  ;;  %v2731_v48 = vshrl.u32 %v4701_v39, %v2725_v53  ;;  %v2734_v62 = vshrl.u32 %v4702_v41, %v2725_v53 }
 0x276   : >> { %3848 = vst [vmem:[%s5306_s28 + $0x20] sm:$0xff] %v1061_v27  ;;  %v2690_v46 = vmul.f32 %v2689_v5, %v2687_v36  ;;  %v5942_v30 = vshrl.u32 %v1123_v61, 30  ;;  %v2727_v44 = vshll.u32 %v4699_v33, %v2724_v26  ;;  %v2733_v56 = vshll.u32 %v4701_v39, %v2724_v26 }
 0x277   : >> { %v2730_v2 = vshll.u32 %v4700_v37, %v2724_v26  ;;  %v2736_v57 = vshll.u32 %v4702_v41, %v2724_v26  ;;  %v2737_v49 = vshrl.u32 %v4703_v43, %v2725_v53  ;;  %v2740_v63 = vshrl.u32 %v4704_v51, %v2725_v53 }
 0x278   : >> { %v2691_v13 = vxor.u32 2147483648, %v2690_v46  ;;  %v1125_v34 = vshll.u32 %v5942_v30, 30  ;;  %v2718_v20 = vor.u32 8388608, %v2717_v42  ;;  %v2735_v14 = vor.u32 %v2734_v62, %v2733_v56  ;;  %v5990_v56 = vpop.f32.mrb[18].mxu0 }
 0x279   : >> { %v2729_v3 = vor.u32 %v2728_v12, %v2727_v44  ;;  %v2732_v16 = vor.u32 %v2731_v48, %v2730_v2  ;;  %v2738_v24 = vor.u32 %v2737_v49, %v2736_v57  ;;  %v2739_v1 = vshll.u32 %v4703_v43, %v2724_v26  ;;  %v435_v57 = vpop.f32.mrb[19].mxu0 }
 0x27a   : >> { %v2692_v4 = vsel %vm2609_vm1, %v2691_v13, %v2690_v46  ;;  %v5954_v40 = vand.u32 3, %v2696_v28  ;;  %v5956_v35 = vsub.s32 %v1122_v25, %v1125_v34  ;;  %v1168_v10 = vand.u32 2139095040, %v5858_v0 }
 0x27b   : >> { %v2695_v18 = vsel %vm5896_vm12, %v5684_v29, %v2692_v4  ;;  %v2726_v38 = vshrl.u32 %v4699_v33, %v2725_v53  ;;  %v2741_v21 = vor.u32 %v2740_v63, %v2739_v1  ;;  %vm2745_vm5 = vcmp.lt.s32.totalorder %v5932_v54, 4 }
 0x27c   : >> { %4457 = vcosq.f32 %v2695_v18  ;;  %v1128_v26 = vsub.s32 0, %v5956_v35  ;;  %vm2742_vm6 = vcmp.lt.s32.totalorder %v5932_v54, 1  ;;  %v2747_v58 = vsel %vm2745_vm5, %v2735_v14, 2102212464 }
 0x27d   : >> { %4459 = vsinq.f32 %v2695_v18  ;;  %v2750_v17 = vsel %vm2742_vm6, %v2729_v3, %v2732_v16  ;;  %v2751_v15 = vsel %vm2745_vm5, %v2738_v24, 920167782  ;;  %v2758_v6 = vshll.u32 %v2718_v20, 8 }
 0x27e   : >> { %v4019_v50 = vmin.u32 %v1128_v26, %v5956_v35  ;;  %vm2743_vm7 = vcmp.lt.s32.totalorder %v5932_v54, 2  ;;  %vm2744_vm8 = vcmp.lt.s32.totalorder %v5932_v54, 3  ;;  %v2746_v53 = vsel %vm2742_vm6, %v2726_v38, %v2729_v3 }
 0x27f   : >> { %v2748_v45 = vsel %vm2744_vm8, %v2732_v16, %v2747_v58  ;;  %v2752_v32 = vsel %vm2744_vm8, %v2735_v14, %v2751_v15  ;;  %v2754_v25 = vsel %vm2742_vm6, %v2732_v16, %v2735_v14  ;;  %v2755_v52 = vsel %vm2745_vm5, %v2741_v21, 1326507024 }
 0x280   : >> { %v1130_v28 = vclz %v4019_v50  ;;  %v2753_v42 = vsel %vm2743_vm7, %v2750_v17, %v2752_v32  ;;  %v2756_v59 = vsel %vm2744_vm8, %v2738_v24, %v2755_v52  ;;  %v1169_v36 = vshrl.u32 %v1168_v10, 23 }
 0x281   : >> { %v2757_v5 = vsel %vm2743_vm7, %v2754_v25, %v2756_v59  ;;  %v5979_v61 = vmul.u32.u64.low %v2758_v6, %v2753_v42  ;;  %v5980_v27 = vmul.u32.u64.high %v2758_v6, %v2753_v42, %v5979_v61  ;;  %vm2701_vm9 = vcmp.lt.s32.totalorder %v5954_v40, 2 }
 0x282   : >> { %v4020_v12 = vadd.s32 4294967294, %v1130_v28  ;;  %v5983_v48 = vmul.u32.u64.low %v2758_v6, %v2757_v5  ;;  %v5984_v62 = vmul.u32.u64.high %v2758_v6, %v2757_v5, %v5983_v48  ;;  %v4022_v46 = vadd.s32 4294967169, %v1169_v36  ;;  %v6029_v36 = vld [vmem:[%s7750_s2] ss:$0 sm:$0xff] }
 0x283   : >> { %vm1064_vm10 = vcmp.lt.s32.totalorder %v5794_v60, 0  ;;  %v2749_v44 = vsel %vm2743_vm7, %v2746_v53, %v2748_v45  ;;  %vm2702_vm11 = vcmp.eq.s32.totalorder %v5954_v40, 0  ;;  %vm2705_vm12 = vcmp.eq.s32.totalorder %v5954_v40, 2 }
 0x284   : >> { %vm4021_vm13 = vcmp.lt.s32.totalorder %v4020_v12, 0  ;;  %v1175_v2 = vadd.s32 1, %v4022_v46  ;;  %v1148_v63 = vsub.s32 4, %v5942_v30  ;;  %v2768_v13 = vadd.s32 1, %v5980_v27 }
 0x285   : >> { %v1133_v49 = vsel %vm4021_vm13, 0, %v4020_v12  ;;  %v1165_v34 = vand.u32 2147483647, %v5858_v0  ;;  %v1118_v54 = vadd.s32 %v5906_v19, %v5902_v23  ;;  %v2765_v16 = vmul.u32 %v2758_v6, %v2749_v44 }
 0x286   : >> { %v4458_v20 = vpop.eup %4457  ;;  %v1134_v14 = vsub.s32 32, %v1133_v49  ;;  %v1138_v3 = vsub.s32 4294967266, %v1133_v49  ;;  %v1135_v4 = vshll.u32 %v5956_v35, %v1133_v49  ;;  %vm2767_vm14 = vc.u32 %v5984_v62, %v5979_v61 }
 0x287   : >> { %v4460_v24 = vpop.eup %4459  ;;  %v2706_v1 = vxor.u32 2147483648, %v4458_v20  ;;  %vm1176_vm15 = vcmp.gt.s32.totalorder %v1175_v2, 0  ;;  %v2769_v21 = vsel %vm2767_vm14, %v2768_v13, %v5980_v27  ;;  %v1149_v19 = vsel %vm1064_vm10, %v1148_v63, %v5942_v30 }
 0x288   : >> { %v2703_v10 = vxor.u32 2147483648, %v4460_v24  ;;  %v1136_v18 = vshrl.u32 %v1118_v54, %v1134_v14  ;;  %v1139_v38 = vadd.s32 127, %v1138_v3  ;;  %v2770_v26 = vadd.s32 %v2769_v21, %v2765_v16 }
 0x289   : >> { %v2707_v23 = vsel %vm2705_vm12, %v2706_v1, %v4460_v24  ;;  %v1177_v58 = vsel %vm1176_vm15, %v1175_v2, 0  ;;  %v1172_v6 = vand.u32 8388607, %v1165_v34  ;;  %vm2699_vm0 = vweird.f32 %v5684_v29 }
 0x28a   : >> { %v2704_v35 = vsel %vm2702_vm11, %v4458_v20, %v2703_v10  ;;  %v1137_v17 = vor.u32 %v1136_v18, %v1135_v4  ;;  %v1140_v15 = vshll.u32 %v1139_v38, 23  ;;  %v2771_v53 = vadd.s32 536870912, %v2770_v26 }
 0x28b   : >> { %v2708_v50 = vsel %vm2701_vm9, %v2704_v35, %v2707_v23  ;;  %v1179_v45 = vand.u32 31, %v1177_v58  ;;  %vm6017_vm1 = vcmp.le.f32.partialorder %v1062_v47, 0.7853982  ;;  %v1173_v59 = vor.u32 8388608, %v1172_v6 }
 0x28c   : >> { %v2709_v32 = vsel %vm2699_vm0, nan, %v2708_v50  ;;  %v1141_v25 = vor.u32 4788187, %v1140_v15  ;;  %v1151_v52 = vsel %vm6017_vm1, 0, %v1149_v19  ;;  %v6024_v28 = vshrl.u32 %v2771_v53, 30 }
 0x28d   : >> { %3864 = vst [vmem:[%s5306_s28 + $0xa0] sm:$0xff] %v2709_v32  ;;  %v1180_v29 = vsub.s32 32, %v1179_v45  ;;  %v1144_v40 = vcvt.s32.f32 %v1137_v17  ;;  %v6033_v47 = vadd.f32 %v6029_v36, %v5561_v9  ;;  %v6036_v27 = vshrl.u32 %v1177_v58, 5 }
 0x28e   : >> { %v1142_v42 = vand.u32 2147483647, %v1141_v25  ;;  %v2773_v5 = vshll.u32 %v6024_v28, 30  ;;  %v1182_v12 = vshll.u32 %v4699_v33, %v1179_v45  ;;  %v1185_v9 = vshll.u32 %v4700_v37, %v1179_v45 }
 0x28f   : >> { %v1183_v48 = vshrl.u32 %v4700_v37, %v1180_v29  ;;  %v1186_v44 = vshrl.u32 %v4701_v39, %v1180_v29  ;;  %v1189_v2 = vshrl.u32 %v4702_v41, %v1180_v29  ;;  %v1192_v57 = vshrl.u32 %v4703_v43, %v1180_v29 }
 0x290   : >> { %v1145_v46 = vmul.f32 %v1144_v40, %v1142_v42  ;;  %v6043_v49 = vsub.s32 %v2770_v26, %v2773_v5  ;;  %v1188_v63 = vshll.u32 %v4701_v39, %v1179_v45  ;;  %v1195_v13 = vshrl.u32 %v4704_v51, %v1180_v29 }
 0x291   : >> { %v6048_v54 = vand.u32 3, %v1151_v52  ;;  %v1191_v14 = vshll.u32 %v4702_v41, %v1179_v45  ;;  %v1194_v3 = vshll.u32 %v4703_v43, %v1179_v45  ;;  %v1184_v24 = vor.u32 %v1183_v48, %v1182_v12 }
 0x292   : >> { %v1146_v20 = vxor.u32 2147483648, %v1145_v46  ;;  %v2776_v16 = vsub.s32 0, %v6043_v49  ;;  %v1187_v1 = vor.u32 %v1186_v44, %v1185_v9  ;;  %v1190_v4 = vor.u32 %v1189_v2, %v1188_v63 }
 0x293   : >> { %v1193_v18 = vor.u32 %v1192_v57, %v1191_v14  ;;  %v1196_v38 = vor.u32 %v1195_v13, %v1194_v3  ;;  %v6055_v21 = vshll.u32 %v1173_v59, 8  ;;  %vm1197_vm2 = vcmp.lt.s32.totalorder %v6036_v27, 1  ;;  %v6078_v59 = vpop.f32.mrb[18].mxu1 }
 0x294   : >> { %v1147_v10 = vsel %vm1064_vm10, %v1146_v20, %v1145_v46  ;;  %v4083_v19 = vmin.u32 %v2776_v16, %v6043_v49  ;;  %v2816_v26 = vand.u32 2139095040, %v6033_v47  ;;  %v1181_v58 = vshrl.u32 %v4699_v33, %v1180_v29  ;;  %v515_v44 = vpop.f32.mrb[19].mxu1 }
 0x295   : >> { %v1150_v23 = vsel %vm6017_vm1, %v5794_v60, %v1147_v10  ;;  %vm1198_vm3 = vcmp.lt.s32.totalorder %v6036_v27, 2  ;;  %vm1200_vm4 = vcmp.lt.s32.totalorder %v6036_v27, 4  ;;  %vm2712_vm5 = vcmp.lt.s32.totalorder %v5821_v55, 0 }
 0x296   : >> { %4461 = vcosq.f32 %v1150_v23  ;;  %v2778_v35 = vclz %v4083_v19  ;;  %v1202_v17 = vsel %vm1200_vm4, %v1190_v4, 2102212464  ;;  %v1205_v15 = vsel %vm1197_vm2, %v1184_v24, %v1187_v1 }
 0x297   : >> { %4463 = vsinq.f32 %v1150_v23  ;;  %vm1199_vm6 = vcmp.lt.s32.totalorder %v6036_v27, 3  ;;  %v1206_v6 = vsel %vm1200_vm4, %v1193_v18, 920167782  ;;  %v1209_v50 = vsel %vm1197_vm2, %v1187_v1, %v1190_v4 }
 0x298   : >> { %v1210_v53 = vsel %vm1200_vm4, %v1196_v38, 1326507024  ;;  %v4084_v45 = vadd.s32 4294967294, %v2778_v35  ;;  %v1201_v32 = vsel %vm1197_vm2, %v1181_v58, %v1184_v24  ;;  %v1207_v30 = vsel %vm1199_vm6, %v1190_v4, %v1206_v6 }
 0x299   : >> { %v1211_v25 = vsel %vm1199_vm6, %v1193_v18, %v1210_v53  ;;  %v1203_v52 = vsel %vm1199_vm6, %v1187_v1, %v1202_v17  ;;  %v1208_v29 = vsel %vm1198_vm3, %v1205_v15, %v1207_v30  ;;  %v2817_v40 = vshrl.u32 %v2816_v26, 23 }
 0x29a   : >> { %v1212_v42 = vsel %vm1198_vm3, %v1209_v50, %v1211_v25  ;;  %vm6082_vm7 = vcmp.le.f32.partialorder %v2710_v22, 0.7853982  ;;  %vm4085_vm8 = vcmp.lt.s32.totalorder %v4084_v45, 0  ;;  %v2796_v12 = vsub.s32 4, %v6024_v28 }
 0x29b   : >> { %v6088_v48 = vmul.u32.u64.low %v6055_v21, %v1212_v42  ;;  %v6089_v46 = vmul.u32.u64.high %v6055_v21, %v1212_v42, %v6088_v48  ;;  %v2781_v2 = vsel %vm4085_vm8, 0, %v4084_v45  ;;  %v4086_v63 = vadd.s32 4294967169, %v2817_v40 }
 0x29c   : >> { %v6092_v57 = vmul.u32.u64.low %v6055_v21, %v1208_v29  ;;  %v6093_v9 = vmul.u32.u64.high %v6055_v21, %v1208_v29, %v6092_v57  ;;  %vm1154_vm9 = vweird.f32 %v5794_v60  ;;  %v2766_v22 = vadd.s32 %v5979_v61, %v5984_v62 }
 0x29d   : >> { %v2782_v13 = vsub.s32 32, %v2781_v2  ;;  %v2786_v20 = vsub.s32 4294967266, %v2781_v2  ;;  %v1204_v14 = vsel %vm1198_vm3, %v1201_v32, %v1203_v52  ;;  %vm1156_vm10 = vcmp.lt.s32.totalorder %v6048_v54, 2 }
 0x29e   : >> { %vm1157_vm11 = vcmp.eq.s32.totalorder %v6048_v54, 0  ;;  %v2813_v3 = vand.u32 2147483647, %v6033_v47  ;;  %v2823_v16 = vadd.s32 1, %v4086_v63  ;;  %v2783_v24 = vshll.u32 %v6043_v49, %v2781_v2 }
 0x29f   : >> { %v2784_v1 = vshrl.u32 %v2766_v22, %v2782_v13  ;;  %v2787_v4 = vadd.s32 127, %v2786_v20  ;;  %vm1222_vm12 = vc.u32 %v6089_v46, %v6092_v57  ;;  %v2797_v62 = vsel %vm2712_vm5, %v2796_v12, %v6024_v28 }
 0x2a0   : >> { %v4462_v61 = vpop.eup %4461  ;;  %v1220_v27 = vmul.u32 %v6055_v21, %v1204_v14  ;;  %v1223_v10 = vadd.s32 1, %v6093_v9  ;;  %vm2824_vm13 = vcmp.gt.s32.totalorder %v2823_v16, 0  ;;  %vm1160_vm14 = vcmp.eq.s32.totalorder %v6048_v54, 2 }
 0x2a1   : >> { %v4464_v18 = vpop.eup %4463  ;;  %v1161_v38 = vxor.u32 2147483648, %v4462_v61  ;;  %v2785_v23 = vor.u32 %v2784_v1, %v2783_v24  ;;  %v2788_v19 = vshll.u32 %v2787_v4, 23  ;;  %v2825_v49 = vsel %vm2824_vm13, %v2823_v16, 0 }
 0x2a2   : >> { %v1158_v26 = vxor.u32 2147483648, %v4464_v18  ;;  %v1224_v58 = vsel %vm1222_vm12, %v1223_v10, %v6093_v9  ;;  %v2827_v35 = vand.u32 31, %v2825_v49  ;;  %v6116_v21 = vadd.f32 %v6029_v36, %v5660_v8 }
 0x2a3   : >> { %v1162_v17 = vsel %vm1160_vm14, %v1161_v38, %v4464_v18  ;;  %v2789_v15 = vor.u32 4788187, %v2788_v19  ;;  %v1225_v28 = vadd.s32 %v1224_v58, %v1220_v27  ;;  %v2799_v50 = vsel %vm6082_vm7, 0, %v2797_v62 }
 0x2a4   : >> { %v1159_v6 = vsel %vm1157_vm11, %v4462_v61, %v1158_v26  ;;  %v2820_v53 = vand.u32 8388607, %v2813_v3  ;;  %v2828_v45 = vsub.s32 32, %v2827_v35  ;;  %v2792_v25 = vcvt.s32.f32 %v2785_v23 }
 0x2a5   : >> { %v1163_v32 = vsel %vm1156_vm10, %v1159_v6, %v1162_v17  ;;  %v2790_v30 = vand.u32 2147483647, %v2789_v15  ;;  %v1226_v52 = vadd.s32 536870912, %v1225_v28  ;;  %v2830_v29 = vshll.u32 %v4699_v33, %v2827_v35 }
 0x2a6   : >> { %v1164_v8 = vsel %vm1154_vm9, nan, %v1163_v32  ;;  %v2831_v42 = vshrl.u32 %v4700_v37, %v2828_v45  ;;  %v2834_v40 = vshrl.u32 %v4701_v39, %v2828_v45  ;;  %v2833_v44 = vshll.u32 %v4700_v37, %v2827_v35 }
 0x2a7   : >> { %3849 = vst [vmem:[%s5306_s28 + $0x28] sm:$0xff] %v1164_v8  ;;  %v2793_v12 = vmul.f32 %v2792_v25, %v2790_v30  ;;  %v6132_v48 = vshrl.u32 %v1226_v52, 30  ;;  %v2837_v54 = vshrl.u32 %v4702_v41, %v2828_v45  ;;  %v2826_v2 = vshrl.u32 %v2825_v49, 5 }
 0x2a8   : >> { %v2836_v9 = vshll.u32 %v4701_v39, %v2827_v35  ;;  %v2839_v60 = vshll.u32 %v4702_v41, %v2827_v35  ;;  %v2840_v63 = vshrl.u32 %v4703_v43, %v2828_v45  ;;  %v2832_v20 = vor.u32 %v2831_v42, %v2830_v29 }
 0x2a9   : >> { %v2794_v22 = vxor.u32 2147483648, %v2793_v12  ;;  %v1228_v13 = vshll.u32 %v6132_v48, 30  ;;  %v2835_v14 = vor.u32 %v2834_v40, %v2833_v44  ;;  %v2842_v1 = vshll.u32 %v4703_v43, %v2827_v35 }
 0x2aa   : >> { %v2838_v16 = vor.u32 %v2837_v54, %v2836_v9  ;;  %v2841_v24 = vor.u32 %v2840_v63, %v2839_v60  ;;  %v2843_v4 = vshrl.u32 %v4704_v51, %v2828_v45  ;;  %v6144_v62 = vand.u32 3, %v2799_v50  ;;  %v6165_v54 = vpop.f32.mrb[20].mxu0 }
 0x2ab   : >> { %v2795_v61 = vsel %vm2712_vm5, %v2794_v22, %v2793_v12  ;;  %v6146_v27 = vsub.s32 %v1225_v28, %v1228_v13  ;;  %v2821_v10 = vor.u32 8388608, %v2820_v53  ;;  %v2829_v38 = vshrl.u32 %v4699_v33, %v2828_v45  ;;  %v440_v63 = vpop.f32.mrb[21].mxu0 }
 0x2ac   : >> { %v2798_v18 = vsel %vm6082_vm7, %v5821_v55, %v2795_v61  ;;  %v2844_v23 = vor.u32 %v2843_v4, %v2842_v1  ;;  %v1271_v19 = vand.u32 2139095040, %v6116_v21  ;;  %vm2845_vm15 = vcmp.lt.s32.totalorder %v2826_v2, 1 }
 0x2ad   : >> { %4465 = vcosq.f32 %v2798_v18  ;;  %v1231_v49 = vsub.s32 0, %v6146_v27  ;;  %vm2848_vm0 = vcmp.lt.s32.totalorder %v2826_v2, 4  ;;  %v2853_v58 = vsel %vm2845_vm15, %v2832_v20, %v2835_v14 }
 0x2ae   : >> { %4467 = vsinq.f32 %v2798_v18  ;;  %v2850_v26 = vsel %vm2848_vm0, %v2838_v16, 2102212464  ;;  %v2854_v35 = vsel %vm2848_vm0, %v2841_v24, 920167782  ;;  %vm2846_vm1 = vcmp.lt.s32.totalorder %v2826_v2, 2 }
 0x2af   : >> { %v4023_v17 = vmin.u32 %v1231_v49, %v6146_v27  ;;  %vm2847_vm2 = vcmp.lt.s32.totalorder %v2826_v2, 3  ;;  %v2861_v5 = vshll.u32 %v2821_v10, 8  ;;  %v2849_v15 = vsel %vm2845_vm15, %v2829_v38, %v2832_v20 }
 0x2b0   : >> { %v2855_v28 = vsel %vm2847_vm2, %v2838_v16, %v2854_v35  ;;  %v2857_v6 = vsel %vm2845_vm15, %v2835_v14, %v2838_v16  ;;  %v2858_v50 = vsel %vm2848_vm0, %v2844_v23, 1326507024  ;;  %v2851_v45 = vsel %vm2847_vm2, %v2835_v14, %v2850_v26 }
 0x2b1   : >> { %v1233_v53 = vclz %v4023_v17  ;;  %v2856_v32 = vsel %vm2846_vm1, %v2853_v58, %v2855_v28  ;;  %v2859_v30 = vsel %vm2847_vm2, %v2841_v24, %v2858_v50  ;;  %v1251_v25 = vsub.s32 4, %v6132_v48 }
 0x2b2   : >> { %v2860_v52 = vsel %vm2846_vm1, %v2857_v6, %v2859_v30  ;;  %v6158_v8 = vmul.u32.u64.low %v2861_v5, %v2856_v32  ;;  %v6159_v29 = vmul.u32.u64.high %v2861_v5, %v2856_v32, %v6158_v8  ;;  %v1272_v44 = vshrl.u32 %v1271_v19, 23 }
 0x2b3   : >> { %v4024_v42 = vadd.s32 4294967294, %v1233_v53  ;;  %v6162_v40 = vmul.u32.u64.low %v2861_v5, %v2860_v52  ;;  %v6163_v12 = vmul.u32.u64.high %v2861_v5, %v2860_v52, %v6162_v40  ;;  %vm2802_vm3 = vweird.f32 %v5821_v55 }
 0x2b4   : >> { %vm2804_vm4 = vcmp.lt.s32.totalorder %v6144_v62, 2  ;;  %vm1167_vm5 = vcmp.lt.s32.totalorder %v5858_v0, 0  ;;  %v2852_v9 = vsel %vm2846_vm1, %v2849_v15, %v2851_v45  ;;  %v6173_v60 = vadd.f32 %v6029_v36, %v5729_v7 }
 0x2b5   : >> { %vm2805_vm6 = vcmp.eq.s32.totalorder %v6144_v62, 0  ;;  %vm2808_vm7 = vcmp.eq.s32.totalorder %v6144_v62, 2  ;;  %vm4025_vm8 = vcmp.lt.s32.totalorder %v4024_v42, 0  ;;  %v4026_v22 = vadd.s32 4294967169, %v1272_v44 }
 0x2b6   : >> { %v1221_v13 = vadd.s32 %v6092_v57, %v6089_v46  ;;  %v1236_v20 = vsel %vm4025_vm8, 0, %v4024_v42  ;;  %v2871_v14 = vadd.s32 1, %v6159_v29  ;;  %v1268_v2 = vand.u32 2147483647, %v6116_v21 }
 0x2b7   : >> { %v4466_v16 = vpop.eup %4465  ;;  %v1237_v24 = vsub.s32 32, %v1236_v20  ;;  %v1241_v1 = vsub.s32 4294967266, %v1236_v20  ;;  %v1252_v7 = vsel %vm1167_vm5, %v1251_v25, %v6132_v48  ;;  %v2868_v4 = vmul.u32 %v2861_v5, %v2852_v9 }
 0x2b8   : >> { %v4468_v61 = vpop.eup %4467  ;;  %v2809_v10 = vxor.u32 2147483648, %v4466_v16  ;;  %v1238_v18 = vshll.u32 %v6146_v27, %v1236_v20  ;;  %vm2870_vm9 = vc.u32 %v6163_v12, %v6158_v8  ;;  %v1278_v46 = vadd.s32 1, %v4026_v22 }
 0x2b9   : >> { %v2806_v57 = vxor.u32 2147483648, %v4468_v61  ;;  %v1239_v38 = vshrl.u32 %v1221_v13, %v1237_v24  ;;  %v1242_v23 = vadd.s32 127, %v1241_v1  ;;  %v2872_v19 = vsel %vm2870_vm9, %v2871_v14, %v6159_v29 }
 0x2ba   : >> { %v2810_v49 = vsel %vm2808_vm7, %v2809_v10, %v4468_v61  ;;  %v2873_v26 = vadd.s32 %v2872_v19, %v2868_v4  ;;  %v1275_v48 = vand.u32 8388607, %v1268_v2  ;;  %vm1279_vm10 = vcmp.gt.s32.totalorder %v1278_v46, 0 }
 0x2bb   : >> { %v2807_v27 = vsel %vm2805_vm6, %v4466_v16, %v2806_v57  ;;  %v1240_v58 = vor.u32 %v1239_v38, %v1238_v18  ;;  %v1243_v35 = vshll.u32 %v1242_v23, 23  ;;  %v1280_v17 = vsel %vm1279_vm10, %v1278_v46, 0 }
 0x2bc   : >> { %v2811_v5 = vsel %vm2804_vm4, %v2807_v27, %v2810_v49  ;;  %v2874_v15 = vadd.s32 536870912, %v2873_v26  ;;  %v1282_v28 = vand.u32 31, %v1280_v17  ;;  %v2919_v6 = vand.u32 2139095040, %v6173_v60 }
 0x2bd   : >> { %v2812_v50 = vsel %vm2802_vm3, nan, %v2811_v5  ;;  %v1244_v53 = vor.u32 4788187, %v1243_v35  ;;  %vm6202_vm11 = vcmp.le.f32.partialorder %v1165_v34, 0.7853982  ;;  %v6210_v62 = vadd.f32 %v6029_v36, %v5813_v11 }
 0x2be   : >> { %3865 = vst [vmem:[%s5306_s28 + $0xa8] sm:$0xff] %v2812_v50  ;;  %v6206_v32 = vshrl.u32 %v2874_v15, 30  ;;  %v1283_v30 = vsub.s32 32, %v1282_v28  ;;  %v1247_v52 = vcvt.s32.f32 %v1240_v58  ;;  %v1254_v55 = vsel %vm6202_vm11, 0, %v1252_v7  ;;  %v6241_v50 = vpop.f32.mrb[20].mxu1 }
 0x2bf   : >> { %v1245_v25 = vand.u32 2147483647, %v1244_v53  ;;  %v1276_v29 = vor.u32 8388608, %v1275_v48  ;;  %v1285_v34 = vshll.u32 %v4699_v33, %v1282_v28  ;;  %v2920_v44 = vshrl.u32 %v2919_v6, 23 }
 0x2c0   : >> { %v2876_v42 = vshll.u32 %v6206_v32, 30  ;;  %v1286_v40 = vshrl.u32 %v4700_v37, %v1283_v30  ;;  %v1289_v63 = vshrl.u32 %v4701_v39, %v1283_v30  ;;  %v1292_v22 = vshrl.u32 %v4702_v41, %v1283_v30 }
 0x2c1   : >> { %v1248_v9 = vmul.f32 %v1247_v52, %v1245_v25  ;;  %v1295_v11 = vshrl.u32 %v4703_v43, %v1283_v30  ;;  %v1288_v20 = vshll.u32 %v4700_v37, %v1282_v28  ;;  %v1291_v14 = vshll.u32 %v4701_v39, %v1282_v28  ;;  %v520_v52 = vpop.f32.mrb[21].mxu1 }
 0x2c2   : >> { %v6220_v13 = vsub.s32 %v2873_v26, %v2876_v42  ;;  %v1298_v16 = vshrl.u32 %v4704_v51, %v1283_v30  ;;  %v1281_v1 = vshrl.u32 %v1280_v17, 5  ;;  %v1294_v7 = vshll.u32 %v4702_v41, %v1282_v28 }
 0x2c3   : >> { %v1249_v24 = vxor.u32 2147483648, %v1248_v9  ;;  %v1297_v4 = vshll.u32 %v4703_v43, %v1282_v28  ;;  %v1287_v10 = vor.u32 %v1286_v40, %v1285_v34  ;;  %v1290_v18 = vor.u32 %v1289_v63, %v1288_v20 }
 0x2c4   : >> { %v2879_v61 = vsub.s32 0, %v6220_v13  ;;  %v1293_v46 = vor.u32 %v1292_v22, %v1291_v14  ;;  %v6230_v38 = vand.u32 3, %v1254_v55  ;;  %v1296_v23 = vor.u32 %v1295_v11, %v1294_v7 }
 0x2c5   : >> { %v1250_v57 = vsel %vm1167_vm5, %v1249_v24, %v1248_v9  ;;  %v1299_v19 = vor.u32 %v1298_v16, %v1297_v4  ;;  %v6236_v48 = vshll.u32 %v1276_v29, 8  ;;  %v4090_v27 = vadd.s32 4294967169, %v2920_v44 }
 0x2c6   : >> { %v1253_v49 = vsel %vm6202_vm11, %v5858_v0, %v1250_v57  ;;  %v4087_v26 = vmin.u32 %v2879_v61, %v6220_v13  ;;  %v1284_v58 = vshrl.u32 %v4699_v33, %v1283_v30  ;;  %vm1300_vm12 = vcmp.lt.s32.totalorder %v1281_v1, 1 }
 0x2c7   : >> { %4469 = vcosq.f32 %v1253_v49  ;;  %vm1303_vm13 = vcmp.lt.s32.totalorder %v1281_v1, 4  ;;  %v1308_v5 = vsel %vm1300_vm12, %v1287_v10, %v1290_v18  ;;  %vm1302_vm14 = vcmp.lt.s32.totalorder %v1281_v1, 3 }
 0x2c8   : >> { %4471 = vsinq.f32 %v1253_v49  ;;  %v2881_v35 = vclz %v4087_v26  ;;  %v1305_v17 = vsel %vm1303_vm13, %v1293_v46, 2102212464  ;;  %v1309_v15 = vsel %vm1303_vm13, %v1296_v23, 920167782 }
 0x2c9   : >> { %v1312_v28 = vsel %vm1300_vm12, %v1290_v18, %v1293_v46  ;;  %v1313_v6 = vsel %vm1303_vm13, %v1299_v19, 1326507024  ;;  %vm1301_vm15 = vcmp.lt.s32.totalorder %v1281_v1, 2  ;;  %v1310_v45 = vsel %vm1302_vm14, %v1293_v46, %v1309_v15 }
 0x2ca   : >> { %v4088_v53 = vadd.s32 4294967294, %v2881_v35  ;;  %v1314_v25 = vsel %vm1302_vm14, %v1296_v23, %v1313_v6  ;;  %v1304_v30 = vsel %vm1300_vm12, %v1284_v58, %v1287_v10  ;;  %v1306_v55 = vsel %vm1302_vm14, %v1290_v18, %v1305_v17 }
 0x2cb   : >> { %v1311_v29 = vsel %vm1301_vm15, %v1308_v5, %v1310_v45  ;;  %v1315_v42 = vsel %vm1301_vm15, %v1312_v28, %v1314_v25  ;;  %vm6248_vm0 = vcmp.le.f32.partialorder %v2813_v3, 0.7853982  ;;  %v2926_v9 = vadd.s32 1, %v4090_v27 }
 0x2cc   : >> { %vm4089_vm1 = vcmp.lt.s32.totalorder %v4088_v53, 0  ;;  %v6253_v40 = vmul.u32.u64.low %v6236_v48, %v1315_v42  ;;  %v6254_v44 = vmul.u32.u64.high %v6236_v48, %v1315_v42, %v6253_v40  ;;  %v2899_v22 = vsub.s32 4, %v6206_v32 }
 0x2cd   : >> { %v2884_v63 = vsel %vm4089_vm1, 0, %v4088_v53  ;;  %v6258_v11 = vmul.u32.u64.low %v6236_v48, %v1311_v29  ;;  %v6259_v20 = vmul.u32.u64.high %v6236_v48, %v1311_v29, %v6258_v11  ;;  %vm1257_vm2 = vweird.f32 %v5858_v0 }
 0x2ce   : >> { %v2869_v3 = vadd.s32 %v6158_v8, %v6163_v12  ;;  %v2885_v14 = vsub.s32 32, %v2884_v63  ;;  %v2889_v16 = vsub.s32 4294967266, %v2884_v63  ;;  %vm2927_vm3 = vcmp.gt.s32.totalorder %v2926_v9, 0 }
 0x2cf   : >> { %vm1259_vm4 = vcmp.lt.s32.totalorder %v6230_v38, 2  ;;  %vm2815_vm5 = vcmp.lt.s32.totalorder %v6033_v47, 0  ;;  %v1307_v24 = vsel %vm1301_vm15, %v1304_v30, %v1306_v55  ;;  %v2928_v7 = vsel %vm2927_vm3, %v2926_v9, 0 }
 0x2d0   : >> { %v2886_v4 = vshll.u32 %v6220_v13, %v2884_v63  ;;  %v2887_v61 = vshrl.u32 %v2869_v3, %v2885_v14  ;;  %v2890_v10 = vadd.s32 127, %v2889_v16  ;;  %vm1325_vm6 = vc.u32 %v6254_v44, %v6258_v11 }
 0x2d1   : >> { %v4470_v18 = vpop.eup %4469  ;;  %v2900_v8 = vsel %vm2815_vm5, %v2899_v22, %v6206_v32  ;;  %v1326_v12 = vadd.s32 1, %v6259_v20  ;;  %v2916_v46 = vand.u32 2147483647, %v6173_v60  ;;  %v2930_v57 = vand.u32 31, %v2928_v7 }
 0x2d2   : >> { %v4472_v1 = vpop.eup %4471  ;;  %v1264_v23 = vxor.u32 2147483648, %v4470_v18  ;;  %v2888_v19 = vor.u32 %v2887_v61, %v2886_v4  ;;  %v2891_v49 = vshll.u32 %v2890_v10, 23  ;;  %v1323_v13 = vmul.u32 %v6236_v48, %v1307_v24 }
 0x2d3   : >> { %v1261_v26 = vxor.u32 2147483648, %v4472_v1  ;;  %vm1263_vm7 = vcmp.eq.s32.totalorder %v6230_v38, 2  ;;  %v1327_v27 = vsel %vm1325_vm6, %v1326_v12, %v6259_v20  ;;  %v2931_v58 = vsub.s32 32, %v2930_v57 }
 0x2d4   : >> { %vm1260_vm8 = vcmp.eq.s32.totalorder %v6230_v38, 0  ;;  %v1265_v32 = vsel %vm1263_vm7, %v1264_v23, %v4472_v1  ;;  %v2892_v35 = vor.u32 4788187, %v2891_v49  ;;  %v1328_v17 = vadd.s32 %v1327_v27, %v1323_v13 }
 0x2d5   : >> { %v1262_v5 = vsel %vm1260_vm8, %v4470_v18, %v1261_v26  ;;  %v2902_v15 = vsel %vm6248_vm0, 0, %v2900_v8  ;;  %v2923_v28 = vand.u32 8388607, %v2916_v46  ;;  %v6284_v48 = vshrl.u32 %v2928_v7, 5 }
 0x2d6   : >> { %v1266_v6 = vsel %vm1259_vm4, %v1262_v5, %v1265_v32  ;;  %v2893_v53 = vand.u32 2147483647, %v2892_v35  ;;  %v2895_v45 = vcvt.s32.f32 %v2888_v19  ;;  %v1329_v25 = vadd.s32 536870912, %v1328_v17 }
 0x2d7   : >> { %v1267_v52 = vsel %vm1257_vm2, nan, %v1266_v6  ;;  %v2934_v30 = vshrl.u32 %v4700_v37, %v2931_v58  ;;  %v2937_v55 = vshrl.u32 %v4701_v39, %v2931_v58  ;;  %v2940_v29 = vshrl.u32 %v4702_v41, %v2931_v58 }
 0x2d8   : >> { %3850 = vst [vmem:[%s5306_s28 + $0x30] sm:$0xff] %v1267_v52  ;;  %v2896_v42 = vmul.f32 %v2895_v45, %v2893_v53  ;;  %v6294_v40 = vshrl.u32 %v1329_v25, 30  ;;  %v2933_v9 = vshll.u32 %v4699_v33, %v2930_v57  ;;  %v2939_v38 = vshll.u32 %v4701_v39, %v2930_v57 }
 0x2d9   : >> { %v2936_v63 = vshll.u32 %v4700_v37, %v2930_v57  ;;  %v2942_v22 = vshll.u32 %v4702_v41, %v2930_v57  ;;  %v2943_v0 = vshrl.u32 %v4703_v43, %v2931_v58  ;;  %v2946_v20 = vshrl.u32 %v4704_v51, %v2931_v58 }
 0x2da   : >> { %v2897_v3 = vxor.u32 2147483648, %v2896_v42  ;;  %v1331_v14 = vshll.u32 %v6294_v40, 30  ;;  %v2924_v16 = vor.u32 8388608, %v2923_v28  ;;  %v2941_v24 = vor.u32 %v2940_v29, %v2939_v38 }
 0x2db   : >> { %v2935_v7 = vor.u32 %v2934_v30, %v2933_v9  ;;  %v2938_v4 = vor.u32 %v2937_v55, %v2936_v63  ;;  %v2944_v61 = vor.u32 %v2943_v0, %v2942_v22  ;;  %v2945_v10 = vshll.u32 %v4703_v43, %v2930_v57  ;;  %v6342_v63 = vpop.f32.mrb[22].mxu0 }
 0x2dc   : >> { %v2898_v18 = vsel %vm2815_vm5, %v2897_v3, %v2896_v42  ;;  %v6306_v8 = vand.u32 3, %v2902_v15  ;;  %v6308_v12 = vsub.s32 %v1328_v17, %v1331_v14  ;;  %v1374_v1 = vand.u32 2139095040, %v6210_v62  ;;  %v445_v0 = vpop.f32.mrb[23].mxu0 }
 0x2dd   : >> { %v2901_v23 = vsel %vm6248_vm0, %v6033_v47, %v2898_v18  ;;  %v2932_v19 = vshrl.u32 %v4699_v33, %v2931_v58  ;;  %v2947_v49 = vor.u32 %v2946_v20, %v2945_v10  ;;  %vm2951_vm9 = vcmp.lt.s32.totalorder %v6284_v48, 4 }
 0x2de   : >> { %4473 = vcosq.f32 %v2901_v23  ;;  %v1334_v57 = vsub.s32 0, %v6308_v12  ;;  %vm2948_vm10 = vcmp.lt.s32.totalorder %v6284_v48, 1  ;;  %v2953_v13 = vsel %vm2951_vm9, %v2941_v24, 2102212464 }
 0x2df   : >> { %4475 = vsinq.f32 %v2901_v23  ;;  %v2956_v26 = vsel %vm2948_vm10, %v2935_v7, %v2938_v4  ;;  %v2957_v27 = vsel %vm2951_vm9, %v2944_v61, 920167782  ;;  %v2964_v34 = vshll.u32 %v2924_v16, 8 }
 0x2e0   : >> { %v4027_v32 = vmin.u32 %v1334_v57, %v6308_v12  ;;  %vm2949_vm11 = vcmp.lt.s32.totalorder %v6284_v48, 2  ;;  %vm2950_vm12 = vcmp.lt.s32.totalorder %v6284_v48, 3  ;;  %v2952_v58 = vsel %vm2948_vm10, %v2932_v19, %v2935_v7 }
 0x2e1   : >> { %v2954_v35 = vsel %vm2950_vm12, %v2938_v4, %v2953_v13  ;;  %v2958_v17 = vsel %vm2950_vm12, %v2941_v24, %v2957_v27  ;;  %v2960_v5 = vsel %vm2948_vm10, %v2938_v4, %v2941_v24  ;;  %v2961_v15 = vsel %vm2951_vm9, %v2947_v49, 1326507024 }
 0x2e2   : >> { %v1336_v28 = vclz %v4027_v32  ;;  %v2959_v6 = vsel %vm2949_vm11, %v2956_v26, %v2958_v17  ;;  %v2962_v53 = vsel %vm2950_vm12, %v2944_v61, %v2961_v15  ;;  %v1375_v45 = vshrl.u32 %v1374_v1, 23 }
 0x2e3   : >> { %v2963_v25 = vsel %vm2949_vm11, %v2960_v5, %v2962_v53  ;;  %v6331_v52 = vmul.u32.u64.low %v2964_v34, %v2959_v6  ;;  %v6332_v30 = vmul.u32.u64.high %v2964_v34, %v2959_v6, %v6331_v52  ;;  %vm2907_vm13 = vcmp.lt.s32.totalorder %v6306_v8, 2 }
 0x2e4   : >> { %v4028_v55 = vadd.s32 4294967294, %v1336_v28  ;;  %v6335_v29 = vmul.u32.u64.low %v2964_v34, %v2963_v25  ;;  %v6336_v42 = vmul.u32.u64.high %v2964_v34, %v2963_v25, %v6335_v29  ;;  %v4030_v9 = vadd.s32 4294967169, %v1375_v45 }
 0x2e5   : >> { %vm1270_vm14 = vcmp.lt.s32.totalorder %v6116_v21, 0  ;;  %v2955_v38 = vsel %vm2949_vm11, %v2952_v58, %v2954_v35  ;;  %vm2908_vm15 = vcmp.eq.s32.totalorder %v6306_v8, 0  ;;  %vm2911_vm0 = vcmp.eq.s32.totalorder %v6306_v8, 2 }
 0x2e6   : >> { %vm4029_vm1 = vcmp.lt.s32.totalorder %v4028_v55, 0  ;;  %v1381_v22 = vadd.s32 1, %v4030_v9  ;;  %v1354_v3 = vsub.s32 4, %v6294_v40  ;;  %v2974_v14 = vadd.s32 1, %v6332_v30 }
 0x2e7   : >> { %v1339_v20 = vsel %vm4029_vm1, 0, %v4028_v55  ;;  %v1371_v16 = vand.u32 2147483647, %v6210_v62  ;;  %v1324_v48 = vadd.s32 %v6258_v11, %v6254_v44  ;;  %v2971_v61 = vmul.u32 %v2964_v34, %v2955_v38 }
 0x2e8   : >> { %v4474_v24 = vpop.eup %4473  ;;  %v1340_v7 = vsub.s32 32, %v1339_v20  ;;  %v1344_v4 = vsub.s32 4294967266, %v1339_v20  ;;  %v1341_v1 = vshll.u32 %v6308_v12, %v1339_v20  ;;  %vm2973_vm2 = vc.u32 %v6336_v42, %v6331_v52 }
 0x2e9   : >> { %v4476_v10 = vpop.eup %4475  ;;  %v2912_v18 = vxor.u32 2147483648, %v4474_v24  ;;  %vm1382_vm3 = vcmp.gt.s32.totalorder %v1381_v22, 0  ;;  %v2975_v57 = vsel %vm2973_vm2, %v2974_v14, %v6332_v30  ;;  %v1355_v11 = vsel %vm1270_vm14, %v1354_v3, %v6294_v40 }
 0x2ea   : >> { %v2909_v23 = vxor.u32 2147483648, %v4476_v10  ;;  %v1342_v19 = vshrl.u32 %v1324_v48, %v1340_v7  ;;  %v1345_v49 = vadd.s32 127, %v1344_v4  ;;  %v2976_v13 = vadd.s32 %v2975_v57, %v2971_v61 }
 0x2eb   : >> { %v2913_v44 = vsel %vm2911_vm0, %v2912_v18, %v4476_v10  ;;  %v1383_v26 = vsel %vm1382_vm3, %v1381_v22, 0  ;;  %v1378_v32 = vand.u32 8388607, %v1371_v16  ;;  %vm2905_vm4 = vweird.f32 %v6033_v47 }
 0x2ec   : >> { %v2910_v12 = vsel %vm2908_vm15, %v4474_v24, %v2909_v23  ;;  %v1343_v27 = vor.u32 %v1342_v19, %v1341_v1  ;;  %v1346_v34 = vshll.u32 %v1345_v49, 23  ;;  %v2977_v35 = vadd.s32 536870912, %v2976_v13 }
 0x2ed   : >> { %v2914_v58 = vsel %vm2907_vm13, %v2910_v12, %v2913_v44  ;;  %v1385_v17 = vand.u32 31, %v1383_v26  ;;  %vm6369_vm5 = vcmp.le.f32.partialorder %v1268_v2, 0.7853982  ;;  %v1379_v45 = vor.u32 8388608, %v1378_v32 }
 0x2ee   : >> { %v2915_v5 = vsel %vm2905_vm4, nan, %v2914_v58  ;;  %v1347_v15 = vor.u32 4788187, %v1346_v34  ;;  %v1357_v28 = vsel %vm6369_vm5, 0, %v1355_v11  ;;  %v6376_v6 = vshrl.u32 %v2977_v35, 30 }
 0x2ef   : >> { %3866 = vst [vmem:[%s5306_s28 + $0xb0] sm:$0xff] %v2915_v5  ;;  %v1386_v47 = vsub.s32 32, %v1385_v17  ;;  %v1350_v8 = vcvt.s32.f32 %v1343_v27  ;;  %v6380_v25 = vadd.f32 %v6029_v36, %v5889_v31  ;;  %v6383_v30 = vshrl.u32 %v1383_v26, 5 }
 0x2f0   : >> { %v1348_v53 = vand.u32 2147483647, %v1347_v15  ;;  %v2979_v2 = vshll.u32 %v6376_v6, 30  ;;  %v1388_v55 = vshll.u32 %v4699_v33, %v1385_v17  ;;  %v1391_v31 = vshll.u32 %v4700_v37, %v1385_v17 }
 0x2f1   : >> { %v1389_v29 = vshrl.u32 %v4700_v37, %v1386_v47  ;;  %v1392_v38 = vshrl.u32 %v4701_v39, %v1386_v47  ;;  %v1395_v22 = vshrl.u32 %v4702_v41, %v1386_v47  ;;  %v1398_v0 = vshrl.u32 %v4703_v43, %v1386_v47 }
 0x2f2   : >> { %v1351_v9 = vmul.f32 %v1350_v8, %v1348_v53  ;;  %v6390_v20 = vsub.s32 %v2976_v13, %v2979_v2  ;;  %v1394_v3 = vshll.u32 %v4701_v39, %v1385_v17  ;;  %v1401_v14 = vshrl.u32 %v4704_v51, %v1386_v47 }
 0x2f3   : >> { %v6395_v48 = vand.u32 3, %v1357_v28  ;;  %v1397_v7 = vshll.u32 %v4702_v41, %v1385_v17  ;;  %v1400_v4 = vshll.u32 %v4703_v43, %v1385_v17  ;;  %v1390_v10 = vor.u32 %v1389_v29, %v1388_v55 }
 0x2f4   : >> { %v1352_v24 = vxor.u32 2147483648, %v1351_v9  ;;  %v2982_v61 = vsub.s32 0, %v6390_v20  ;;  %v1393_v18 = vor.u32 %v1392_v38, %v1391_v31  ;;  %v1396_v1 = vor.u32 %v1395_v22, %v1394_v3 }
 0x2f5   : >> { %v1399_v19 = vor.u32 %v1398_v0, %v1397_v7  ;;  %v1402_v49 = vor.u32 %v1401_v14, %v1400_v4  ;;  %v6402_v57 = vshll.u32 %v1379_v45, 8  ;;  %vm1403_vm6 = vcmp.lt.s32.totalorder %v6383_v30, 1  ;;  %v6425_v45 = vpop.f32.mrb[22].mxu1 }
 0x2f6   : >> { %v1353_v23 = vsel %vm1270_vm14, %v1352_v24, %v1351_v9  ;;  %v4091_v11 = vmin.u32 %v2982_v61, %v6390_v20  ;;  %v3022_v13 = vand.u32 2139095040, %v6380_v25  ;;  %v1387_v26 = vshrl.u32 %v4699_v33, %v1386_v47  ;;  %v525_v38 = vpop.f32.mrb[23].mxu1 }
 0x2f7   : >> { %v1356_v44 = vsel %vm6369_vm5, %v6116_v21, %v1353_v23  ;;  %vm1404_vm7 = vcmp.lt.s32.totalorder %v6383_v30, 2  ;;  %vm1406_vm8 = vcmp.lt.s32.totalorder %v6383_v30, 4  ;;  %vm2918_vm9 = vcmp.lt.s32.totalorder %v6173_v60, 0 }
 0x2f8   : >> { %4477 = vcosq.f32 %v1356_v44  ;;  %v2984_v12 = vclz %v4091_v11  ;;  %v1408_v27 = vsel %vm1406_vm8, %v1396_v1, 2102212464  ;;  %v1411_v34 = vsel %vm1403_vm6, %v1390_v10, %v1393_v18 }
 0x2f9   : >> { %4479 = vsinq.f32 %v1356_v44  ;;  %vm1405_vm10 = vcmp.lt.s32.totalorder %v6383_v30, 3  ;;  %v1412_v32 = vsel %vm1406_vm8, %v1399_v19, 920167782  ;;  %v1415_v58 = vsel %vm1403_vm6, %v1393_v18, %v1396_v1 }
 0x2fa   : >> { %v1416_v35 = vsel %vm1406_vm8, %v1402_v49, 1326507024  ;;  %v4092_v17 = vadd.s32 4294967294, %v2984_v12  ;;  %v1407_v5 = vsel %vm1403_vm6, %v1387_v26, %v1390_v10  ;;  %v1413_v40 = vsel %vm1405_vm10, %v1396_v1, %v1412_v32 }
 0x2fb   : >> { %v1417_v15 = vsel %vm1405_vm10, %v1399_v19, %v1416_v35  ;;  %v1409_v28 = vsel %vm1405_vm10, %v1393_v18, %v1408_v27  ;;  %v1414_v47 = vsel %vm1404_vm7, %v1411_v34, %v1413_v40  ;;  %v3023_v8 = vshrl.u32 %v3022_v13, 23 }
 0x2fc   : >> { %v1418_v53 = vsel %vm1404_vm7, %v1415_v58, %v1417_v15  ;;  %vm6429_vm11 = vcmp.le.f32.partialorder %v2916_v46, 0.7853982  ;;  %vm4093_vm12 = vcmp.lt.s32.totalorder %v4092_v17, 0  ;;  %v3002_v55 = vsub.s32 4, %v6376_v6 }
 0x2fd   : >> { %v6435_v29 = vmul.u32.u64.low %v6402_v57, %v1418_v53  ;;  %v6436_v9 = vmul.u32.u64.high %v6402_v57, %v1418_v53, %v6435_v29  ;;  %v2987_v22 = vsel %vm4093_vm12, 0, %v4092_v17  ;;  %v4094_v3 = vadd.s32 4294967169, %v3023_v8 }
 0x2fe   : >> { %v6439_v0 = vmul.u32.u64.low %v6402_v57, %v1414_v47  ;;  %v6440_v31 = vmul.u32.u64.high %v6402_v57, %v1414_v47, %v6439_v0  ;;  %vm1360_vm13 = vweird.f32 %v6116_v21  ;;  %v2972_v46 = vadd.s32 %v6331_v52, %v6336_v42 }
 0x2ff   : >> { %v2988_v14 = vsub.s32 32, %v2987_v22  ;;  %v2992_v24 = vsub.s32 4294967266, %v2987_v22  ;;  %v1410_v7 = vsel %vm1404_vm7, %v1407_v5, %v1409_v28  ;;  %vm1362_vm14 = vcmp.lt.s32.totalorder %v6395_v48, 2 }
 0x300   : >> { %vm1363_vm15 = vcmp.eq.s32.totalorder %v6395_v48, 0  ;;  %v3019_v4 = vand.u32 2147483647, %v6380_v25  ;;  %v3029_v61 = vadd.s32 1, %v4094_v3  ;;  %v2989_v10 = vshll.u32 %v6390_v20, %v2987_v22 }
 0x301   : >> { %v2990_v18 = vshrl.u32 %v2972_v46, %v2988_v14  ;;  %v2993_v1 = vadd.s32 127, %v2992_v24  ;;  %vm1428_vm0 = vc.u32 %v6436_v9, %v6439_v0  ;;  %v3003_v42 = vsel %vm2918_vm9, %v3002_v55, %v6376_v6 }
 0x302   : >> { %v4478_v52 = vpop.eup %4477  ;;  %v1426_v30 = vmul.u32 %v6402_v57, %v1410_v7  ;;  %v1429_v23 = vadd.s32 1, %v6440_v31  ;;  %vm3030_vm1 = vcmp.gt.s32.totalorder %v3029_v61, 0  ;;  %vm1366_vm2 = vcmp.eq.s32.totalorder %v6395_v48, 2 }
 0x303   : >> { %v4480_v19 = vpop.eup %4479  ;;  %v1367_v49 = vxor.u32 2147483648, %v4478_v52  ;;  %v2991_v44 = vor.u32 %v2990_v18, %v2989_v10  ;;  %v2994_v11 = vshll.u32 %v2993_v1, 23  ;;  %v3031_v20 = vsel %vm3030_vm1, %v3029_v61, 0 }
 0x304   : >> { %v1364_v13 = vxor.u32 2147483648, %v4480_v19  ;;  %v1430_v26 = vsel %vm1428_vm0, %v1429_v23, %v6440_v31  ;;  %v3033_v12 = vand.u32 31, %v3031_v20  ;;  %v6463_v57 = vadd.f32 %v6029_v36, %v5990_v56 }
 0x305   : >> { %v1368_v27 = vsel %vm1366_vm2, %v1367_v49, %v4480_v19  ;;  %v2995_v34 = vor.u32 4788187, %v2994_v11  ;;  %v1431_v6 = vadd.s32 %v1430_v26, %v1426_v30  ;;  %v3005_v58 = vsel %vm6429_vm11, 0, %v3003_v42 }
 0x306   : >> { %v1365_v32 = vsel %vm1363_vm15, %v4478_v52, %v1364_v13  ;;  %v3026_v35 = vand.u32 8388607, %v3019_v4  ;;  %v3034_v17 = vsub.s32 32, %v3033_v12  ;;  %v2998_v15 = vcvt.s32.f32 %v2991_v44 }
 0x307   : >> { %v1369_v5 = vsel %vm1362_vm14, %v1365_v32, %v1368_v27  ;;  %v2996_v40 = vand.u32 2147483647, %v2995_v34  ;;  %v1432_v28 = vadd.s32 536870912, %v1431_v6  ;;  %v3036_v36 = vshll.u32 %v4699_v33, %v3033_v12 }
 0x308   : >> { %v1370_v56 = vsel %vm1360_vm13, nan, %v1369_v5  ;;  %v3037_v47 = vshrl.u32 %v4700_v37, %v3034_v17  ;;  %v3040_v53 = vshrl.u32 %v4701_v39, %v3034_v17  ;;  %v3039_v29 = vshll.u32 %v4700_v37, %v3033_v12 }
 0x309   : >> { %3851 = vst [vmem:[%s5306_s28 + $0x38] sm:$0xff] %v1370_v56  ;;  %v2999_v8 = vmul.f32 %v2998_v15, %v2996_v40  ;;  %v6479_v55 = vshrl.u32 %v1432_v28, 30  ;;  %v3043_v48 = vshrl.u32 %v4702_v41, %v3034_v17  ;;  %v3032_v38 = vshrl.u32 %v3031_v20, 5 }
 0x30a   : >> { %v3042_v22 = vshll.u32 %v4701_v39, %v3033_v12  ;;  %v3045_v21 = vshll.u32 %v4702_v41, %v3033_v12  ;;  %v3046_v31 = vshrl.u32 %v4703_v43, %v3034_v17  ;;  %v3038_v14 = vor.u32 %v3037_v47, %v3036_v36 }
 0x30b   : >> { %v3000_v3 = vxor.u32 2147483648, %v2999_v8  ;;  %v1434_v46 = vshll.u32 %v6479_v55, 30  ;;  %v3041_v24 = vor.u32 %v3040_v53, %v3039_v29  ;;  %v3048_v10 = vshll.u32 %v4703_v43, %v3033_v12  ;;  %v6512_v29 = vpop.f32.mrb[24].mxu0 }
 0x30c   : >> { %v3044_v7 = vor.u32 %v3043_v48, %v3042_v22  ;;  %v3047_v61 = vor.u32 %v3046_v31, %v3045_v21  ;;  %v3049_v18 = vshrl.u32 %v4704_v51, %v3034_v17  ;;  %v6491_v52 = vand.u32 3, %v3005_v58  ;;  %v6521_v22 = vld [vmem:[%s7750_s2] ss:$0 sm:$0xff]  ;;  %v450_v31 = vpop.f32.mrb[25].mxu0 }
 0x30d   : >> { %v3001_v1 = vsel %vm2918_vm9, %v3000_v3, %v2999_v8  ;;  %v6493_v42 = vsub.s32 %v1431_v6, %v1434_v46  ;;  %v3027_v30 = vor.u32 8388608, %v3026_v35  ;;  %v3035_v19 = vshrl.u32 %v4699_v33, %v3034_v17 }
 0x30e   : >> { %v3004_v23 = vsel %vm6429_vm11, %v6173_v60, %v3001_v1  ;;  %v3050_v49 = vor.u32 %v3049_v18, %v3048_v10  ;;  %v1477_v44 = vand.u32 2139095040, %v6463_v57  ;;  %vm3051_vm3 = vcmp.lt.s32.totalorder %v3032_v38, 1 }
 0x30f   : >> { %4481 = vcosq.f32 %v3004_v23  ;;  %v1437_v11 = vsub.s32 0, %v6493_v42  ;;  %vm3054_vm4 = vcmp.lt.s32.totalorder %v3032_v38, 4  ;;  %v3059_v13 = vsel %vm3051_vm3, %v3038_v14, %v3041_v24 }
 0x310   : >> { %4483 = vsinq.f32 %v3004_v23  ;;  %v3056_v20 = vsel %vm3054_vm4, %v3044_v7, 2102212464  ;;  %v3060_v26 = vsel %vm3054_vm4, %v3047_v61, 920167782  ;;  %vm3052_vm5 = vcmp.lt.s32.totalorder %v3032_v38, 2 }
 0x311   : >> { %v4031_v12 = vmin.u32 %v1437_v11, %v6493_v42  ;;  %vm3053_vm6 = vcmp.lt.s32.totalorder %v3032_v38, 3  ;;  %v3067_v2 = vshll.u32 %v3027_v30, 8  ;;  %v3055_v27 = vsel %vm3051_vm3, %v3035_v19, %v3038_v14 }
 0x312   : >> { %v3061_v34 = vsel %vm3053_vm6, %v3044_v7, %v3060_v26  ;;  %v3063_v6 = vsel %vm3051_vm3, %v3041_v24, %v3044_v7  ;;  %v3064_v32 = vsel %vm3054_vm4, %v3050_v49, 1326507024  ;;  %v3057_v35 = vsel %vm3053_vm6, %v3041_v24, %v3056_v20 }
 0x313   : >> { %v1439_v58 = vclz %v4031_v12  ;;  %v3062_v17 = vsel %vm3052_vm5, %v3059_v13, %v3061_v34  ;;  %v3065_v5 = vsel %vm3053_vm6, %v3047_v61, %v3064_v32  ;;  %v1457_v40 = vsub.s32 4, %v6479_v55 }
 0x314   : >> { %v3066_v15 = vsel %vm3052_vm5, %v3063_v6, %v3065_v5  ;;  %v6505_v28 = vmul.u32.u64.low %v3067_v2, %v3062_v17  ;;  %v6506_v56 = vmul.u32.u64.high %v3067_v2, %v3062_v17, %v6505_v28  ;;  %v1478_v8 = vshrl.u32 %v1477_v44, 23 }
 0x315   : >> { %v4032_v36 = vadd.s32 4294967294, %v1439_v58  ;;  %v6509_v47 = vmul.u32.u64.low %v3067_v2, %v3066_v15  ;;  %v6510_v53 = vmul.u32.u64.high %v3067_v2, %v3066_v15, %v6509_v47  ;;  %vm3008_vm7 = vweird.f32 %v6173_v60 }
 0x316   : >> { %vm3010_vm8 = vcmp.lt.s32.totalorder %v6491_v52, 2  ;;  %vm1373_vm9 = vcmp.lt.s32.totalorder %v6210_v62, 0  ;;  %v3058_v48 = vsel %vm3052_vm5, %v3055_v27, %v3057_v35  ;;  %v6525_v21 = vadd.f32 %v6521_v22, %v6078_v59 }
 0x317   : >> { %vm3011_vm10 = vcmp.eq.s32.totalorder %v6491_v52, 0  ;;  %vm3014_vm11 = vcmp.eq.s32.totalorder %v6491_v52, 2  ;;  %vm4033_vm12 = vcmp.lt.s32.totalorder %v4032_v36, 0  ;;  %v4034_v3 = vadd.s32 4294967169, %v1478_v8 }
 0x318   : >> { %v1427_v38 = vadd.s32 %v6439_v0, %v6436_v9  ;;  %v1442_v46 = vsel %vm4033_vm12, 0, %v4032_v36  ;;  %v3077_v14 = vadd.s32 1, %v6506_v56  ;;  %v1474_v24 = vand.u32 2147483647, %v6463_v57 }
 0x319   : >> { %v4482_v7 = vpop.eup %4481  ;;  %v1443_v61 = vsub.s32 32, %v1442_v46  ;;  %v1447_v10 = vsub.s32 4294967266, %v1442_v46  ;;  %v1458_v59 = vsel %vm1373_vm9, %v1457_v40, %v6479_v55  ;;  %v3074_v18 = vmul.u32 %v3067_v2, %v3058_v48 }
 0x31a   : >> { %v4484_v1 = vpop.eup %4483  ;;  %v3015_v30 = vxor.u32 2147483648, %v4482_v7  ;;  %v1444_v23 = vshll.u32 %v6493_v42, %v1442_v46  ;;  %vm3076_vm13 = vc.u32 %v6510_v53, %v6505_v28  ;;  %v1484_v9 = vadd.s32 1, %v4034_v3 }
 0x31b   : >> { %v3012_v0 = vxor.u32 2147483648, %v4484_v1  ;;  %v1445_v19 = vshrl.u32 %v1427_v38, %v1443_v61  ;;  %v1448_v49 = vadd.s32 127, %v1447_v10  ;;  %v3078_v44 = vsel %vm3076_vm13, %v3077_v14, %v6506_v56 }
 0x31c   : >> { %v3016_v11 = vsel %vm3014_vm11, %v3015_v30, %v4484_v1  ;;  %v3079_v20 = vadd.s32 %v3078_v44, %v3074_v18  ;;  %v1481_v55 = vand.u32 8388607, %v1474_v24  ;;  %vm1485_vm14 = vcmp.gt.s32.totalorder %v1484_v9, 0 }
 0x31d   : >> { %v3013_v42 = vsel %vm3011_vm10, %v4482_v7, %v3012_v0  ;;  %v1446_v13 = vor.u32 %v1445_v19, %v1444_v23  ;;  %v1449_v26 = vshll.u32 %v1448_v49, 23  ;;  %v1486_v12 = vsel %vm1485_vm14, %v1484_v9, 0 }
 0x31e   : >> { %v3017_v2 = vsel %vm3010_vm8, %v3013_v42, %v3016_v11  ;;  %v3080_v27 = vadd.s32 536870912, %v3079_v20  ;;  %v1488_v34 = vand.u32 31, %v1486_v12  ;;  %v3125_v6 = vand.u32 2139095040, %v6525_v21 }
 0x31f   : >> { %v3018_v32 = vsel %vm3008_vm7, nan, %v3017_v2  ;;  %v1450_v58 = vor.u32 4788187, %v1449_v26  ;;  %vm6554_vm15 = vcmp.le.f32.partialorder %v1371_v16, 0.7853982  ;;  %v6562_v52 = vadd.f32 %v6521_v22, %v6165_v54 }
 0x320   : >> { %3867 = vst [vmem:[%s5306_s28 + $0xb8] sm:$0xff] %v3018_v32  ;;  %v6558_v17 = vshrl.u32 %v3080_v27, 30  ;;  %v1489_v5 = vsub.s32 32, %v1488_v34  ;;  %v1453_v15 = vcvt.s32.f32 %v1446_v13  ;;  %v1460_v60 = vsel %vm6554_vm15, 0, %v1458_v59  ;;  %v6593_v32 = vpop.f32.mrb[24].mxu1 }
 0x321   : >> { %v1451_v40 = vand.u32 2147483647, %v1450_v58  ;;  %v1482_v56 = vor.u32 8388608, %v1481_v55  ;;  %v1491_v16 = vshll.u32 %v4699_v33, %v1488_v34  ;;  %v3126_v8 = vshrl.u32 %v3125_v6, 23 }
 0x322   : >> { %v3082_v36 = vshll.u32 %v6558_v17, 30  ;;  %v1492_v47 = vshrl.u32 %v4700_v37, %v1489_v5  ;;  %v1495_v31 = vshrl.u32 %v4701_v39, %v1489_v5  ;;  %v1498_v3 = vshrl.u32 %v4702_v41, %v1489_v5 }
 0x323   : >> { %v1454_v48 = vmul.f32 %v1453_v15, %v1451_v40  ;;  %v1501_v54 = vshrl.u32 %v4703_v43, %v1489_v5  ;;  %v1494_v46 = vshll.u32 %v4700_v37, %v1488_v34  ;;  %v1497_v14 = vshll.u32 %v4701_v39, %v1488_v34  ;;  %v530_v15 = vpop.f32.mrb[25].mxu1 }
 0x324   : >> { %v6572_v38 = vsub.s32 %v3079_v20, %v3082_v36  ;;  %v1504_v7 = vshrl.u32 %v4704_v51, %v1489_v5  ;;  %v1487_v10 = vshrl.u32 %v1486_v12, 5  ;;  %v1500_v59 = vshll.u32 %v4702_v41, %v1488_v34 }
 0x325   : >> { %v1455_v61 = vxor.u32 2147483648, %v1454_v48  ;;  %v1503_v18 = vshll.u32 %v4703_v43, %v1488_v34  ;;  %v1493_v30 = vor.u32 %v1492_v47, %v1491_v16  ;;  %v1496_v23 = vor.u32 %v1495_v31, %v1494_v46 }
 0x326   : >> { %v3085_v1 = vsub.s32 0, %v6572_v38  ;;  %v1499_v9 = vor.u32 %v1498_v3, %v1497_v14  ;;  %v6582_v19 = vand.u32 3, %v1460_v60  ;;  %v1502_v49 = vor.u32 %v1501_v54, %v1500_v59 }
 0x327   : >> { %v1456_v0 = vsel %vm1373_vm9, %v1455_v61, %v1454_v48  ;;  %v1505_v44 = vor.u32 %v1504_v7, %v1503_v18  ;;  %v6588_v55 = vshll.u32 %v1482_v56, 8  ;;  %v4098_v42 = vadd.s32 4294967169, %v3126_v8 }
 0x328   : >> { %v1459_v11 = vsel %vm6554_vm15, %v6210_v62, %v1456_v0  ;;  %v4095_v20 = vmin.u32 %v3085_v1, %v6572_v38  ;;  %v1490_v13 = vshrl.u32 %v4699_v33, %v1489_v5  ;;  %vm1506_vm0 = vcmp.lt.s32.totalorder %v1487_v10, 1 }
 0x329   : >> { %4485 = vcosq.f32 %v1459_v11  ;;  %vm1509_vm1 = vcmp.lt.s32.totalorder %v1487_v10, 4  ;;  %v1514_v2 = vsel %vm1506_vm0, %v1493_v30, %v1496_v23  ;;  %vm1508_vm2 = vcmp.lt.s32.totalorder %v1487_v10, 3 }
 0x32a   : >> { %4487 = vsinq.f32 %v1459_v11  ;;  %v3087_v26 = vclz %v4095_v20  ;;  %v1511_v12 = vsel %vm1509_vm1, %v1499_v9, 2102212464  ;;  %v1515_v27 = vsel %vm1509_vm1, %v1502_v49, 920167782 }
 0x32b   : >> { %v1518_v34 = vsel %vm1506_vm0, %v1496_v23, %v1499_v9  ;;  %v1519_v6 = vsel %vm1509_vm1, %v1505_v44, 1326507024  ;;  %vm1507_vm3 = vcmp.lt.s32.totalorder %v1487_v10, 2  ;;  %v1516_v35 = vsel %vm1508_vm2, %v1499_v9, %v1515_v27 }
 0x32c   : >> { %v4096_v58 = vadd.s32 4294967294, %v3087_v26  ;;  %v1520_v40 = vsel %vm1508_vm2, %v1502_v49, %v1519_v6  ;;  %v1510_v5 = vsel %vm1506_vm0, %v1490_v13, %v1493_v30  ;;  %v1512_v60 = vsel %vm1508_vm2, %v1496_v23, %v1511_v12 }
 0x32d   : >> { %v1517_v56 = vsel %vm1507_vm3, %v1514_v2, %v1516_v35  ;;  %v1521_v36 = vsel %vm1507_vm3, %v1518_v34, %v1520_v40  ;;  %vm6600_vm4 = vcmp.le.f32.partialorder %v3019_v4, 0.7853982  ;;  %v3132_v48 = vadd.s32 1, %v4098_v42 }
 0x32e   : >> { %vm4097_vm5 = vcmp.lt.s32.totalorder %v4096_v58, 0  ;;  %v6605_v47 = vmul.u32.u64.low %v6588_v55, %v1521_v36  ;;  %v6606_v8 = vmul.u32.u64.high %v6588_v55, %v1521_v36, %v6605_v47  ;;  %v3105_v3 = vsub.s32 4, %v6558_v17 }
 0x32f   : >> { %v3090_v31 = vsel %vm4097_vm5, 0, %v4096_v58  ;;  %v6610_v54 = vmul.u32.u64.low %v6588_v55, %v1517_v56  ;;  %v6611_v46 = vmul.u32.u64.high %v6588_v55, %v1517_v56, %v6610_v54  ;;  %vm1463_vm6 = vweird.f32 %v6210_v62 }
 0x330   : >> { %v3075_v4 = vadd.s32 %v6505_v28, %v6510_v53  ;;  %v3091_v14 = vsub.s32 32, %v3090_v31  ;;  %v3095_v7 = vsub.s32 4294967266, %v3090_v31  ;;  %vm3133_vm7 = vcmp.gt.s32.totalorder %v3132_v48, 0 }
 0x331   : >> { %vm1465_vm8 = vcmp.lt.s32.totalorder %v6582_v19, 2  ;;  %vm3021_vm9 = vcmp.lt.s32.totalorder %v6380_v25, 0  ;;  %v1513_v61 = vsel %vm1507_vm3, %v1510_v5, %v1512_v60  ;;  %v3134_v59 = vsel %vm3133_vm7, %v3132_v48, 0 }
 0x332   : >> { %v3092_v18 = vshll.u32 %v6572_v38, %v3090_v31  ;;  %v3093_v1 = vshrl.u32 %v3075_v4, %v3091_v14  ;;  %v3096_v30 = vadd.s32 127, %v3095_v7  ;;  %vm1531_vm10 = vc.u32 %v6606_v8, %v6610_v54 }
 0x333   : >> { %v4486_v23 = vpop.eup %4485  ;;  %v3106_v28 = vsel %vm3021_vm9, %v3105_v3, %v6558_v17  ;;  %v1532_v53 = vadd.s32 1, %v6611_v46  ;;  %v3122_v9 = vand.u32 2147483647, %v6525_v21  ;;  %v3136_v0 = vand.u32 31, %v3134_v59 }
 0x334   : >> { %v4488_v10 = vpop.eup %4487  ;;  %v1470_v49 = vxor.u32 2147483648, %v4486_v23  ;;  %v3094_v44 = vor.u32 %v3093_v1, %v3092_v18  ;;  %v3097_v11 = vshll.u32 %v3096_v30, 23  ;;  %v1529_v38 = vmul.u32 %v6588_v55, %v1513_v61 }
 0x335   : >> { %v1467_v20 = vxor.u32 2147483648, %v4488_v10  ;;  %vm1469_vm11 = vcmp.eq.s32.totalorder %v6582_v19, 2  ;;  %v1533_v42 = vsel %vm1531_vm10, %v1532_v53, %v6611_v46  ;;  %v3137_v13 = vsub.s32 32, %v3136_v0 }
 0x336   : >> { %vm1466_vm12 = vcmp.eq.s32.totalorder %v6582_v19, 0  ;;  %v1471_v17 = vsel %vm1469_vm11, %v1470_v49, %v4488_v10  ;;  %v3098_v26 = vor.u32 4788187, %v3097_v11  ;;  %v1534_v12 = vadd.s32 %v1533_v42, %v1529_v38 }
 0x337   : >> { %v1468_v2 = vsel %vm1466_vm12, %v4486_v23, %v1467_v20  ;;  %v3108_v27 = vsel %vm6600_vm4, 0, %v3106_v28  ;;  %v3129_v34 = vand.u32 8388607, %v3122_v9  ;;  %v6636_v55 = vshrl.u32 %v3134_v59, 5 }
 0x338   : >> { %v1472_v6 = vsel %vm1465_vm8, %v1468_v2, %v1471_v17  ;;  %v3099_v58 = vand.u32 2147483647, %v3098_v26  ;;  %v3101_v35 = vcvt.s32.f32 %v3094_v44  ;;  %v1535_v40 = vadd.s32 536870912, %v1534_v12 }
 0x339   : >> { %v1473_v15 = vsel %vm1463_vm6, nan, %v1472_v6  ;;  %v3140_v5 = vshrl.u32 %v4700_v37, %v3137_v13  ;;  %v3143_v60 = vshrl.u32 %v4701_v39, %v3137_v13  ;;  %v3146_v56 = vshrl.u32 %v4702_v41, %v3137_v13 }
 0x33a   : >> { %3852 = vst [vmem:[%s5306_s28 + $0x40] sm:$0xff] %v1473_v15  ;;  %v3102_v36 = vmul.f32 %v3101_v35, %v3099_v58  ;;  %v6646_v47 = vshrl.u32 %v1535_v40, 30  ;;  %v3139_v48 = vshll.u32 %v4699_v33, %v3136_v0  ;;  %v3145_v19 = vshll.u32 %v4701_v39, %v3136_v0 }
 0x33b   : >> { %v3142_v31 = vshll.u32 %v4700_v37, %v3136_v0  ;;  %v3148_v3 = vshll.u32 %v4702_v41, %v3136_v0  ;;  %v3149_v62 = vshrl.u32 %v4703_v43, %v3137_v13  ;;  %v3152_v46 = vshrl.u32 %v4704_v51, %v3137_v13 }
 0x33c   : >> { %v3103_v4 = vxor.u32 2147483648, %v3102_v36  ;;  %v1537_v14 = vshll.u32 %v6646_v47, 30  ;;  %v3130_v7 = vor.u32 8388608, %v3129_v34  ;;  %v3147_v61 = vor.u32 %v3146_v56, %v3145_v19 }
 0x33d   : >> { %v3141_v59 = vor.u32 %v3140_v5, %v3139_v48  ;;  %v3144_v18 = vor.u32 %v3143_v60, %v3142_v31  ;;  %v3150_v1 = vor.u32 %v3149_v62, %v3148_v3  ;;  %v3151_v30 = vshll.u32 %v4703_v43, %v3136_v0  ;;  %v6694_v31 = vpop.f32.mrb[26].mxu0 }
 0x33e   : >> { %v3104_v23 = vsel %vm3021_vm9, %v3103_v4, %v3102_v36  ;;  %v6658_v28 = vand.u32 3, %v3108_v27  ;;  %v6660_v53 = vsub.s32 %v1534_v12, %v1537_v14  ;;  %v1580_v10 = vand.u32 2139095040, %v6562_v52  ;;  %v455_v62 = vpop.f32.mrb[27].mxu0 }
 0x33f   : >> { %v3107_v49 = vsel %vm6600_vm4, %v6380_v25, %v3104_v23  ;;  %v3138_v44 = vshrl.u32 %v4699_v33, %v3137_v13  ;;  %v3153_v11 = vor.u32 %v3152_v46, %v3151_v30  ;;  %vm3157_vm13 = vcmp.lt.s32.totalorder %v6636_v55, 4 }
 0x340   : >> { %4489 = vcosq.f32 %v3107_v49  ;;  %v1540_v0 = vsub.s32 0, %v6660_v53  ;;  %vm3154_vm14 = vcmp.lt.s32.totalorder %v6636_v55, 1  ;;  %v3159_v38 = vsel %vm3157_vm13, %v3147_v61, 2102212464 }
 0x341   : >> { %4491 = vsinq.f32 %v3107_v49  ;;  %v3162_v20 = vsel %vm3154_vm14, %v3141_v59, %v3144_v18  ;;  %v3163_v42 = vsel %vm3157_vm13, %v3150_v1, 920167782  ;;  %v3170_v16 = vshll.u32 %v3130_v7, 8 }
 0x342   : >> { %v4035_v17 = vmin.u32 %v1540_v0, %v6660_v53  ;;  %vm3155_vm15 = vcmp.lt.s32.totalorder %v6636_v55, 2  ;;  %vm3156_vm0 = vcmp.lt.s32.totalorder %v6636_v55, 3  ;;  %v3158_v13 = vsel %vm3154_vm14, %v3138_v44, %v3141_v59 }
 0x343   : >> { %v3160_v26 = vsel %vm3156_vm0, %v3144_v18, %v3159_v38  ;;  %v3164_v12 = vsel %vm3156_vm0, %v3147_v61, %v3163_v42  ;;  %v3166_v2 = vsel %vm3154_vm14, %v3144_v18, %v3147_v61  ;;  %v3167_v27 = vsel %vm3157_vm13, %v3153_v11, 1326507024 }
 0x344   : >> { %v1542_v34 = vclz %v4035_v17  ;;  %v3165_v6 = vsel %vm3155_vm15, %v3162_v20, %v3164_v12  ;;  %v3168_v58 = vsel %vm3156_vm0, %v3150_v1, %v3167_v27  ;;  %v1581_v35 = vshrl.u32 %v1580_v10, 23 }
 0x345   : >> { %v3169_v40 = vsel %vm3155_vm15, %v3166_v2, %v3168_v58  ;;  %v6683_v15 = vmul.u32.u64.low %v3170_v16, %v3165_v6  ;;  %v6684_v5 = vmul.u32.u64.high %v3170_v16, %v3165_v6, %v6683_v15  ;;  %vm3113_vm1 = vcmp.lt.s32.totalorder %v6658_v28, 2 }
 0x346   : >> { %v4036_v60 = vadd.s32 4294967294, %v1542_v34  ;;  %v6687_v56 = vmul.u32.u64.low %v3170_v16, %v3169_v40  ;;  %v6688_v36 = vmul.u32.u64.high %v3170_v16, %v3169_v40, %v6687_v56  ;;  %v4038_v48 = vadd.s32 4294967169, %v1581_v35 }
 0x347   : >> { %vm1476_vm2 = vcmp.lt.s32.totalorder %v6463_v57, 0  ;;  %v3161_v19 = vsel %vm3155_vm15, %v3158_v13, %v3160_v26  ;;  %vm3114_vm3 = vcmp.eq.s32.totalorder %v6658_v28, 0  ;;  %vm3117_vm4 = vcmp.eq.s32.totalorder %v6658_v28, 2 }
 0x348   : >> { %vm4037_vm5 = vcmp.lt.s32.totalorder %v4036_v60, 0  ;;  %v1587_v3 = vadd.s32 1, %v4038_v48  ;;  %v1560_v4 = vsub.s32 4, %v6646_v47  ;;  %v3180_v14 = vadd.s32 1, %v6684_v5 }
 0x349   : >> { %v1545_v46 = vsel %vm4037_vm5, 0, %v4036_v60  ;;  %v1577_v7 = vand.u32 2147483647, %v6562_v52  ;;  %v1530_v55 = vadd.s32 %v6610_v54, %v6606_v8  ;;  %v3177_v1 = vmul.u32 %v3170_v16, %v3161_v19 }
 0x34a   : >> { %v4490_v61 = vpop.eup %4489  ;;  %v1546_v59 = vsub.s32 32, %v1545_v46  ;;  %v1550_v18 = vsub.s32 4294967266, %v1545_v46  ;;  %v1547_v10 = vshll.u32 %v6660_v53, %v1545_v46  ;;  %vm3179_vm6 = vc.u32 %v6688_v36, %v6683_v15 }
 0x34b   : >> { %v4492_v30 = vpop.eup %4491  ;;  %v3118_v23 = vxor.u32 2147483648, %v4490_v61  ;;  %vm1588_vm7 = vcmp.gt.s32.totalorder %v1587_v3, 0  ;;  %v3181_v0 = vsel %vm3179_vm6, %v3180_v14, %v6684_v5  ;;  %v1561_v54 = vsel %vm1476_vm2, %v1560_v4, %v6646_v47 }
 0x34c   : >> { %v3115_v49 = vxor.u32 2147483648, %v4492_v30  ;;  %v1548_v44 = vshrl.u32 %v1530_v55, %v1546_v59  ;;  %v1551_v11 = vadd.s32 127, %v1550_v18  ;;  %v3182_v38 = vadd.s32 %v3181_v0, %v3177_v1 }
 0x34d   : >> { %v3119_v8 = vsel %vm3117_vm4, %v3118_v23, %v4492_v30  ;;  %v1589_v20 = vsel %vm1588_vm7, %v1587_v3, 0  ;;  %v1584_v17 = vand.u32 8388607, %v1577_v7  ;;  %vm3111_vm8 = vweird.f32 %v6380_v25 }
 0x34e   : >> { %v3116_v53 = vsel %vm3114_vm3, %v4490_v61, %v3115_v49  ;;  %v1549_v42 = vor.u32 %v1548_v44, %v1547_v10  ;;  %v1552_v16 = vshll.u32 %v1551_v11, 23  ;;  %v3183_v26 = vadd.s32 536870912, %v3182_v38 }
 0x34f   : >> { %v3120_v13 = vsel %vm3113_vm1, %v3116_v53, %v3119_v8  ;;  %v1591_v12 = vand.u32 31, %v1589_v20  ;;  %vm6721_vm9 = vcmp.le.f32.partialorder %v1474_v24, 0.7853982  ;;  %v1585_v35 = vor.u32 8388608, %v1584_v17 }
 0x350   : >> { %v3121_v2 = vsel %vm3111_vm8, nan, %v3120_v13  ;;  %v1553_v27 = vor.u32 4788187, %v1552_v16  ;;  %v1563_v34 = vsel %vm6721_vm9, 0, %v1561_v54  ;;  %v6728_v6 = vshrl.u32 %v3183_v26, 30 }
 0x351   : >> { %3868 = vst [vmem:[%s5306_s28 + $0xc0] sm:$0xff] %v3121_v2  ;;  %v1592_v25 = vsub.s32 32, %v1591_v12  ;;  %v1556_v28 = vcvt.s32.f32 %v1549_v42  ;;  %v6732_v40 = vadd.f32 %v6521_v22, %v6241_v50  ;;  %v6735_v5 = vshrl.u32 %v1589_v20, 5 }
 0x352   : >> { %v1554_v58 = vand.u32 2147483647, %v1553_v27  ;;  %v3185_v24 = vshll.u32 %v6728_v6, 30  ;;  %v1594_v60 = vshll.u32 %v4699_v33, %v1591_v12  ;;  %v1597_v50 = vshll.u32 %v4700_v37, %v1591_v12 }
 0x353   : >> { %v1595_v56 = vshrl.u32 %v4700_v37, %v1592_v25  ;;  %v1598_v19 = vshrl.u32 %v4701_v39, %v1592_v25  ;;  %v1601_v3 = vshrl.u32 %v4702_v41, %v1592_v25  ;;  %v1604_v62 = vshrl.u32 %v4703_v43, %v1592_v25 }
 0x354   : >> { %v1557_v48 = vmul.f32 %v1556_v28, %v1554_v58  ;;  %v6742_v46 = vsub.s32 %v3182_v38, %v3185_v24  ;;  %v1600_v4 = vshll.u32 %v4701_v39, %v1591_v12  ;;  %v1607_v14 = vshrl.u32 %v4704_v51, %v1592_v25 }
 0x355   : >> { %v6747_v55 = vand.u32 3, %v1563_v34  ;;  %v1603_v59 = vshll.u32 %v4702_v41, %v1591_v12  ;;  %v1606_v18 = vshll.u32 %v4703_v43, %v1591_v12  ;;  %v1596_v30 = vor.u32 %v1595_v56, %v1594_v60 }
 0x356   : >> { %v1558_v61 = vxor.u32 2147483648, %v1557_v48  ;;  %v3188_v1 = vsub.s32 0, %v6742_v46  ;;  %v1599_v23 = vor.u32 %v1598_v19, %v1597_v50  ;;  %v1602_v10 = vor.u32 %v1601_v3, %v1600_v4 }
 0x357   : >> { %v1605_v44 = vor.u32 %v1604_v62, %v1603_v59  ;;  %v1608_v11 = vor.u32 %v1607_v14, %v1606_v18  ;;  %v6754_v0 = vshll.u32 %v1585_v35, 8  ;;  %vm1609_vm10 = vcmp.lt.s32.totalorder %v6735_v5, 1  ;;  %v6777_v35 = vpop.f32.mrb[26].mxu1 }
 0x358   : >> { %v1559_v49 = vsel %vm1476_vm2, %v1558_v61, %v1557_v48  ;;  %v4099_v54 = vmin.u32 %v3188_v1, %v6742_v46  ;;  %v3228_v38 = vand.u32 2139095040, %v6732_v40  ;;  %v1593_v20 = vshrl.u32 %v4699_v33, %v1592_v25  ;;  %v535_v19 = vpop.f32.mrb[27].mxu1 }
 0x359   : >> { %v1562_v8 = vsel %vm6721_vm9, %v6463_v57, %v1559_v49  ;;  %vm1610_vm11 = vcmp.lt.s32.totalorder %v6735_v5, 2  ;;  %vm1612_vm12 = vcmp.lt.s32.totalorder %v6735_v5, 4  ;;  %vm3124_vm13 = vcmp.lt.s32.totalorder %v6525_v21, 0 }
 0x35a   : >> { %4493 = vcosq.f32 %v1562_v8  ;;  %v3190_v53 = vclz %v4099_v54  ;;  %v1614_v42 = vsel %vm1612_vm12, %v1602_v10, 2102212464  ;;  %v1617_v16 = vsel %vm1609_vm10, %v1596_v30, %v1599_v23 }
 0x35b   : >> { %4495 = vsinq.f32 %v1562_v8  ;;  %vm1611_vm14 = vcmp.lt.s32.totalorder %v6735_v5, 3  ;;  %v1618_v17 = vsel %vm1612_vm12, %v1605_v44, 920167782  ;;  %v1621_v13 = vsel %vm1609_vm10, %v1599_v23, %v1602_v10 }
 0x35c   : >> { %v1622_v26 = vsel %vm1612_vm12, %v1608_v11, 1326507024  ;;  %v4100_v12 = vadd.s32 4294967294, %v3190_v53  ;;  %v1613_v2 = vsel %vm1609_vm10, %v1593_v20, %v1596_v30  ;;  %v1619_v47 = vsel %vm1611_vm14, %v1602_v10, %v1618_v17 }
 0x35d   : >> { %v1623_v27 = vsel %vm1611_vm14, %v1605_v44, %v1622_v26  ;;  %v1615_v34 = vsel %vm1611_vm14, %v1599_v23, %v1614_v42  ;;  %v1620_v25 = vsel %vm1610_vm11, %v1617_v16, %v1619_v47  ;;  %v3229_v28 = vshrl.u32 %v3228_v38, 23 }
 0x35e   : >> { %v1624_v58 = vsel %vm1610_vm11, %v1621_v13, %v1623_v27  ;;  %vm6781_vm15 = vcmp.le.f32.partialorder %v3122_v9, 0.7853982  ;;  %vm4101_vm0 = vcmp.lt.s32.totalorder %v4100_v12, 0  ;;  %v3208_v60 = vsub.s32 4, %v6728_v6 }
 0x35f   : >> { %v6787_v56 = vmul.u32.u64.low %v6754_v0, %v1624_v58  ;;  %v6788_v48 = vmul.u32.u64.high %v6754_v0, %v1624_v58, %v6787_v56  ;;  %v3193_v3 = vsel %vm4101_vm0, 0, %v4100_v12  ;;  %v4102_v4 = vadd.s32 4294967169, %v3229_v28 }
 0x360   : >> { %v6791_v62 = vmul.u32.u64.low %v6754_v0, %v1620_v25  ;;  %v6792_v50 = vmul.u32.u64.high %v6754_v0, %v1620_v25, %v6791_v62  ;;  %vm1566_vm1 = vweird.f32 %v6463_v57  ;;  %v3178_v9 = vadd.s32 %v6683_v15, %v6688_v36 }
 0x361   : >> { %v3194_v14 = vsub.s32 32, %v3193_v3  ;;  %v3198_v61 = vsub.s32 4294967266, %v3193_v3  ;;  %v1616_v59 = vsel %vm1610_vm11, %v1613_v2, %v1615_v34  ;;  %vm1568_vm2 = vcmp.lt.s32.totalorder %v6747_v55, 2 }
 0x362   : >> { %vm1569_vm3 = vcmp.eq.s32.totalorder %v6747_v55, 0  ;;  %v3225_v18 = vand.u32 2147483647, %v6732_v40  ;;  %v3235_v1 = vadd.s32 1, %v4102_v4  ;;  %v3195_v30 = vshll.u32 %v6742_v46, %v3193_v3 }
 0x363   : >> { %v3196_v23 = vshrl.u32 %v3178_v9, %v3194_v14  ;;  %v3199_v10 = vadd.s32 127, %v3198_v61  ;;  %vm1634_vm4 = vc.u32 %v6788_v48, %v6791_v62  ;;  %v3209_v36 = vsel %vm3124_vm13, %v3208_v60, %v6728_v6 }
 0x364   : >> { %v4494_v15 = vpop.eup %4493  ;;  %v1632_v5 = vmul.u32 %v6754_v0, %v1616_v59  ;;  %v1635_v49 = vadd.s32 1, %v6792_v50  ;;  %vm3236_vm5 = vcmp.gt.s32.totalorder %v3235_v1, 0  ;;  %vm1572_vm6 = vcmp.eq.s32.totalorder %v6747_v55, 2 }
 0x365   : >> { %v4496_v44 = vpop.eup %4495  ;;  %v1573_v11 = vxor.u32 2147483648, %v4494_v15  ;;  %v3197_v8 = vor.u32 %v3196_v23, %v3195_v30  ;;  %v3200_v54 = vshll.u32 %v3199_v10, 23  ;;  %v3237_v46 = vsel %vm3236_vm5, %v3235_v1, 0 }
 0x366   : >> { %v1570_v38 = vxor.u32 2147483648, %v4496_v44  ;;  %v1636_v20 = vsel %vm1634_vm4, %v1635_v49, %v6792_v50  ;;  %v3239_v53 = vand.u32 31, %v3237_v46  ;;  %v6815_v0 = vadd.f32 %v6521_v22, %v6342_v63 }
 0x367   : >> { %v1574_v42 = vsel %vm1572_vm6, %v1573_v11, %v4496_v44  ;;  %v3201_v16 = vor.u32 4788187, %v3200_v54  ;;  %v1637_v6 = vadd.s32 %v1636_v20, %v1632_v5  ;;  %v3211_v13 = vsel %vm6781_vm15, 0, %v3209_v36 }
 0x368   : >> { %v1571_v17 = vsel %vm1569_vm3, %v4494_v15, %v1570_v38  ;;  %v3232_v26 = vand.u32 8388607, %v3225_v18  ;;  %v3240_v12 = vsub.s32 32, %v3239_v53  ;;  %v3204_v27 = vcvt.s32.f32 %v3197_v8 }
 0x369   : >> { %v1575_v2 = vsel %vm1568_vm2, %v1571_v17, %v1574_v42  ;;  %v3202_v47 = vand.u32 2147483647, %v3201_v16  ;;  %v1638_v34 = vadd.s32 536870912, %v1637_v6  ;;  %v3242_v25 = vshll.u32 %v4699_v33, %v3239_v53 }
 0x36a   : >> { %v1576_v63 = vsel %vm1566_vm1, nan, %v1575_v2  ;;  %v3243_v58 = vshrl.u32 %v4700_v37, %v3240_v12  ;;  %v3246_v28 = vshrl.u32 %v4701_v39, %v3240_v12  ;;  %v3245_v19 = vshll.u32 %v4700_v37, %v3239_v53 }
 0x36b   : >> { %3853 = vst [vmem:[%s5306_s28 + $0x48] sm:$0xff] %v1576_v63  ;;  %v3205_v60 = vmul.f32 %v3204_v27, %v3202_v47  ;;  %v6831_v56 = vshrl.u32 %v1638_v34, 30  ;;  %v3249_v55 = vshrl.u32 %v4702_v41, %v3240_v12  ;;  %v3238_v3 = vshrl.u32 %v3237_v46, 5 }
 0x36c   : >> { %v3248_v50 = vshll.u32 %v4701_v39, %v3239_v53  ;;  %v3251_v57 = vshll.u32 %v4702_v41, %v3239_v53  ;;  %v3252_v4 = vshrl.u32 %v4703_v43, %v3240_v12  ;;  %v3244_v61 = vor.u32 %v3243_v58, %v3242_v25 }
 0x36d   : >> { %v3206_v9 = vxor.u32 2147483648, %v3205_v60  ;;  %v1640_v14 = vshll.u32 %v6831_v56, 30  ;;  %v3247_v59 = vor.u32 %v3246_v28, %v3245_v19  ;;  %v3254_v23 = vshll.u32 %v4703_v43, %v3239_v53 }
 0x36e   : >> { %v3250_v1 = vor.u32 %v3249_v55, %v3248_v50  ;;  %v3253_v30 = vor.u32 %v3252_v4, %v3251_v57  ;;  %v3255_v10 = vshrl.u32 %v4704_v51, %v3240_v12  ;;  %v6843_v36 = vand.u32 3, %v3211_v13  ;;  %v6864_v55 = vpop.f32.mrb[28].mxu0 }
 0x36f   : >> { %v3207_v15 = vsel %vm3124_vm13, %v3206_v9, %v3205_v60  ;;  %v6845_v5 = vsub.s32 %v1637_v6, %v1640_v14  ;;  %v3233_v49 = vor.u32 8388608, %v3232_v26  ;;  %v3241_v11 = vshrl.u32 %v4699_v33, %v3240_v12  ;;  %v460_v4 = vpop.f32.mrb[29].mxu0 }
 0x370   : >> { %v3210_v44 = vsel %vm6781_vm15, %v6525_v21, %v3207_v15  ;;  %v3256_v8 = vor.u32 %v3255_v10, %v3254_v23  ;;  %v1683_v54 = vand.u32 2139095040, %v6815_v0  ;;  %vm3257_vm7 = vcmp.lt.s32.totalorder %v3238_v3, 1 }
 0x371   : >> { %4497 = vcosq.f32 %v3210_v44  ;;  %v1643_v46 = vsub.s32 0, %v6845_v5  ;;  %vm3260_vm8 = vcmp.lt.s32.totalorder %v3238_v3, 4  ;;  %v3265_v20 = vsel %vm3257_vm7, %v3244_v61, %v3247_v59 }
 0x372   : >> { %4499 = vsinq.f32 %v3210_v44  ;;  %v3262_v38 = vsel %vm3260_vm8, %v3250_v1, 2102212464  ;;  %v3266_v53 = vsel %vm3260_vm8, %v3253_v30, 920167782  ;;  %vm3258_vm9 = vcmp.lt.s32.totalorder %v3238_v3, 2 }
 0x373   : >> { %v4039_v42 = vmin.u32 %v1643_v46, %v6845_v5  ;;  %vm3259_vm10 = vcmp.lt.s32.totalorder %v3238_v3, 3  ;;  %v3273_v24 = vshll.u32 %v3233_v49, 8  ;;  %v3261_v16 = vsel %vm3257_vm7, %v3241_v11, %v3244_v61 }
 0x374   : >> { %v3267_v6 = vsel %vm3259_vm10, %v3250_v1, %v3266_v53  ;;  %v3269_v17 = vsel %vm3257_vm7, %v3247_v59, %v3250_v1  ;;  %v3270_v13 = vsel %vm3260_vm8, %v3256_v8, 1326507024  ;;  %v3263_v12 = vsel %vm3259_vm10, %v3247_v59, %v3262_v38 }
 0x375   : >> { %v1645_v26 = vclz %v4039_v42  ;;  %v3268_v2 = vsel %vm3258_vm9, %v3265_v20, %v3267_v6  ;;  %v3271_v47 = vsel %vm3259_vm10, %v3253_v30, %v3270_v13  ;;  %v1663_v27 = vsub.s32 4, %v6831_v56 }
 0x376   : >> { %v3272_v34 = vsel %vm3258_vm9, %v3269_v17, %v3271_v47  ;;  %v6857_v63 = vmul.u32.u64.low %v3273_v24, %v3268_v2  ;;  %v6858_v25 = vmul.u32.u64.high %v3273_v24, %v3268_v2, %v6857_v63  ;;  %v1684_v19 = vshrl.u32 %v1683_v54, 23 }
 0x377   : >> { %v4040_v58 = vadd.s32 4294967294, %v1645_v26  ;;  %v6861_v28 = vmul.u32.u64.low %v3273_v24, %v3272_v34  ;;  %v6862_v60 = vmul.u32.u64.high %v3273_v24, %v3272_v34, %v6861_v28  ;;  %vm3214_vm11 = vweird.f32 %v6525_v21 }
 0x378   : >> { %vm3216_vm12 = vcmp.lt.s32.totalorder %v6843_v36, 2  ;;  %vm1579_vm13 = vcmp.lt.s32.totalorder %v6562_v52, 0  ;;  %v3264_v50 = vsel %vm3258_vm9, %v3261_v16, %v3263_v12  ;;  %v6872_v57 = vadd.f32 %v6521_v22, %v6425_v45 }
 0x379   : >> { %vm3217_vm14 = vcmp.eq.s32.totalorder %v6843_v36, 0  ;;  %vm3220_vm15 = vcmp.eq.s32.totalorder %v6843_v36, 2  ;;  %vm4041_vm0 = vcmp.lt.s32.totalorder %v4040_v58, 0  ;;  %v4042_v9 = vadd.s32 4294967169, %v1684_v19 }
 0x37a   : >> { %v1633_v14 = vadd.s32 %v6791_v62, %v6788_v48  ;;  %v1648_v61 = vsel %vm4041_vm0, 0, %v4040_v58  ;;  %v3283_v59 = vadd.s32 1, %v6858_v25  ;;  %v1680_v3 = vand.u32 2147483647, %v6815_v0 }
 0x37b   : >> { %v4498_v1 = vpop.eup %4497  ;;  %v1649_v30 = vsub.s32 32, %v1648_v61  ;;  %v1653_v23 = vsub.s32 4294967266, %v1648_v61  ;;  %v1664_v45 = vsel %vm1579_vm13, %v1663_v27, %v6831_v56  ;;  %v3280_v10 = vmul.u32 %v3273_v24, %v3264_v50 }
 0x37c   : >> { %v4500_v15 = vpop.eup %4499  ;;  %v3221_v49 = vxor.u32 2147483648, %v4498_v1  ;;  %v1650_v44 = vshll.u32 %v6845_v5, %v1648_v61  ;;  %vm3282_vm1 = vc.u32 %v6862_v60, %v6857_v63  ;;  %v1690_v48 = vadd.s32 1, %v4042_v9 }
 0x37d   : >> { %v3218_v62 = vxor.u32 2147483648, %v4500_v15  ;;  %v1651_v11 = vshrl.u32 %v1633_v14, %v1649_v30  ;;  %v1654_v8 = vadd.s32 127, %v1653_v23  ;;  %v3284_v54 = vsel %vm3282_vm1, %v3283_v59, %v6858_v25 }
 0x37e   : >> { %v3222_v46 = vsel %vm3220_vm15, %v3221_v49, %v4500_v15  ;;  %v3285_v38 = vadd.s32 %v3284_v54, %v3280_v10  ;;  %v1687_v56 = vand.u32 8388607, %v1680_v3  ;;  %vm1691_vm2 = vcmp.gt.s32.totalorder %v1690_v48, 0 }
 0x37f   : >> { %v3219_v5 = vsel %vm3217_vm14, %v4498_v1, %v3218_v62  ;;  %v1652_v20 = vor.u32 %v1651_v11, %v1650_v44  ;;  %v1655_v53 = vshll.u32 %v1654_v8, 23  ;;  %v1692_v42 = vsel %vm1691_vm2, %v1690_v48, 0 }
 0x380   : >> { %v3223_v24 = vsel %vm3216_vm12, %v3219_v5, %v3222_v46  ;;  %v3286_v16 = vadd.s32 536870912, %v3285_v38  ;;  %v1694_v6 = vand.u32 31, %v1692_v42  ;;  %v3331_v17 = vand.u32 2139095040, %v6872_v57 }
 0x381   : >> { %v3224_v13 = vsel %vm3214_vm11, nan, %v3223_v24  ;;  %v1656_v26 = vor.u32 4788187, %v1655_v53  ;;  %vm6901_vm3 = vcmp.le.f32.partialorder %v1577_v7, 0.7853982  ;;  %v6909_v36 = vadd.f32 %v6521_v22, %v6512_v29 }
 0x382   : >> { %3869 = vst [vmem:[%s5306_s28 + $0xc8] sm:$0xff] %v3224_v13  ;;  %v6905_v2 = vshrl.u32 %v3286_v16, 30  ;;  %v1695_v47 = vsub.s32 32, %v1694_v6  ;;  %v1659_v34 = vcvt.s32.f32 %v1652_v20  ;;  %v1666_v21 = vsel %vm6901_vm3, 0, %v1664_v45 }
 0x383   : >> { %v1657_v27 = vand.u32 2147483647, %v1656_v26  ;;  %v1688_v25 = vor.u32 8388608, %v1687_v56  ;;  %v1697_v7 = vshll.u32 %v4699_v33, %v1694_v6  ;;  %v3332_v19 = vshrl.u32 %v3331_v17, 23  ;;  %v6940_v17 = vpop.f32.mrb[28].mxu1 }
 0x384   : >> { %v3288_v58 = vshll.u32 %v6905_v2, 30  ;;  %v1698_v28 = vshrl.u32 %v4700_v37, %v1695_v47  ;;  %v1701_v4 = vshrl.u32 %v4701_v39, %v1695_v47  ;;  %v1704_v9 = vshrl.u32 %v4702_v41, %v1695_v47 }
 0x385   : >> { %v1660_v50 = vmul.f32 %v1659_v34, %v1657_v27  ;;  %v1707_v29 = vshrl.u32 %v4703_v43, %v1695_v47  ;;  %v1700_v14 = vshll.u32 %v4700_v37, %v1694_v6  ;;  %v1703_v61 = vshll.u32 %v4701_v39, %v1694_v6  ;;  %v540_v27 = vpop.f32.mrb[29].mxu1 }
 0x386   : >> { %v6919_v22 = vsub.s32 %v3285_v38, %v3288_v58  ;;  %v1710_v59 = vshrl.u32 %v4704_v51, %v1695_v47  ;;  %v1693_v30 = vshrl.u32 %v1692_v42, 5  ;;  %v1706_v23 = vshll.u32 %v4702_v41, %v1694_v6 }
 0x387   : >> { %v1661_v1 = vxor.u32 2147483648, %v1660_v50  ;;  %v1709_v45 = vshll.u32 %v4703_v43, %v1694_v6  ;;  %v1699_v15 = vor.u32 %v1698_v28, %v1697_v7  ;;  %v1702_v49 = vor.u32 %v1701_v4, %v1700_v14 }
 0x388   : >> { %v3291_v10 = vsub.s32 0, %v6919_v22  ;;  %v1705_v44 = vor.u32 %v1704_v9, %v1703_v61  ;;  %v6929_v62 = vand.u32 3, %v1666_v21  ;;  %v1708_v11 = vor.u32 %v1707_v29, %v1706_v23 }
 0x389   : >> { %v1662_v48 = vsel %vm1579_vm13, %v1661_v1, %v1660_v50  ;;  %v1711_v8 = vor.u32 %v1710_v59, %v1709_v45  ;;  %v6935_v38 = vshll.u32 %v1688_v25, 8  ;;  %v4106_v56 = vadd.s32 4294967169, %v3332_v19 }
 0x38a   : >> { %v1665_v54 = vsel %vm6901_vm3, %v6562_v52, %v1662_v48  ;;  %v4103_v46 = vmin.u32 %v3291_v10, %v6919_v22  ;;  %v1696_v5 = vshrl.u32 %v4699_v33, %v1695_v47  ;;  %vm1712_vm4 = vcmp.lt.s32.totalorder %v1693_v30, 1 }
 0x38b   : >> { %4501 = vcosq.f32 %v1665_v54  ;;  %vm1715_vm5 = vcmp.lt.s32.totalorder %v1693_v30, 4  ;;  %v1720_v42 = vsel %vm1712_vm4, %v1699_v15, %v1702_v49  ;;  %vm1714_vm6 = vcmp.lt.s32.totalorder %v1693_v30, 3 }
 0x38c   : >> { %4503 = vsinq.f32 %v1665_v54  ;;  %v3293_v20 = vclz %v4103_v46  ;;  %v1717_v53 = vsel %vm1715_vm5, %v1705_v44, 2102212464  ;;  %v1721_v24 = vsel %vm1715_vm5, %v1708_v11, 920167782 }
 0x38d   : >> { %v1724_v16 = vsel %vm1712_vm4, %v1702_v49, %v1705_v44  ;;  %v1725_v6 = vsel %vm1715_vm5, %v1711_v8, 1326507024  ;;  %vm1713_vm7 = vcmp.lt.s32.totalorder %v1693_v30, 2  ;;  %v1722_v26 = vsel %vm1714_vm6, %v1705_v44, %v1721_v24 }
 0x38e   : >> { %v4104_v13 = vadd.s32 4294967294, %v3293_v20  ;;  %v1726_v12 = vsel %vm1714_vm6, %v1708_v11, %v1725_v6  ;;  %v1716_v47 = vsel %vm1712_vm4, %v1696_v5, %v1699_v15  ;;  %v1718_v34 = vsel %vm1714_vm6, %v1702_v49, %v1717_v53 }
 0x38f   : >> { %v1723_v21 = vsel %vm1713_vm7, %v1720_v42, %v1722_v26  ;;  %v1727_v25 = vsel %vm1713_vm7, %v1724_v16, %v1726_v12  ;;  %vm6947_vm8 = vcmp.le.f32.partialorder %v3225_v18, 0.7853982  ;;  %v3338_v19 = vadd.s32 1, %v4106_v56 }
 0x390   : >> { %vm4105_vm9 = vcmp.lt.s32.totalorder %v4104_v13, 0  ;;  %v6952_v7 = vmul.u32.u64.low %v6935_v38, %v1727_v25  ;;  %v6953_v28 = vmul.u32.u64.high %v6935_v38, %v1727_v25, %v6952_v7  ;;  %v3311_v4 = vsub.s32 4, %v6905_v2 }
 0x391   : >> { %v3296_v50 = vsel %vm4105_vm9, 0, %v4104_v13  ;;  %v6957_v9 = vmul.u32.u64.low %v6935_v38, %v1723_v21  ;;  %v6958_v29 = vmul.u32.u64.high %v6935_v38, %v1723_v21, %v6957_v9  ;;  %vm1669_vm10 = vweird.f32 %v6562_v52 }
 0x392   : >> { %v3281_v18 = vadd.s32 %v6857_v63, %v6862_v60  ;;  %v3297_v14 = vsub.s32 32, %v3296_v50  ;;  %v3301_v61 = vsub.s32 4294967266, %v3296_v50  ;;  %vm3339_vm11 = vcmp.gt.s32.totalorder %v3338_v19, 0 }
 0x393   : >> { %vm1671_vm12 = vcmp.lt.s32.totalorder %v6929_v62, 2  ;;  %vm3227_vm13 = vcmp.lt.s32.totalorder %v6732_v40, 0  ;;  %v1719_v59 = vsel %vm1713_vm7, %v1716_v47, %v1718_v34  ;;  %v3340_v1 = vsel %vm3339_vm11, %v3338_v19, 0 }
 0x394   : >> { %v3298_v23 = vshll.u32 %v6919_v22, %v3296_v50  ;;  %v3299_v45 = vshrl.u32 %v3281_v18, %v3297_v14  ;;  %v3302_v10 = vadd.s32 127, %v3301_v61  ;;  %vm1737_vm14 = vc.u32 %v6953_v28, %v6957_v9 }
 0x395   : >> { %v4502_v15 = vpop.eup %4501  ;;  %v3312_v63 = vsel %vm3227_vm13, %v3311_v4, %v6905_v2  ;;  %v1738_v60 = vadd.s32 1, %v6958_v29  ;;  %v3328_v49 = vand.u32 2147483647, %v6872_v57  ;;  %v3342_v44 = vand.u32 31, %v3340_v1 }
 0x396   : >> { %v4504_v30 = vpop.eup %4503  ;;  %v1676_v48 = vxor.u32 2147483648, %v4502_v15  ;;  %v3300_v11 = vor.u32 %v3299_v45, %v3298_v23  ;;  %v3303_v8 = vshll.u32 %v3302_v10, 23  ;;  %v1735_v22 = vmul.u32 %v6935_v38, %v1719_v59 }
 0x397   : >> { %v1673_v54 = vxor.u32 2147483648, %v4504_v30  ;;  %vm1675_vm15 = vcmp.eq.s32.totalorder %v6929_v62, 2  ;;  %v1739_v46 = vsel %vm1737_vm14, %v1738_v60, %v6958_v29  ;;  %v3343_v56 = vsub.s32 32, %v3342_v44 }
 0x398   : >> { %vm1672_vm0 = vcmp.eq.s32.totalorder %v6929_v62, 0  ;;  %v1677_v2 = vsel %vm1675_vm15, %v1676_v48, %v4504_v30  ;;  %v3304_v5 = vor.u32 4788187, %v3303_v8  ;;  %v1740_v20 = vadd.s32 %v1739_v46, %v1735_v22 }
 0x399   : >> { %v1674_v53 = vsel %vm1672_vm0, %v4502_v15, %v1673_v54  ;;  %v3314_v42 = vsel %vm6947_vm8, 0, %v3312_v63  ;;  %v3335_v24 = vand.u32 8388607, %v3328_v49  ;;  %v6983_v38 = vshrl.u32 %v3340_v1, 5 }
 0x39a   : >> { %v1678_v16 = vsel %vm1671_vm12, %v1674_v53, %v1677_v2  ;;  %v3305_v6 = vand.u32 2147483647, %v3304_v5  ;;  %v3307_v13 = vcvt.s32.f32 %v3300_v11  ;;  %v1741_v26 = vadd.s32 536870912, %v1740_v20 }
 0x39b   : >> { %v1679_v12 = vsel %vm1669_vm10, nan, %v1678_v16  ;;  %v3346_v27 = vshrl.u32 %v4700_v37, %v3343_v56  ;;  %v3349_v47 = vshrl.u32 %v4701_v39, %v3343_v56  ;;  %v3352_v34 = vshrl.u32 %v4702_v41, %v3343_v56 }
 0x39c   : >> { %3854 = vst [vmem:[%s5306_s28 + $0x50] sm:$0xff] %v1679_v12  ;;  %v3308_v21 = vmul.f32 %v3307_v13, %v3305_v6  ;;  %v6993_v25 = vshrl.u32 %v1741_v26, 30  ;;  %v3345_v7 = vshll.u32 %v4699_v33, %v3342_v44  ;;  %v3351_v62 = vshll.u32 %v4701_v39, %v3342_v44 }
 0x39d   : >> { %v3348_v19 = vshll.u32 %v4700_v37, %v3342_v44  ;;  %v3354_v50 = vshll.u32 %v4702_v41, %v3342_v44  ;;  %v3355_v52 = vshrl.u32 %v4703_v43, %v3343_v56  ;;  %v3358_v4 = vshrl.u32 %v4704_v51, %v3343_v56 }
 0x39e   : >> { %v3309_v29 = vxor.u32 2147483648, %v3308_v21  ;;  %v1743_v18 = vshll.u32 %v6993_v25, 30  ;;  %v3336_v14 = vor.u32 8388608, %v3335_v24  ;;  %v3353_v61 = vor.u32 %v3352_v34, %v3351_v62  ;;  %v7041_v62 = vpop.f32.mrb[30].mxu0 }
 0x39f   : >> { %v3347_v59 = vor.u32 %v3346_v27, %v3345_v7  ;;  %v3350_v1 = vor.u32 %v3349_v47, %v3348_v19  ;;  %v3356_v23 = vor.u32 %v3355_v52, %v3354_v50  ;;  %v3357_v45 = vshll.u32 %v4703_v43, %v3342_v44  ;;  %v465_v50 = vpop.f32.mrb[31].mxu0 }
 0x3a0   : >> { %v3310_v10 = vsel %vm3227_vm13, %v3309_v29, %v3308_v21  ;;  %v7005_v15 = vand.u32 3, %v3314_v42  ;;  %v7007_v63 = vsub.s32 %v1740_v20, %v1743_v18  ;;  %v1786_v60 = vand.u32 2139095040, %v6909_v36 }
 0x3a1   : >> { %v3313_v30 = vsel %vm6947_vm8, %v6732_v40, %v3310_v10  ;;  %v3344_v48 = vshrl.u32 %v4699_v33, %v3343_v56  ;;  %v3359_v11 = vor.u32 %v3358_v4, %v3357_v45  ;;  %vm3363_vm1 = vcmp.lt.s32.totalorder %v6983_v38, 4 }
 0x3a2   : >> { %4505 = vcosq.f32 %v3313_v30  ;;  %v1746_v44 = vsub.s32 0, %v7007_v63  ;;  %vm3360_vm2 = vcmp.lt.s32.totalorder %v6983_v38, 1  ;;  %v3365_v8 = vsel %vm3363_vm1, %v3353_v61, 2102212464 }
 0x3a3   : >> { %4507 = vsinq.f32 %v3313_v30  ;;  %v3368_v22 = vsel %vm3360_vm2, %v3347_v59, %v3350_v1  ;;  %v3369_v54 = vsel %vm3363_vm1, %v3356_v23, 920167782  ;;  %v3376_v58 = vshll.u32 %v3336_v14, 8 }
 0x3a4   : >> { %v4043_v46 = vmin.u32 %v1746_v44, %v7007_v63  ;;  %vm3361_vm3 = vcmp.lt.s32.totalorder %v6983_v38, 2  ;;  %vm3362_vm4 = vcmp.lt.s32.totalorder %v6983_v38, 3  ;;  %v3364_v56 = vsel %vm3360_vm2, %v3344_v48, %v3347_v59 }
 0x3a5   : >> { %v3366_v2 = vsel %vm3362_vm4, %v3350_v1, %v3365_v8  ;;  %v3370_v5 = vsel %vm3362_vm4, %v3353_v61, %v3369_v54  ;;  %v3372_v20 = vsel %vm3360_vm2, %v3350_v1, %v3353_v61  ;;  %v3373_v53 = vsel %vm3363_vm1, %v3359_v11, 1326507024 }
 0x3a6   : >> { %v1748_v42 = vclz %v4043_v46  ;;  %v3371_v24 = vsel %vm3361_vm3, %v3368_v22, %v3370_v5  ;;  %v3374_v16 = vsel %vm3362_vm4, %v3356_v23, %v3373_v53  ;;  %v1787_v6 = vshrl.u32 %v1786_v60, 23 }
 0x3a7   : >> { %v3375_v13 = vsel %vm3361_vm3, %v3372_v20, %v3374_v16  ;;  %v7030_v26 = vmul.u32.u64.low %v3376_v58, %v3371_v24  ;;  %v7031_v12 = vmul.u32.u64.high %v3376_v58, %v3371_v24, %v7030_v26  ;;  %vm3319_vm5 = vcmp.lt.s32.totalorder %v7005_v15, 2 }
 0x3a8   : >> { %v4044_v27 = vadd.s32 4294967294, %v1748_v42  ;;  %v7034_v47 = vmul.u32.u64.low %v3376_v58, %v3375_v13  ;;  %v7035_v34 = vmul.u32.u64.high %v3376_v58, %v3375_v13, %v7034_v47  ;;  %v4046_v21 = vadd.s32 4294967169, %v1787_v6  ;;  %v7080_v6 = vld [vmem:[%s7750_s2] ss:$0 sm:$0xff] }
 0x3a9   : >> { %vm1682_vm6 = vcmp.lt.s32.totalorder %v6815_v0, 0  ;;  %v3367_v7 = vsel %vm3361_vm3, %v3364_v56, %v3366_v2  ;;  %vm3320_vm7 = vcmp.eq.s32.totalorder %v7005_v15, 0  ;;  %vm3323_vm8 = vcmp.eq.s32.totalorder %v7005_v15, 2 }
 0x3aa   : >> { %vm4045_vm9 = vcmp.lt.s32.totalorder %v4044_v27, 0  ;;  %v1793_v19 = vadd.s32 1, %v4046_v21  ;;  %v1766_v4 = vsub.s32 4, %v6993_v25  ;;  %v3386_v29 = vadd.s32 1, %v7031_v12 }
 0x3ab   : >> { %v1751_v52 = vsel %vm4045_vm9, 0, %v4044_v27  ;;  %v1783_v18 = vand.u32 2147483647, %v6909_v36  ;;  %v1736_v38 = vadd.s32 %v6957_v9, %v6953_v28  ;;  %v3383_v1 = vmul.u32 %v3376_v58, %v3367_v7 }
 0x3ac   : >> { %v4506_v14 = vpop.eup %4505  ;;  %v1752_v61 = vsub.s32 32, %v1751_v52  ;;  %v1756_v59 = vsub.s32 4294967266, %v1751_v52  ;;  %v1753_v10 = vshll.u32 %v7007_v63, %v1751_v52  ;;  %vm3385_vm10 = vc.u32 %v7035_v34, %v7030_v26 }
 0x3ad   : >> { %v4508_v23 = vpop.eup %4507  ;;  %v3324_v45 = vxor.u32 2147483648, %v4506_v14  ;;  %vm1794_vm11 = vcmp.gt.s32.totalorder %v1793_v19, 0  ;;  %v3387_v11 = vsel %vm3385_vm10, %v3386_v29, %v7031_v12  ;;  %v1767_v9 = vsel %vm1682_vm6, %v1766_v4, %v6993_v25 }
 0x3ae   : >> { %v3321_v60 = vxor.u32 2147483648, %v4508_v23  ;;  %v1754_v30 = vshrl.u32 %v1736_v38, %v1752_v61  ;;  %v1757_v48 = vadd.s32 127, %v1756_v59  ;;  %v3388_v44 = vadd.s32 %v3387_v11, %v3383_v1 }
 0x3af   : >> { %v3325_v28 = vsel %vm3323_vm8, %v3324_v45, %v4508_v23  ;;  %v1795_v8 = vsel %vm1794_vm11, %v1793_v19, 0  ;;  %v1790_v58 = vand.u32 8388607, %v1783_v18  ;;  %vm3317_vm12 = vweird.f32 %v6732_v40 }
 0x3b0   : >> { %v3322_v63 = vsel %vm3320_vm7, %v4506_v14, %v3321_v60  ;;  %v1755_v22 = vor.u32 %v1754_v30, %v1753_v10  ;;  %v1758_v54 = vshll.u32 %v1757_v48, 23  ;;  %v3389_v56 = vadd.s32 536870912, %v3388_v44 }
 0x3b1   : >> { %v3326_v46 = vsel %vm3319_vm5, %v3322_v63, %v3325_v28  ;;  %v1797_v2 = vand.u32 31, %v1795_v8  ;;  %vm7068_vm13 = vcmp.le.f32.partialorder %v1680_v3, 0.7853982  ;;  %v1791_v16 = vor.u32 8388608, %v1790_v58 }
 0x3b2   : >> { %v3327_v5 = vsel %vm3317_vm12, nan, %v3326_v46  ;;  %v1759_v20 = vor.u32 4788187, %v1758_v54  ;;  %v1769_v53 = vsel %vm7068_vm13, 0, %v1767_v9  ;;  %v7075_v42 = vshrl.u32 %v3389_v56, 30 }
 0x3b3   : >> { %3870 = vst [vmem:[%s5306_s28 + $0xd0] sm:$0xff] %v3327_v5  ;;  %v1798_v40 = vsub.s32 32, %v1797_v2  ;;  %v1762_v15 = vcvt.s32.f32 %v1755_v22  ;;  %v7084_v3 = vadd.f32 %v7080_v6, %v6593_v32  ;;  %v7087_v12 = vshrl.u32 %v1795_v8, 5 }
 0x3b4   : >> { %v1760_v24 = vand.u32 2147483647, %v1759_v20  ;;  %v3391_v13 = vshll.u32 %v7075_v42, 30  ;;  %v1800_v27 = vshll.u32 %v4699_v33, %v1797_v2  ;;  %v1803_v32 = vshll.u32 %v4700_v37, %v1797_v2 }
 0x3b5   : >> { %v1801_v47 = vshrl.u32 %v4700_v37, %v1798_v40  ;;  %v1804_v7 = vshrl.u32 %v4701_v39, %v1798_v40  ;;  %v1807_v19 = vshrl.u32 %v4702_v41, %v1798_v40  ;;  %v1810_v50 = vshrl.u32 %v4703_v43, %v1798_v40 }
 0x3b6   : >> { %v1763_v21 = vmul.f32 %v1762_v15, %v1760_v24  ;;  %v7094_v52 = vsub.s32 %v3388_v44, %v3391_v13  ;;  %v1806_v4 = vshll.u32 %v4701_v39, %v1797_v2  ;;  %v1813_v29 = vshrl.u32 %v4704_v51, %v1798_v40 }
 0x3b7   : >> { %v7099_v38 = vand.u32 3, %v1769_v53  ;;  %v1809_v61 = vshll.u32 %v4702_v41, %v1797_v2  ;;  %v1812_v59 = vshll.u32 %v4703_v43, %v1797_v2  ;;  %v1802_v23 = vor.u32 %v1801_v47, %v1800_v27 }
 0x3b8   : >> { %v1764_v14 = vxor.u32 2147483648, %v1763_v21  ;;  %v3394_v1 = vsub.s32 0, %v7094_v52  ;;  %v1805_v45 = vor.u32 %v1804_v7, %v1803_v32  ;;  %v1808_v10 = vor.u32 %v1807_v19, %v1806_v4 }
 0x3b9   : >> { %v1811_v30 = vor.u32 %v1810_v50, %v1809_v61  ;;  %v1814_v48 = vor.u32 %v1813_v29, %v1812_v59  ;;  %v7106_v11 = vshll.u32 %v1791_v16, 8  ;;  %vm1815_vm14 = vcmp.lt.s32.totalorder %v7087_v12, 1  ;;  %v7129_v16 = vpop.f32.mrb[30].mxu1 }
 0x3ba   : >> { %v1765_v60 = vsel %vm1682_vm6, %v1764_v14, %v1763_v21  ;;  %v4107_v9 = vmin.u32 %v3394_v1, %v7094_v52  ;;  %v3434_v44 = vand.u32 2139095040, %v7084_v3  ;;  %v1799_v8 = vshrl.u32 %v4699_v33, %v1798_v40  ;;  %v545_v7 = vpop.f32.mrb[31].mxu1 }
 0x3bb   : >> { %v1768_v28 = vsel %vm7068_vm13, %v6815_v0, %v1765_v60  ;;  %vm1816_vm15 = vcmp.lt.s32.totalorder %v7087_v12, 2  ;;  %vm1818_vm0 = vcmp.lt.s32.totalorder %v7087_v12, 4  ;;  %vm3330_vm1 = vcmp.lt.s32.totalorder %v6872_v57, 0 }
 0x3bc   : >> { %4509 = vcosq.f32 %v1768_v28  ;;  %v3396_v63 = vclz %v4107_v9  ;;  %v1820_v22 = vsel %vm1818_vm0, %v1808_v10, 2102212464  ;;  %v1823_v54 = vsel %vm1815_vm14, %v1802_v23, %v1805_v45 }
 0x3bd   : >> { %4511 = vsinq.f32 %v1768_v28  ;;  %vm1817_vm2 = vcmp.lt.s32.totalorder %v7087_v12, 3  ;;  %v1824_v58 = vsel %vm1818_vm0, %v1811_v30, 920167782  ;;  %v1827_v46 = vsel %vm1815_vm14, %v1805_v45, %v1808_v10 }
 0x3be   : >> { %v1828_v56 = vsel %vm1818_vm0, %v1814_v48, 1326507024  ;;  %v4108_v2 = vadd.s32 4294967294, %v3396_v63  ;;  %v1819_v5 = vsel %vm1815_vm14, %v1799_v8, %v1802_v23  ;;  %v1825_v25 = vsel %vm1817_vm2, %v1808_v10, %v1824_v58 }
 0x3bf   : >> { %v1829_v20 = vsel %vm1817_vm2, %v1811_v30, %v1828_v56  ;;  %v1821_v53 = vsel %vm1817_vm2, %v1805_v45, %v1820_v22  ;;  %v1826_v40 = vsel %vm1816_vm15, %v1823_v54, %v1825_v25  ;;  %v3435_v15 = vshrl.u32 %v3434_v44, 23 }
 0x3c0   : >> { %v1830_v24 = vsel %vm1816_vm15, %v1827_v46, %v1829_v20  ;;  %vm7133_vm3 = vcmp.le.f32.partialorder %v3328_v49, 0.7853982  ;;  %vm4109_vm4 = vcmp.lt.s32.totalorder %v4108_v2, 0  ;;  %v3414_v27 = vsub.s32 4, %v7075_v42 }
 0x3c1   : >> { %v7139_v47 = vmul.u32.u64.low %v7106_v11, %v1830_v24  ;;  %v7140_v21 = vmul.u32.u64.high %v7106_v11, %v1830_v24, %v7139_v47  ;;  %v3399_v19 = vsel %vm4109_vm4, 0, %v4108_v2  ;;  %v4110_v4 = vadd.s32 4294967169, %v3435_v15 }
 0x3c2   : >> { %v7143_v50 = vmul.u32.u64.low %v7106_v11, %v1826_v40  ;;  %v7144_v32 = vmul.u32.u64.high %v7106_v11, %v1826_v40, %v7143_v50  ;;  %vm1772_vm5 = vweird.f32 %v6815_v0  ;;  %v3384_v49 = vadd.s32 %v7030_v26, %v7035_v34 }
 0x3c3   : >> { %v3400_v29 = vsub.s32 32, %v3399_v19  ;;  %v3404_v14 = vsub.s32 4294967266, %v3399_v19  ;;  %v1822_v61 = vsel %vm1816_vm15, %v1819_v5, %v1821_v53  ;;  %vm1774_vm6 = vcmp.lt.s32.totalorder %v7099_v38, 2 }
 0x3c4   : >> { %vm1775_vm7 = vcmp.eq.s32.totalorder %v7099_v38, 0  ;;  %v3431_v59 = vand.u32 2147483647, %v7084_v3  ;;  %v3441_v1 = vadd.s32 1, %v4110_v4  ;;  %v3401_v23 = vshll.u32 %v7094_v52, %v3399_v19 }
 0x3c5   : >> { %v3402_v45 = vshrl.u32 %v3384_v49, %v3400_v29  ;;  %v3405_v10 = vadd.s32 127, %v3404_v14  ;;  %vm1840_vm8 = vc.u32 %v7140_v21, %v7143_v50  ;;  %v3415_v34 = vsel %vm3330_vm1, %v3414_v27, %v7075_v42 }
 0x3c6   : >> { %v4510_v26 = vpop.eup %4509  ;;  %v1838_v12 = vmul.u32 %v7106_v11, %v1822_v61  ;;  %v1841_v60 = vadd.s32 1, %v7144_v32  ;;  %vm3442_vm9 = vcmp.gt.s32.totalorder %v3441_v1, 0  ;;  %vm1778_vm10 = vcmp.eq.s32.totalorder %v7099_v38, 2 }
 0x3c7   : >> { %v4512_v30 = vpop.eup %4511  ;;  %v1779_v48 = vxor.u32 2147483648, %v4510_v26  ;;  %v3403_v28 = vor.u32 %v3402_v45, %v3401_v23  ;;  %v3406_v9 = vshll.u32 %v3405_v10, 23  ;;  %v3443_v52 = vsel %vm3442_vm9, %v3441_v1, 0 }
 0x3c8   : >> { %v1776_v44 = vxor.u32 2147483648, %v4512_v30  ;;  %v1842_v8 = vsel %vm1840_vm8, %v1841_v60, %v7144_v32  ;;  %v3445_v63 = vand.u32 31, %v3443_v52  ;;  %v7167_v11 = vadd.f32 %v7080_v6, %v6694_v31 }
 0x3c9   : >> { %v1780_v22 = vsel %vm1778_vm10, %v1779_v48, %v4512_v30  ;;  %v3407_v54 = vor.u32 4788187, %v3406_v9  ;;  %v1843_v42 = vadd.s32 %v1842_v8, %v1838_v12  ;;  %v3417_v46 = vsel %vm7133_vm3, 0, %v3415_v34 }
 0x3ca   : >> { %v1777_v58 = vsel %vm1775_vm7, %v4510_v26, %v1776_v44  ;;  %v3438_v56 = vand.u32 8388607, %v3431_v59  ;;  %v3446_v2 = vsub.s32 32, %v3445_v63  ;;  %v3410_v20 = vcvt.s32.f32 %v3403_v28 }
 0x3cb   : >> { %v1781_v5 = vsel %vm1774_vm6, %v1777_v58, %v1780_v22  ;;  %v3408_v25 = vand.u32 2147483647, %v3407_v54  ;;  %v1844_v53 = vadd.s32 536870912, %v1843_v42  ;;  %v3448_v40 = vshll.u32 %v4699_v33, %v3445_v63 }
 0x3cc   : >> { %v1782_v31 = vsel %vm1772_vm5, nan, %v1781_v5  ;;  %v3449_v24 = vshrl.u32 %v4700_v37, %v3446_v2  ;;  %v3452_v15 = vshrl.u32 %v4701_v39, %v3446_v2  ;;  %v3451_v7 = vshll.u32 %v4700_v37, %v3445_v63 }
 0x3cd   : >> { %3855 = vst [vmem:[%s5306_s28 + $0x58] sm:$0xff] %v1782_v31  ;;  %v3411_v27 = vmul.f32 %v3410_v20, %v3408_v25  ;;  %v7183_v47 = vshrl.u32 %v1844_v53, 30  ;;  %v3455_v38 = vshrl.u32 %v4702_v41, %v3446_v2  ;;  %v3444_v19 = vshrl.u32 %v3443_v52, 5 }
 0x3ce   : >> { %v3454_v32 = vshll.u32 %v4701_v39, %v3445_v63  ;;  %v3457_v0 = vshll.u32 %v4702_v41, %v3445_v63  ;;  %v3458_v4 = vshrl.u32 %v4703_v43, %v3446_v2  ;;  %v3450_v14 = vor.u32 %v3449_v24, %v3448_v40 }
 0x3cf   : >> { %v3412_v49 = vxor.u32 2147483648, %v3411_v27  ;;  %v1846_v29 = vshll.u32 %v7183_v47, 30  ;;  %v3453_v61 = vor.u32 %v3452_v15, %v3451_v7  ;;  %v3460_v45 = vshll.u32 %v4703_v43, %v3445_v63 }
 0x3d0   : >> { %v3456_v1 = vor.u32 %v3455_v38, %v3454_v32  ;;  %v3459_v23 = vor.u32 %v3458_v4, %v3457_v0  ;;  %v3461_v10 = vshrl.u32 %v4704_v51, %v3446_v2  ;;  %v7195_v34 = vand.u32 3, %v3417_v46 }
 0x3d1   : >> { %v3413_v26 = vsel %vm3330_vm1, %v3412_v49, %v3411_v27  ;;  %v7197_v12 = vsub.s32 %v1843_v42, %v1846_v29  ;;  %v3439_v60 = vor.u32 8388608, %v3438_v56  ;;  %v3447_v48 = vshrl.u32 %v4699_v33, %v3446_v2 }
 0x3d2   : >> { %v3416_v30 = vsel %vm7133_vm3, %v6872_v57, %v3413_v26  ;;  %v3462_v28 = vor.u32 %v3461_v10, %v3460_v45  ;;  %v1889_v9 = vand.u32 2139095040, %v7167_v11  ;;  %vm3463_vm11 = vcmp.lt.s32.totalorder %v3444_v19, 1 }
 0x3d3   : >> { %4513 = vcosq.f32 %v3416_v30  ;;  %v1849_v52 = vsub.s32 0, %v7197_v12  ;;  %vm3466_vm12 = vcmp.lt.s32.totalorder %v3444_v19, 4  ;;  %v3471_v8 = vsel %vm3463_vm11, %v3450_v14, %v3453_v61 }
 0x3d4   : >> { %4515 = vsinq.f32 %v3416_v30  ;;  %v3468_v44 = vsel %vm3466_vm12, %v3456_v1, 2102212464  ;;  %v3472_v63 = vsel %vm3466_vm12, %v3459_v23, 920167782  ;;  %vm3464_vm13 = vcmp.lt.s32.totalorder %v3444_v19, 2 }
 0x3d5   : >> { %v4047_v22 = vmin.u32 %v1849_v52, %v7197_v12  ;;  %vm3465_vm14 = vcmp.lt.s32.totalorder %v3444_v19, 3  ;;  %v3479_v13 = vshll.u32 %v3439_v60, 8  ;;  %v3467_v54 = vsel %vm3463_vm11, %v3447_v48, %v3450_v14 }
 0x3d6   : >> { %v3473_v42 = vsel %vm3465_vm14, %v3456_v1, %v3472_v63  ;;  %v3475_v58 = vsel %vm3463_vm11, %v3453_v61, %v3456_v1  ;;  %v3476_v46 = vsel %vm3466_vm12, %v3462_v28, 1326507024  ;;  %v3469_v2 = vsel %vm3465_vm14, %v3453_v61, %v3468_v44 }
 0x3d7   : >> { %v1851_v56 = vclz %v4047_v22  ;;  %v3474_v5 = vsel %vm3464_vm13, %v3471_v8, %v3473_v42  ;;  %v3477_v25 = vsel %vm3465_vm14, %v3459_v23, %v3476_v46  ;;  %v1869_v20 = vsub.s32 4, %v7183_v47 }
 0x3d8   : >> { %v3478_v53 = vsel %vm3464_vm13, %v3475_v58, %v3477_v25  ;;  %v7209_v31 = vmul.u32.u64.low %v3479_v13, %v3474_v5  ;;  %v7210_v40 = vmul.u32.u64.high %v3479_v13, %v3474_v5, %v7209_v31  ;;  %v1890_v7 = vshrl.u32 %v1889_v9, 23 }
 0x3d9   : >> { %v4048_v24 = vadd.s32 4294967294, %v1851_v56  ;;  %v7213_v15 = vmul.u32.u64.low %v3479_v13, %v3478_v53  ;;  %v7214_v27 = vmul.u32.u64.high %v3479_v13, %v3478_v53, %v7213_v15  ;;  %vm3420_vm15 = vweird.f32 %v6872_v57 }
 0x3da   : >> { %vm3422_vm0 = vcmp.lt.s32.totalorder %v7195_v34, 2  ;;  %vm1785_vm1 = vcmp.lt.s32.totalorder %v6909_v36, 0  ;;  %v3470_v38 = vsel %vm3464_vm13, %v3467_v54, %v3469_v2  ;;  %v7222_v32 = vadd.f32 %v7080_v6, %v6777_v35 }
 0x3db   : >> { %vm3423_vm2 = vcmp.eq.s32.totalorder %v7195_v34, 0  ;;  %vm3426_vm3 = vcmp.eq.s32.totalorder %v7195_v34, 2  ;;  %vm4049_vm4 = vcmp.lt.s32.totalorder %v4048_v24, 0  ;;  %v4050_v0 = vadd.s32 4294967169, %v1890_v7 }
 0x3dc   : >> { %v1839_v4 = vadd.s32 %v7143_v50, %v7140_v21  ;;  %v1854_v49 = vsel %vm4049_vm4, 0, %v4048_v24  ;;  %v3489_v29 = vadd.s32 1, %v7210_v40  ;;  %v1886_v14 = vand.u32 2147483647, %v7167_v11 }
 0x3dd   : >> { %v4514_v19 = vpop.eup %4513  ;;  %v1855_v61 = vsub.s32 32, %v1854_v49  ;;  %v1859_v1 = vsub.s32 4294967266, %v1854_v49  ;;  %v1870_v35 = vsel %vm1785_vm1, %v1869_v20, %v7183_v47  ;;  %v3486_v23 = vmul.u32 %v3479_v13, %v3470_v38 }
 0x3de   : >> { %v4516_v45 = vpop.eup %4515  ;;  %v3427_v10 = vxor.u32 2147483648, %v4514_v19  ;;  %v1856_v26 = vshll.u32 %v7197_v12, %v1854_v49  ;;  %vm3488_vm5 = vc.u32 %v7214_v27, %v7209_v31  ;;  %v1896_v21 = vadd.s32 1, %v4050_v0 }
 0x3df   : >> { %v3424_v50 = vxor.u32 2147483648, %v4516_v45  ;;  %v1857_v60 = vshrl.u32 %v1839_v4, %v1855_v61  ;;  %v1860_v30 = vadd.s32 127, %v1859_v1  ;;  %v3490_v48 = vsel %vm3488_vm5, %v3489_v29, %v7210_v40 }
 0x3e0   : >> { %v3428_v28 = vsel %vm3426_vm3, %v3427_v10, %v4516_v45  ;;  %v3491_v9 = vadd.s32 %v3490_v48, %v3486_v23  ;;  %v1893_v47 = vand.u32 8388607, %v1886_v14  ;;  %vm1897_vm6 = vcmp.gt.s32.totalorder %v1896_v21, 0 }
 0x3e1   : >> { %v3425_v12 = vsel %vm3423_vm2, %v4514_v19, %v3424_v50  ;;  %v1858_v52 = vor.u32 %v1857_v60, %v1856_v26  ;;  %v1861_v44 = vshll.u32 %v1860_v30, 23  ;;  %v1898_v8 = vsel %vm1897_vm6, %v1896_v21, 0 }
 0x3e2   : >> { %v3429_v63 = vsel %vm3422_vm0, %v3425_v12, %v3428_v28  ;;  %v3492_v22 = vadd.s32 536870912, %v3491_v9  ;;  %v1900_v13 = vand.u32 31, %v1898_v8  ;;  %v3537_v54 = vand.u32 2139095040, %v7222_v32 }
 0x3e3   : >> { %v3430_v42 = vsel %vm3420_vm15, nan, %v3429_v63  ;;  %v1862_v58 = vor.u32 4788187, %v1861_v44  ;;  %vm7251_vm7 = vcmp.le.f32.partialorder %v1783_v18, 0.7853982  ;;  %v7259_v34 = vadd.f32 %v7080_v6, %v6864_v55 }
 0x3e4   : >> { %3871 = vst [vmem:[%s5306_s28 + $0xd8] sm:$0xff] %v3430_v42  ;;  %v7255_v56 = vshrl.u32 %v3492_v22, 30  ;;  %v1901_v2 = vsub.s32 32, %v1900_v13  ;;  %v1865_v25 = vcvt.s32.f32 %v1858_v52  ;;  %v1872_v57 = vsel %vm7251_vm7, 0, %v1870_v35 }
 0x3e5   : >> { %v1863_v5 = vand.u32 2147483647, %v1862_v58  ;;  %v1894_v20 = vor.u32 8388608, %v1893_v47  ;;  %v1903_v18 = vshll.u32 %v4699_v33, %v1900_v13  ;;  %v3538_v24 = vshrl.u32 %v3537_v54, 23 }
 0x3e6   : >> { %v3494_v53 = vshll.u32 %v7255_v56, 30  ;;  %v1904_v40 = vshrl.u32 %v4700_v37, %v1901_v2  ;;  %v1907_v7 = vshrl.u32 %v4701_v39, %v1901_v2  ;;  %v1910_v38 = vshrl.u32 %v4702_v41, %v1901_v2 }
 0x3e7   : >> { %v1866_v15 = vmul.f32 %v1865_v25, %v1863_v5  ;;  %v1913_v55 = vshrl.u32 %v4703_v43, %v1901_v2  ;;  %v1906_v4 = vshll.u32 %v4700_v37, %v1900_v13  ;;  %v1909_v49 = vshll.u32 %v4701_v39, %v1900_v13 }
 0x3e8   : >> { %v7269_v0 = vsub.s32 %v3491_v9, %v3494_v53  ;;  %v1916_v29 = vshrl.u32 %v4704_v51, %v1901_v2  ;;  %v1899_v61 = vshrl.u32 %v1898_v8, 5  ;;  %v1912_v1 = vshll.u32 %v4702_v41, %v1900_v13 }
 0x3e9   : >> { %v1867_v19 = vxor.u32 2147483648, %v1866_v15  ;;  %v1915_v35 = vshll.u32 %v4703_v43, %v1900_v13  ;;  %v1905_v45 = vor.u32 %v1904_v40, %v1903_v18  ;;  %v1908_v10 = vor.u32 %v1907_v7, %v1906_v4 }
 0x3ea   : >> { %v3497_v23 = vsub.s32 0, %v7269_v0  ;;  %v1911_v26 = vor.u32 %v1910_v38, %v1909_v49  ;;  %v7279_v50 = vand.u32 3, %v1872_v57  ;;  %v1914_v60 = vor.u32 %v1913_v55, %v1912_v1 }
 0x3eb   : >> { %v1868_v21 = vsel %vm1785_vm1, %v1867_v19, %v1866_v15  ;;  %v1917_v30 = vor.u32 %v1916_v29, %v1915_v35  ;;  %v1934_v9 = vshll.u32 %v1894_v20, 8  ;;  %v4114_v47 = vadd.s32 4294967169, %v3538_v24 }
 0x3ec   : >> { %v1871_v48 = vsel %vm7251_vm7, %v6909_v36, %v1868_v21  ;;  %v4111_v28 = vmin.u32 %v3497_v23, %v7269_v0  ;;  %v1902_v12 = vshrl.u32 %v4699_v33, %v1901_v2  ;;  %vm1918_vm8 = vcmp.lt.s32.totalorder %v1899_v61, 1 }
 0x3ed   : >> { %4517 = vcosq.f32 %v1871_v48  ;;  %vm1921_vm9 = vcmp.lt.s32.totalorder %v1899_v61, 4  ;;  %v1926_v8 = vsel %vm1918_vm8, %v1905_v45, %v1908_v10  ;;  %vm1920_vm10 = vcmp.lt.s32.totalorder %v1899_v61, 3 }
 0x3ee   : >> { %4519 = vsinq.f32 %v1871_v48  ;;  %v3499_v52 = vclz %v4111_v28  ;;  %v1923_v44 = vsel %vm1921_vm9, %v1911_v26, 2102212464  ;;  %v1927_v63 = vsel %vm1921_vm9, %v1914_v60, 920167782 }
 0x3ef   : >> { %v1930_v22 = vsel %vm1918_vm8, %v1908_v10, %v1911_v26  ;;  %v1931_v13 = vsel %vm1921_vm9, %v1917_v30, 1326507024  ;;  %vm1919_vm11 = vcmp.lt.s32.totalorder %v1899_v61, 2  ;;  %v1928_v42 = vsel %vm1920_vm10, %v1911_v26, %v1927_v63 }
 0x3f0   : >> { %v4112_v54 = vadd.s32 4294967294, %v3499_v52  ;;  %v1932_v58 = vsel %vm1920_vm10, %v1914_v60, %v1931_v13  ;;  %v1922_v46 = vsel %vm1918_vm8, %v1902_v12, %v1905_v45  ;;  %v1924_v5 = vsel %vm1920_vm10, %v1908_v10, %v1923_v44 }
 0x3f1   : >> { %v1929_v25 = vsel %vm1919_vm11, %v1926_v8, %v1928_v42  ;;  %v1933_v2 = vsel %vm1919_vm11, %v1930_v22, %v1932_v58  ;;  %vm7290_vm12 = vcmp.le.f32.partialorder %v3431_v59, 0.7853982  ;;  %v3544_v18 = vadd.s32 1, %v4114_v47 }
 0x3f2   : >> { %vm4113_vm13 = vcmp.lt.s32.totalorder %v4112_v54, 0  ;;  %v7294_v20 = vmul.u32.u64.low %v1934_v9, %v1933_v2  ;;  %v7295_v53 = vmul.u32.u64.high %v1934_v9, %v1933_v2, %v7294_v20  ;;  %v3517_v24 = vsub.s32 4, %v7255_v56 }
 0x3f3   : >> { %v3502_v40 = vsel %vm4113_vm13, 0, %v4112_v54  ;;  %v7298_v15 = vmul.u32.u64.low %v1934_v9, %v1929_v25  ;;  %v7299_v7 = vmul.u32.u64.high %v1934_v9, %v1929_v25, %v7298_v15  ;;  %vm1875_vm14 = vweird.f32 %v6909_v36 }
 0x3f4   : >> { %v3487_v59 = vadd.s32 %v7209_v31, %v7214_v27  ;;  %v3503_v38 = vsub.s32 32, %v3502_v40  ;;  %v3507_v55 = vsub.s32 4294967266, %v3502_v40  ;;  %vm3545_vm15 = vcmp.gt.s32.totalorder %v3544_v18, 0 }
 0x3f5   : >> { %vm1877_vm0 = vcmp.lt.s32.totalorder %v7279_v50, 2  ;;  %vm3433_vm1 = vcmp.lt.s32.totalorder %v7084_v3, 0  ;;  %v1925_v4 = vsel %vm1919_vm11, %v1922_v46, %v1924_v5  ;;  %v3546_v49 = vsel %vm3545_vm15, %v3544_v18, 0 }
 0x3f6   : >> { %v3504_v29 = vshll.u32 %v7269_v0, %v3502_v40  ;;  %v3505_v19 = vshrl.u32 %v3487_v59, %v3503_v38  ;;  %v3508_v1 = vadd.s32 127, %v3507_v55  ;;  %vm1943_vm2 = vc.u32 %v7295_v53, %v7298_v15 }
 0x3f7   : >> { %v4518_v35 = vpop.eup %4517  ;;  %v3518_v31 = vsel %vm3433_vm1, %v3517_v24, %v7255_v56  ;;  %v1944_v27 = vadd.s32 1, %v7299_v7  ;;  %v3534_v23 = vand.u32 2147483647, %v7222_v32  ;;  %v3548_v45 = vand.u32 31, %v3546_v49 }
 0x3f8   : >> { %v4520_v61 = vpop.eup %4519  ;;  %v1882_v10 = vxor.u32 2147483648, %v4518_v35  ;;  %v3506_v26 = vor.u32 %v3505_v19, %v3504_v29  ;;  %v3509_v21 = vshll.u32 %v3508_v1, 23  ;;  %v1941_v0 = vmul.u32 %v1934_v9, %v1925_v4 }
 0x3f9   : >> { %v1879_v60 = vxor.u32 2147483648, %v4520_v61  ;;  %vm1881_vm3 = vcmp.eq.s32.totalorder %v7279_v50, 2  ;;  %v1945_v30 = vsel %vm1943_vm2, %v1944_v27, %v7299_v7  ;;  %v3549_v48 = vsub.s32 32, %v3548_v45 }
 0x3fa   : >> { %vm1878_vm4 = vcmp.eq.s32.totalorder %v7279_v50, 0  ;;  %v1883_v56 = vsel %vm1881_vm3, %v1882_v10, %v4520_v61  ;;  %v3510_v28 = vor.u32 4788187, %v3509_v21  ;;  %v1946_v47 = vadd.s32 %v1945_v30, %v1941_v0 }
 0x3fb   : >> { %v1880_v12 = vsel %vm1878_vm4, %v4518_v35, %v1879_v60  ;;  %v3520_v52 = vsel %vm7290_vm12, 0, %v3518_v31  ;;  %v3541_v44 = vand.u32 8388607, %v3534_v23  ;;  %v7323_v9 = vshrl.u32 %v3546_v49, 5 }
 0x3fc   : >> { %v1884_v8 = vsel %vm1877_vm0, %v1880_v12, %v1883_v56  ;;  %v3511_v63 = vand.u32 2147483647, %v3510_v28  ;;  %v3513_v22 = vcvt.s32.f32 %v3506_v26  ;;  %v1947_v13 = vadd.s32 536870912, %v1946_v47 }
 0x3fd   : >> { %v1885_v54 = vsel %vm1875_vm14, nan, %v1884_v8  ;;  %v3552_v42 = vshrl.u32 %v4700_v37, %v3549_v48  ;;  %v3555_v58 = vshrl.u32 %v4701_v39, %v3549_v48  ;;  %v3558_v46 = vshrl.u32 %v4702_v41, %v3549_v48 }
 0x3fe   : >> { %3856 = vst [vmem:[%s5306_s28 + $0x60] sm:$0xff] %v1885_v54  ;;  %v3514_v5 = vmul.f32 %v3513_v22, %v3511_v63  ;;  %v7333_v25 = vshrl.u32 %v1947_v13, 30  ;;  %v3551_v2 = vshll.u32 %v4699_v33, %v3548_v45  ;;  %v3557_v50 = vshll.u32 %v4701_v39, %v3548_v45 }
 0x3ff   : >> { %v3554_v20 = vshll.u32 %v4700_v37, %v3548_v45  ;;  %v3560_v18 = vshll.u32 %v4702_v41, %v3548_v45  ;;  %v3561_v36 = vshrl.u32 %v4703_v43, %v3549_v48  ;;  %v3564_v40 = vshrl.u32 %v4704_v51, %v3549_v48 }
 0x400   : >> { %v3515_v24 = vxor.u32 2147483648, %v3514_v5  ;;  %v1949_v7 = vshll.u32 %v7333_v25, 30  ;;  %v3542_v59 = vor.u32 8388608, %v3541_v44  ;;  %v3559_v38 = vor.u32 %v3558_v46, %v3557_v50 }
 0x401   : >> { %v3553_v55 = vor.u32 %v3552_v42, %v3551_v2  ;;  %v3556_v4 = vor.u32 %v3555_v58, %v3554_v20  ;;  %v3562_v49 = vor.u32 %v3561_v36, %v3560_v18  ;;  %v3563_v29 = vshll.u32 %v4703_v43, %v3548_v45 }
 0x402   : >> { %v3516_v19 = vsel %vm3433_vm1, %v3515_v24, %v3514_v5  ;;  %v7345_v1 = vand.u32 3, %v3520_v52  ;;  %v7347_v35 = vsub.s32 %v1946_v47, %v1949_v7  ;;  %v1992_v31 = vand.u32 2139095040, %v7259_v34 }
 0x403   : >> { %v3519_v27 = vsel %vm7290_vm12, %v7084_v3, %v3516_v19  ;;  %v3550_v61 = vshrl.u32 %v4699_v33, %v3549_v48  ;;  %v3565_v10 = vor.u32 %v3564_v40, %v3563_v29  ;;  %vm3569_vm5 = vcmp.lt.s32.totalorder %v7323_v9, 4 }
 0x404   : >> { %4521 = vcosq.f32 %v3519_v27  ;;  %v1952_v45 = vsub.s32 0, %v7347_v35  ;;  %vm3566_vm6 = vcmp.lt.s32.totalorder %v7323_v9, 1  ;;  %v3571_v26 = vsel %vm3569_vm5, %v3559_v38, 2102212464 }
 0x405   : >> { %4523 = vsinq.f32 %v3519_v27  ;;  %v3574_v21 = vsel %vm3566_vm6, %v3553_v55, %v3556_v4  ;;  %v3575_v0 = vsel %vm3569_vm5, %v3562_v49, 920167782  ;;  %v3582_v57 = vshll.u32 %v3542_v59, 8 }
 0x406   : >> { %v4051_v60 = vmin.u32 %v1952_v45, %v7347_v35  ;;  %vm3567_vm7 = vcmp.lt.s32.totalorder %v7323_v9, 2  ;;  %vm3568_vm8 = vcmp.lt.s32.totalorder %v7323_v9, 3  ;;  %v3570_v30 = vsel %vm3566_vm6, %v3550_v61, %v3553_v55 }
 0x407   : >> { %v3572_v48 = vsel %vm3568_vm8, %v3556_v4, %v3571_v26  ;;  %v3576_v56 = vsel %vm3568_vm8, %v3559_v38, %v3575_v0  ;;  %v3578_v28 = vsel %vm3566_vm6, %v3556_v4, %v3559_v38  ;;  %v3579_v47 = vsel %vm3569_vm5, %v3565_v10, 1326507024 }
 0x408   : >> { %v1954_v12 = vclz %v4051_v60  ;;  %v3577_v52 = vsel %vm3567_vm7, %v3574_v21, %v3576_v56  ;;  %v3580_v44 = vsel %vm3568_vm8, %v3562_v49, %v3579_v47  ;;  %v1993_v8 = vshrl.u32 %v1992_v31, 23 }
 0x409   : >> { %v3581_v63 = vsel %vm3567_vm7, %v3578_v28, %v3580_v44  ;;  %v7370_v22 = vmul.u32.u64.low %v3582_v57, %v3577_v52  ;;  %v7371_v13 = vmul.u32.u64.high %v3582_v57, %v3577_v52, %v7370_v22  ;;  %vm3525_vm9 = vcmp.lt.s32.totalorder %v7345_v1, 2 }
 0x40a   : >> { %v4052_v54 = vadd.s32 4294967294, %v1954_v12  ;;  %v7374_v42 = vmul.u32.u64.low %v3582_v57, %v3581_v63  ;;  %v7375_v58 = vmul.u32.u64.high %v3582_v57, %v3581_v63, %v7374_v42  ;;  %v4054_v46 = vadd.s32 4294967169, %v1993_v8 }
 0x40b   : >> { %vm1888_vm10 = vcmp.lt.s32.totalorder %v7167_v11, 0  ;;  %v3573_v5 = vsel %vm3567_vm7, %v3570_v30, %v3572_v48  ;;  %vm3526_vm11 = vcmp.eq.s32.totalorder %v7345_v1, 0  ;;  %vm3529_vm12 = vcmp.eq.s32.totalorder %v7345_v1, 2 }
 0x40c   : >> { %vm4053_vm13 = vcmp.lt.s32.totalorder %v4052_v54, 0  ;;  %v1999_v2 = vadd.s32 1, %v4054_v46  ;;  %v1972_v20 = vsub.s32 4, %v7333_v25  ;;  %v3592_v18 = vadd.s32 1, %v7371_v13 }
 0x40d   : >> { %v1957_v50 = vsel %vm4053_vm13, 0, %v4052_v54  ;;  %v1989_v36 = vand.u32 2147483647, %v7259_v34  ;;  %v1942_v24 = vadd.s32 %v7298_v15, %v7295_v53  ;;  %v3589_v59 = vmul.u32 %v3582_v57, %v3573_v5 }
 0x40e   : >> { %v4522_v40 = vpop.eup %4521  ;;  %v1958_v7 = vsub.s32 32, %v1957_v50  ;;  %v1962_v9 = vsub.s32 4294967266, %v1957_v50  ;;  %v1959_v4 = vshll.u32 %v7347_v35, %v1957_v50  ;;  %vm3591_vm14 = vc.u32 %v7375_v58, %v7370_v22 }
 0x40f   : >> { %v4524_v38 = vpop.eup %4523  ;;  %v3530_v55 = vxor.u32 2147483648, %v4522_v40  ;;  %vm2000_vm15 = vcmp.gt.s32.totalorder %v1999_v2, 0  ;;  %v3593_v31 = vsel %vm3591_vm14, %v3592_v18, %v7371_v13  ;;  %v1973_v15 = vsel %vm1888_vm10, %v1972_v20, %v7333_v25 }
 0x410   : >> { %v3527_v49 = vxor.u32 2147483648, %v4524_v38  ;;  %v1960_v29 = vshrl.u32 %v1942_v24, %v1958_v7  ;;  %v1963_v19 = vadd.s32 127, %v1962_v9  ;;  %v3594_v27 = vadd.s32 %v3593_v31, %v3589_v59 }
 0x411   : >> { %v3531_v53 = vsel %vm3529_vm12, %v3530_v55, %v4524_v38  ;;  %v2001_v61 = vsel %vm2000_vm15, %v1999_v2, 0  ;;  %v1996_v26 = vand.u32 8388607, %v1989_v36  ;;  %vm3523_vm0 = vweird.f32 %v7084_v3 }
 0x412   : >> { %v3528_v35 = vsel %vm3526_vm11, %v4522_v40, %v3527_v49  ;;  %v1961_v10 = vor.u32 %v1960_v29, %v1959_v4  ;;  %v1964_v45 = vshll.u32 %v1963_v19, 23  ;;  %v3595_v0 = vadd.s32 536870912, %v3594_v27 }
 0x413   : >> { %v3532_v21 = vsel %vm3525_vm9, %v3528_v35, %v3531_v53  ;;  %v2003_v57 = vand.u32 31, %v2001_v61  ;;  %vm7406_vm1 = vcmp.le.f32.partialorder %v1886_v14, 0.7853982  ;;  %v1997_v47 = vor.u32 8388608, %v1996_v26 }
 0x414   : >> { %v3533_v60 = vsel %vm3523_vm0, nan, %v3532_v21  ;;  %v1965_v30 = vor.u32 4788187, %v1964_v45  ;;  %v1975_v48 = vsel %vm7406_vm1, 0, %v1973_v15  ;;  %v7413_v56 = vshrl.u32 %v3595_v0, 30 }
 0x415   : >> { %3872 = vst [vmem:[%s5306_s28 + $0xe0] sm:$0xff] %v3533_v60  ;;  %v2004_v3 = vsub.s32 32, %v2003_v57  ;;  %v1968_v1 = vcvt.s32.f32 %v1961_v10  ;;  %v7417_v12 = vadd.f32 %v7080_v6, %v6940_v17  ;;  %v2002_v52 = vshrl.u32 %v2001_v61, 5 }
 0x416   : >> { %v1966_v28 = vand.u32 2147483647, %v1965_v30  ;;  %v3597_v14 = vshll.u32 %v7413_v56, 30  ;;  %v2006_v44 = vshll.u32 %v4699_v33, %v2003_v57  ;;  %v2009_v5 = vshll.u32 %v4700_v37, %v2003_v57 }
 0x417   : >> { %v2007_v8 = vshrl.u32 %v4700_v37, %v2004_v3  ;;  %v2010_v13 = vshrl.u32 %v4701_v39, %v2004_v3  ;;  %v2013_v54 = vshrl.u32 %v4702_v41, %v2004_v3  ;;  %v2016_v42 = vshrl.u32 %v4703_v43, %v2004_v3 }
 0x418   : >> { %v1969_v63 = vmul.f32 %v1968_v1, %v1966_v28  ;;  %v7425_v46 = vsub.s32 %v3594_v27, %v3597_v14  ;;  %v2012_v17 = vshll.u32 %v4701_v39, %v2003_v57  ;;  %v2019_v2 = vshrl.u32 %v4704_v51, %v2004_v3 }
 0x419   : >> { %v7430_v20 = vand.u32 3, %v1975_v48  ;;  %v2015_v18 = vshll.u32 %v4702_v41, %v2003_v57  ;;  %v2018_v40 = vshll.u32 %v4703_v43, %v2003_v57  ;;  %v2008_v7 = vor.u32 %v2007_v8, %v2006_v44 }
 0x41a   : >> { %v1970_v50 = vxor.u32 2147483648, %v1969_v63  ;;  %v3600_v24 = vsub.s32 0, %v7425_v46  ;;  %v2011_v9 = vor.u32 %v2010_v13, %v2009_v5  ;;  %v2014_v59 = vor.u32 %v2013_v54, %v2012_v17 }
 0x41b   : >> { %v2017_v55 = vor.u32 %v2016_v42, %v2015_v18  ;;  %v2020_v4 = vor.u32 %v2019_v2, %v2018_v40  ;;  %v7437_v49 = vshll.u32 %v1997_v47, 8  ;;  %vm2021_vm2 = vcmp.lt.s32.totalorder %v2002_v52, 1 }
 0x41c   : >> { %v1971_v38 = vsel %vm1888_vm10, %v1970_v50, %v1969_v63  ;;  %v4115_v19 = vmin.u32 %v3600_v24, %v7425_v46  ;;  %v3640_v31 = vand.u32 2139095040, %v7417_v12  ;;  %v2005_v53 = vshrl.u32 %v4699_v33, %v2004_v3 }
 0x41d   : >> { %v1974_v29 = vsel %vm7406_vm1, %v7167_v11, %v1971_v38  ;;  %vm2022_vm3 = vcmp.lt.s32.totalorder %v2002_v52, 2  ;;  %vm2024_vm4 = vcmp.lt.s32.totalorder %v2002_v52, 4  ;;  %vm3536_vm5 = vcmp.lt.s32.totalorder %v7222_v32, 0 }
 0x41e   : >> { %4525 = vcosq.f32 %v1974_v29  ;;  %v3602_v15 = vclz %v4115_v19  ;;  %v2026_v27 = vsel %vm2024_vm4, %v2014_v59, 2102212464  ;;  %v2029_v61 = vsel %vm2021_vm2, %v2008_v7, %v2011_v9 }
 0x41f   : >> { %4527 = vsinq.f32 %v1974_v29  ;;  %vm2023_vm6 = vcmp.lt.s32.totalorder %v2002_v52, 3  ;;  %v2030_v35 = vsel %vm2024_vm4, %v2017_v55, 920167782  ;;  %v2033_v10 = vsel %vm2021_vm2, %v2011_v9, %v2014_v59 }
 0x420   : >> { %v2034_v45 = vsel %vm2024_vm4, %v2020_v4, 1326507024  ;;  %v4116_v26 = vadd.s32 4294967294, %v3602_v15  ;;  %v2025_v21 = vsel %vm2021_vm2, %v2005_v53, %v2008_v7  ;;  %v2031_v0 = vsel %vm2023_vm6, %v2014_v59, %v2030_v35 }
 0x421   : >> { %v2035_v57 = vsel %vm2023_vm6, %v2017_v55, %v2034_v45  ;;  %v2027_v60 = vsel %vm2023_vm6, %v2011_v9, %v2026_v27  ;;  %v2032_v25 = vsel %vm2022_vm3, %v2029_v61, %v2031_v0  ;;  %v3641_v48 = vshrl.u32 %v3640_v31, 23 }
 0x422   : >> { %v2036_v30 = vsel %vm2022_vm3, %v2033_v10, %v2035_v57  ;;  %vm7453_vm7 = vcmp.le.f32.partialorder %v3534_v23, 0.7853982  ;;  %vm4117_vm8 = vcmp.lt.s32.totalorder %v4116_v26, 0  ;;  %v3620_v28 = vsub.s32 4, %v7413_v56 }
 0x423   : >> { %v7459_v1 = vmul.u32.u64.low %v7437_v49, %v2036_v30  ;;  %v7460_v47 = vmul.u32.u64.high %v7437_v49, %v2036_v30, %v7459_v1  ;;  %v3605_v14 = vsel %vm4117_vm8, 0, %v4116_v26  ;;  %v4118_v63 = vadd.s32 4294967169, %v3641_v48 }
 0x424   : >> { %v7463_v44 = vmul.u32.u64.low %v7437_v49, %v2032_v25  ;;  %v7464_v8 = vmul.u32.u64.high %v7437_v49, %v2032_v25, %v7463_v44  ;;  %vm1978_vm9 = vweird.f32 %v7167_v11  ;;  %v3590_v23 = vadd.s32 %v7370_v22, %v7375_v58 }
 0x425   : >> { %v3606_v13 = vsub.s32 32, %v3605_v14  ;;  %v3610_v54 = vsub.s32 4294967266, %v3605_v14  ;;  %v2028_v42 = vsel %vm2022_vm3, %v2025_v21, %v2027_v60  ;;  %vm1980_vm10 = vcmp.lt.s32.totalorder %v7430_v20, 2 }
 0x426   : >> { %vm1981_vm11 = vcmp.eq.s32.totalorder %v7430_v20, 0  ;;  %v3637_v5 = vand.u32 2147483647, %v7417_v12  ;;  %v3647_v17 = vadd.s32 1, %v4118_v63  ;;  %v3607_v2 = vshll.u32 %v7425_v46, %v3605_v14 }
 0x427   : >> { %v3608_v50 = vshrl.u32 %v3590_v23, %v3606_v13  ;;  %v3611_v18 = vadd.s32 127, %v3610_v54  ;;  %vm2046_vm12 = vc.u32 %v7460_v47, %v7463_v44  ;;  %v3621_v22 = vsel %vm3536_vm5, %v3620_v28, %v7413_v56 }
 0x428   : >> { %v4526_v40 = vpop.eup %4525  ;;  %v2044_v58 = vmul.u32 %v7437_v49, %v2028_v42  ;;  %v2047_v52 = vadd.s32 1, %v7464_v8  ;;  %vm3648_vm13 = vcmp.gt.s32.totalorder %v3647_v17, 0  ;;  %vm1984_vm14 = vcmp.eq.s32.totalorder %v7430_v20, 2 }
 0x429   : >> { %v4528_v24 = vpop.eup %4527  ;;  %v1985_v7 = vxor.u32 2147483648, %v4526_v40  ;;  %v3609_v9 = vor.u32 %v3608_v50, %v3607_v2  ;;  %v3612_v59 = vshll.u32 %v3611_v18, 23  ;;  %v3649_v46 = vsel %vm3648_vm13, %v3647_v17, 0 }
 0x42a   : >> { %v1982_v38 = vxor.u32 2147483648, %v4528_v24  ;;  %v2048_v55 = vsel %vm2046_vm12, %v2047_v52, %v7464_v8  ;;  %v3651_v4 = vand.u32 31, %v3649_v46  ;;  %v7486_v49 = vadd.f32 %v7080_v6, %v7041_v62 }
 0x42b   : >> { %v1986_v29 = vsel %vm1984_vm14, %v1985_v7, %v4528_v24  ;;  %v3613_v19 = vor.u32 4788187, %v3612_v59  ;;  %v2049_v56 = vadd.s32 %v2048_v55, %v2044_v58  ;;  %v3623_v53 = vsel %vm7453_vm7, 0, %v3621_v22 }
 0x42c   : >> { %v1983_v31 = vsel %vm1981_vm11, %v4526_v40, %v1982_v38  ;;  %v3644_v15 = vand.u32 8388607, %v3637_v5  ;;  %v3652_v27 = vsub.s32 32, %v3651_v4  ;;  %v3616_v10 = vcvt.s32.f32 %v3609_v9 }
 0x42d   : >> { %v1987_v61 = vsel %vm1980_vm10, %v1983_v31, %v1986_v29  ;;  %v3614_v35 = vand.u32 2147483647, %v3613_v19  ;;  %v2050_v45 = vadd.s32 536870912, %v2049_v56  ;;  %v3654_v6 = vshll.u32 %v4699_v33, %v3651_v4 }
 0x42e   : >> { %v1988_v62 = vsel %vm1978_vm9, nan, %v1987_v61  ;;  %v3655_v26 = vshrl.u32 %v4700_v37, %v3652_v27  ;;  %v3658_v21 = vshrl.u32 %v4701_v39, %v3652_v27  ;;  %v3657_v60 = vshll.u32 %v4700_v37, %v3651_v4 }
 0x42f   : >> { %3857 = vst [vmem:[%s5306_s28 + $0x68] sm:$0xff] %v1988_v62  ;;  %v3617_v0 = vmul.f32 %v3616_v10, %v3614_v35  ;;  %v7502_v57 = vshrl.u32 %v2050_v45, 30  ;;  %v3661_v20 = vshrl.u32 %v4702_v41, %v3652_v27  ;;  %v3650_v25 = vshrl.u32 %v3649_v46, 5 }
 0x430   : >> { %v3660_v30 = vshll.u32 %v4701_v39, %v3651_v4  ;;  %v3663_v11 = vshll.u32 %v4702_v41, %v3651_v4  ;;  %v3664_v48 = vshrl.u32 %v4703_v43, %v3652_v27  ;;  %v3656_v14 = vor.u32 %v3655_v26, %v3654_v6  ;;  %v4553_v6 = vld [vmem:[%s7750_s2] ss:$0 sm:$0xff] }
 0x431   : >> { %v3618_v28 = vxor.u32 2147483648, %v3617_v0  ;;  %v2052_v1 = vshll.u32 %v7502_v57, 30  ;;  %v3659_v8 = vor.u32 %v3658_v21, %v3657_v60  ;;  %v3666_v13 = vshll.u32 %v4703_v43, %v3651_v4 }
 0x432   : >> { %v3662_v63 = vor.u32 %v3661_v20, %v3660_v30  ;;  %v3665_v23 = vor.u32 %v3664_v48, %v3663_v11  ;;  %v3667_v54 = vshrl.u32 %v4704_v51, %v3652_v27  ;;  %v7514_v17 = vand.u32 3, %v3623_v53 }
 0x433   : >> { %v3619_v42 = vsel %vm3536_vm5, %v3618_v28, %v3617_v0  ;;  %v7516_v2 = vsub.s32 %v2049_v56, %v2052_v1  ;;  %v3645_v50 = vor.u32 8388608, %v3644_v15  ;;  %v3653_v40 = vshrl.u32 %v4699_v33, %v3652_v27 }
 0x434   : >> { %v3622_v18 = vsel %vm7453_vm7, %v7222_v32, %v3619_v42  ;;  %v3668_v22 = vor.u32 %v3667_v54, %v3666_v13  ;;  %v2095_v58 = vand.u32 2139095040, %v7486_v49  ;;  %vm3669_vm15 = vcmp.lt.s32.totalorder %v3650_v25, 1 }
 0x435   : >> { %4529 = vcosq.f32 %v3622_v18  ;;  %v2055_v52 = vsub.s32 0, %v7516_v2  ;;  %vm3672_vm0 = vcmp.lt.s32.totalorder %v3650_v25, 4  ;;  %v3677_v7 = vsel %vm3669_vm15, %v3656_v14, %v3659_v8 }
 0x436   : >> { %4531 = vsinq.f32 %v3622_v18  ;;  %v3674_v24 = vsel %vm3672_vm0, %v3662_v63, 2102212464  ;;  %v3678_v9 = vsel %vm3672_vm0, %v3665_v23, 920167782  ;;  %vm3670_vm1 = vcmp.lt.s32.totalorder %v3650_v25, 2 }
 0x437   : >> { %v4055_v59 = vmin.u32 %v2055_v52, %v7516_v2  ;;  %vm3671_vm2 = vcmp.lt.s32.totalorder %v3650_v25, 3  ;;  %v3685_v3 = vshll.u32 %v3645_v50, 8  ;;  %v3673_v46 = vsel %vm3669_vm15, %v3653_v40, %v3656_v14 }
 0x438   : >> { %v3679_v38 = vsel %vm3671_vm2, %v3662_v63, %v3678_v9  ;;  %v3681_v55 = vsel %vm3669_vm15, %v3659_v8, %v3662_v63  ;;  %v3682_v4 = vsel %vm3672_vm0, %v3668_v22, 1326507024  ;;  %v3675_v19 = vsel %vm3671_vm2, %v3659_v8, %v3674_v24 }
 0x439   : >> { %v2057_v29 = vclz %v4055_v59  ;;  %v3680_v56 = vsel %vm3670_vm1, %v3677_v7, %v3679_v38  ;;  %v3683_v31 = vsel %vm3671_vm2, %v3665_v23, %v3682_v4  ;;  %v2096_v45 = vshrl.u32 %v2095_v58, 23 }
 0x43a   : >> { %v3684_v53 = vsel %vm3670_vm1, %v3681_v55, %v3683_v31  ;;  %v7527_v15 = vmul.u32.u64.low %v3685_v3, %v3680_v56  ;;  %v7528_v27 = vmul.u32.u64.high %v3685_v3, %v3680_v56, %v7527_v15  ;;  %vm3626_vm3 = vweird.f32 %v7222_v32 }
 0x43b   : >> { %v4056_v61 = vadd.s32 4294967294, %v2057_v29  ;;  %v7531_v35 = vmul.u32.u64.low %v3685_v3, %v3684_v53  ;;  %v7532_v10 = vmul.u32.u64.high %v3685_v3, %v3684_v53, %v7531_v35  ;;  %vm3628_vm4 = vcmp.lt.s32.totalorder %v7514_v17, 2 }
 0x43c   : >> { %v3676_v62 = vsel %vm3670_vm1, %v3673_v46, %v3675_v19  ;;  %v7541_v26 = vadd.f32 %v4553_v6, %v7129_v16  ;;  %vm3629_vm5 = vcmp.eq.s32.totalorder %v7514_v17, 0  ;;  %vm3632_vm6 = vcmp.eq.s32.totalorder %v7514_v17, 2 }
 0x43d   : >> { %vm4057_vm7 = vcmp.lt.s32.totalorder %v4056_v61, 0  ;;  %v4058_v21 = vadd.s32 4294967169, %v2096_v45  ;;  %v2045_v0 = vadd.s32 %v7463_v44, %v7460_v47  ;;  %v3695_v20 = vadd.s32 1, %v7528_v27 }
 0x43e   : >> { %v2060_v60 = vsel %vm4057_vm7, 0, %v4056_v61  ;;  %v2092_v25 = vand.u32 2147483647, %v7486_v49  ;;  %v2075_v16 = vsub.s32 4, %v7502_v57  ;;  %v3692_v28 = vmul.u32 %v3685_v3, %v3676_v62 }
 0x43f   : >> { %v4530_v30 = vpop.eup %4529  ;;  %v2061_v11 = vsub.s32 32, %v2060_v60  ;;  %v2065_v48 = vsub.s32 4294967266, %v2060_v60  ;;  %v2062_v8 = vshll.u32 %v7516_v2, %v2060_v60  ;;  %vm3694_vm8 = vc.u32 %v7532_v10, %v7527_v15 }
 0x440   : >> { %v4532_v1 = vpop.eup %4531  ;;  %v3633_v14 = vxor.u32 2147483648, %v4530_v30  ;;  %v2102_v63 = vadd.s32 1, %v4058_v21  ;;  %v3696_v13 = vsel %vm3694_vm8, %v3695_v20, %v7528_v27  ;;  %v2099_v50 = vand.u32 8388607, %v2092_v25 }
 0x441   : >> { %v3630_v47 = vxor.u32 2147483648, %v4532_v1  ;;  %v2063_v44 = vshrl.u32 %v2045_v0, %v2061_v11  ;;  %v2066_v23 = vadd.s32 127, %v2065_v48  ;;  %v3697_v42 = vadd.s32 %v3696_v13, %v3692_v28 }
 0x442   : >> { %v3634_v54 = vsel %vm3632_vm6, %v3633_v14, %v4532_v1  ;;  %vm2103_vm9 = vcmp.gt.s32.totalorder %v2102_v63, 0  ;;  %v3743_v7 = vand.u32 2139095040, %v7541_v26  ;;  %vm7568_vm10 = vcmp.le.f32.partialorder %v1989_v36, 0.7853982 }
 0x443   : >> { %v3631_v2 = vsel %vm3629_vm5, %v4530_v30, %v3630_v47  ;;  %v2064_v18 = vor.u32 %v2063_v44, %v2062_v8  ;;  %v2067_v40 = vshll.u32 %v2066_v23, 23  ;;  %v2104_v22 = vsel %vm2103_vm9, %v2102_v63, 0 }
 0x444   : >> { %v3635_v58 = vsel %vm3628_vm4, %v3631_v2, %v3634_v54  ;;  %v3698_v52 = vadd.s32 536870912, %v3697_v42  ;;  %v2106_v24 = vand.u32 31, %v2104_v22  ;;  %vm1991_vm11 = vcmp.lt.s32.totalorder %v7259_v34, 0 }
 0x445   : >> { %v3636_v9 = vsel %vm3626_vm3, nan, %v3635_v58  ;;  %v2068_v59 = vor.u32 4788187, %v2067_v40  ;;  %v2071_v55 = vcvt.s32.f32 %v2064_v18  ;;  %v2076_v32 = vsel %vm1991_vm11, %v2075_v16, %v7502_v57 }
 0x446   : >> { %3873 = vst [vmem:[%s5306_s28 + $0xe8] sm:$0xff] %v3636_v9  ;;  %v7573_v46 = vshrl.u32 %v3698_v52, 30  ;;  %v2107_v17 = vsub.s32 32, %v2106_v24  ;;  %v2100_v4 = vor.u32 8388608, %v2099_v50  ;;  %v2109_v19 = vshll.u32 %v4699_v33, %v2106_v24 }
 0x447   : >> { %v2069_v38 = vand.u32 2147483647, %v2068_v59  ;;  %v3744_v56 = vshrl.u32 %v3743_v7, 23  ;;  %v2112_v45 = vshll.u32 %v4700_v37, %v2106_v24  ;;  %v2115_v57 = vshll.u32 %v4701_v39, %v2106_v24 }
 0x448   : >> { %v3700_v29 = vshll.u32 %v7573_v46, 30  ;;  %v2110_v36 = vshrl.u32 %v4700_v37, %v2107_v17  ;;  %v2113_v53 = vshrl.u32 %v4701_v39, %v2107_v17  ;;  %v2116_v27 = vshrl.u32 %v4702_v41, %v2107_v17 }
 0x449   : >> { %v2072_v31 = vmul.f32 %v2071_v55, %v2069_v38  ;;  %v2119_v61 = vshrl.u32 %v4703_v43, %v2107_v17  ;;  %v2122_v62 = vshrl.u32 %v4704_v51, %v2107_v17  ;;  %v2105_v21 = vshrl.u32 %v2104_v22, 5 }
 0x44a   : >> { %v7584_v35 = vsub.s32 %v3697_v42, %v3700_v29  ;;  %v2118_v0 = vshll.u32 %v4702_v41, %v2106_v24  ;;  %v2121_v60 = vshll.u32 %v4703_v43, %v2106_v24  ;;  %v2111_v30 = vor.u32 %v2110_v36, %v2109_v19 }
 0x44b   : >> { %v2073_v6 = vxor.u32 2147483648, %v2072_v31  ;;  %v2114_v11 = vor.u32 %v2113_v53, %v2112_v45  ;;  %v2117_v48 = vor.u32 %v2116_v27, %v2115_v57  ;;  %v2078_v28 = vsel %vm7568_vm10, 0, %v2076_v32 }
 0x44c   : >> { %v3703_v20 = vsub.s32 0, %v7584_v35  ;;  %v2120_v1 = vor.u32 %v2119_v61, %v2118_v0  ;;  %v2123_v14 = vor.u32 %v2122_v62, %v2121_v60  ;;  %v2140_v47 = vshll.u32 %v2100_v4, 8 }
 0x44d   : >> { %v2074_v16 = vsel %vm1991_vm11, %v2073_v6, %v2072_v31  ;;  %v4122_v44 = vadd.s32 4294967169, %v3744_v56  ;;  %v2108_v23 = vshrl.u32 %v4699_v33, %v2107_v17  ;;  %vm2124_vm12 = vcmp.lt.s32.totalorder %v2105_v21, 1 }
 0x44e   : >> { %v2077_v8 = vsel %vm7568_vm10, %v7259_v34, %v2074_v16  ;;  %v4119_v63 = vmin.u32 %v3703_v20, %v7584_v35  ;;  %vm2127_vm13 = vcmp.lt.s32.totalorder %v2105_v21, 4  ;;  %v2132_v42 = vsel %vm2124_vm12, %v2111_v30, %v2114_v11 }
 0x44f   : >> { %4533 = vcosq.f32 %v2077_v8  ;;  %v2129_v54 = vsel %vm2127_vm13, %v2117_v48, 2102212464  ;;  %vm2126_vm14 = vcmp.lt.s32.totalorder %v2105_v21, 3  ;;  %v2133_v50 = vsel %vm2127_vm13, %v2120_v1, 920167782 }
 0x450   : >> { %4535 = vsinq.f32 %v2077_v8  ;;  %v3705_v13 = vclz %v4119_v63  ;;  %v2136_v2 = vsel %vm2124_vm12, %v2114_v11, %v2117_v48  ;;  %v2137_v18 = vsel %vm2127_vm13, %v2123_v14, 1326507024 }
 0x451   : >> { %vm2125_vm15 = vcmp.lt.s32.totalorder %v2105_v21, 2  ;;  %v2134_v22 = vsel %vm2126_vm14, %v2117_v48, %v2133_v50  ;;  %v2138_v58 = vsel %vm2126_vm14, %v2120_v1, %v2137_v18  ;;  %v2128_v52 = vsel %vm2124_vm12, %v2108_v23, %v2111_v30 }
 0x452   : >> { %v4120_v40 = vadd.s32 4294967294, %v3705_v13  ;;  %v2130_v24 = vsel %vm2126_vm14, %v2114_v11, %v2129_v54  ;;  %v2135_v7 = vsel %vm2125_vm15, %v2132_v42, %v2134_v22  ;;  %v2139_v9 = vsel %vm2125_vm15, %v2136_v2, %v2138_v58 }
 0x453   : >> { %v7603_v59 = vmul.u32.u64.low %v2140_v47, %v2139_v9  ;;  %v7604_v3 = vmul.u32.u64.high %v2140_v47, %v2139_v9, %v7603_v59  ;;  %v3750_v17 = vadd.s32 1, %v4122_v44  ;;  %v2082_v38 = vand.u32 3, %v2078_v28 }
 0x454   : >> { %vm4121_vm0 = vcmp.lt.s32.totalorder %v4120_v40, 0  ;;  %v7606_v32 = vmul.u32.u64.low %v2140_v47, %v2135_v7  ;;  %v7607_v4 = vmul.u32.u64.high %v2140_v47, %v2135_v7, %v7606_v32  ;;  %v3693_v29 = vadd.s32 %v7527_v15, %v7532_v10 }
 0x455   : >> { %v3708_v55 = vsel %vm4121_vm0, 0, %v4120_v40  ;;  %vm3751_vm1 = vcmp.gt.s32.totalorder %v3750_v17, 0  ;;  %vm3639_vm2 = vcmp.lt.s32.totalorder %v7417_v12, 0  ;;  %v2131_v56 = vsel %vm2125_vm15, %v2128_v52, %v2130_v24 }
 0x456   : >> { %v3709_v19 = vsub.s32 32, %v3708_v55  ;;  %v3713_v36 = vsub.s32 4294967266, %v3708_v55  ;;  %v3740_v31 = vand.u32 2147483647, %v7541_v26  ;;  %v3752_v53 = vsel %vm3751_vm1, %v3750_v17, 0 }
 0x457   : >> { %v3710_v27 = vshll.u32 %v7584_v35, %v3708_v55  ;;  %vm2149_vm3 = vc.u32 %v7604_v3, %v7606_v32  ;;  %vm2087_vm4 = vcmp.eq.s32.totalorder %v2082_v38, 2  ;;  %v3723_v15 = vsub.s32 4, %v7573_v46 }
 0x458   : >> { %v3711_v61 = vshrl.u32 %v3693_v29, %v3709_v19  ;;  %v3714_v45 = vadd.s32 127, %v3713_v36  ;;  %v2150_v10 = vadd.s32 1, %v7607_v4  ;;  %v3754_v62 = vand.u32 31, %v3752_v53 }
 0x459   : >> { %v4534_v57 = vpop.eup %4533  ;;  %v2147_v20 = vmul.u32 %v2140_v47, %v2131_v56  ;;  %v3747_v11 = vand.u32 8388607, %v3740_v31  ;;  %vm2084_vm5 = vcmp.eq.s32.totalorder %v2082_v38, 0  ;;  %vm2081_vm6 = vweird.f32 %v7259_v34 }
 0x45a   : >> { %v4536_v6 = vpop.eup %4535  ;;  %v2088_v21 = vxor.u32 2147483648, %v4534_v57  ;;  %v3712_v0 = vor.u32 %v3711_v61, %v3710_v27  ;;  %v3715_v60 = vshll.u32 %v3714_v45, 23  ;;  %v2151_v35 = vsel %vm2149_vm3, %v2150_v10, %v7607_v4 }
 0x45b   : >> { %v2085_v30 = vxor.u32 2147483648, %v4536_v6  ;;  %v3755_v48 = vsub.s32 32, %v3754_v62  ;;  %v2152_v1 = vadd.s32 %v2151_v35, %v2147_v20  ;;  %vm2083_vm7 = vcmp.lt.s32.totalorder %v2082_v38, 2 }
 0x45c   : >> { %v2089_v16 = vsel %vm2087_vm4, %v2088_v21, %v4536_v6  ;;  %v3716_v28 = vor.u32 4788187, %v3715_v60  ;;  %v3724_v8 = vsel %vm3639_vm2, %v3723_v15, %v7573_v46  ;;  %v3719_v44 = vcvt.s32.f32 %v3712_v0 }
 0x45d   : >> { %v2086_v14 = vsel %vm2084_vm5, %v4534_v57, %v2085_v30  ;;  %v2153_v23 = vadd.s32 536870912, %v2152_v1  ;;  %v3748_v54 = vor.u32 8388608, %v3747_v11  ;;  %v3758_v42 = vshrl.u32 %v4700_v37, %v3755_v48 }
 0x45e   : >> { %v2090_v63 = vsel %vm2083_vm7, %v2086_v14, %v2089_v16  ;;  %v3717_v47 = vand.u32 2147483647, %v3716_v28  ;;  %v3761_v50 = vshrl.u32 %v4701_v39, %v3755_v48  ;;  %v3757_v34 = vshll.u32 %v4699_v33, %v3754_v62 }
 0x45f   : >> { %v2091_v13 = vsel %vm2081_vm6, nan, %v2090_v63  ;;  %v7630_v18 = vshrl.u32 %v2153_v23, 30  ;;  %v3764_v40 = vshrl.u32 %v4702_v41, %v3755_v48  ;;  %v3760_v46 = vshll.u32 %v4700_v37, %v3754_v62 }
 0x460   : >> { %3858 = vst [vmem:[%s5306_s28 + $0x70] sm:$0xff] %v2091_v13  ;;  %v3720_v2 = vmul.f32 %v3719_v44, %v3717_v47  ;;  %v3766_v22 = vshll.u32 %v4702_v41, %v3754_v62  ;;  %v3767_v58 = vshrl.u32 %v4703_v43, %v3755_v48  ;;  %v3770_v52 = vshrl.u32 %v4704_v51, %v3755_v48 }
 0x461   : >> { %v2155_v7 = vshll.u32 %v7630_v18, 30  ;;  %v3753_v9 = vshrl.u32 %v3752_v53, 5  ;;  %v3763_v59 = vshll.u32 %v4701_v39, %v3754_v62  ;;  %v3759_v17 = vor.u32 %v3758_v42, %v3757_v34 }
 0x462   : >> { %v3721_v24 = vxor.u32 2147483648, %v3720_v2  ;;  %v3762_v38 = vor.u32 %v3761_v50, %v3760_v46  ;;  %v3768_v55 = vor.u32 %v3767_v58, %v3766_v22  ;;  %v3769_v4 = vshll.u32 %v4703_v43, %v3754_v62 }
 0x463   : >> { %vm7643_vm8 = vcmp.le.f32.partialorder %v3637_v5, 0.7853982  ;;  %v2156_v51 = vsub.s32 %v2152_v1, %v2155_v7  ;;  %v3765_v29 = vor.u32 %v3764_v40, %v3763_v59  ;;  %vm3772_vm9 = vcmp.lt.s32.totalorder %v3753_v9, 1 }
 0x464   : >> { %v3722_v41 = vsel %vm3639_vm2, %v3721_v24, %v3720_v2  ;;  %v3726_v19 = vsel %vm7643_vm8, 0, %v3724_v8  ;;  %v3771_v36 = vor.u32 %v3770_v52, %v3769_v4  ;;  %vm3775_vm10 = vcmp.lt.s32.totalorder %v3753_v9, 4 }
 0x465   : >> { %v3725_v39 = vsel %vm7643_vm8, %v7417_v12, %v3722_v41  ;;  %v2158_v43 = vsub.s32 0, %v2156_v51  ;;  %v3780_v5 = vsel %vm3772_vm9, %v3759_v17, %v3762_v38  ;;  %v3781_v56 = vsel %vm3775_vm10, %v3768_v55, 920167782 }
 0x466   : >> { %4537 = vcosq.f32 %v3725_v39  ;;  %v3788_v53 = vshll.u32 %v3748_v54, 8  ;;  %v3756_v61 = vshrl.u32 %v4699_v33, %v3755_v48  ;;  %vm3774_vm11 = vcmp.lt.s32.totalorder %v3753_v9, 3 }
 0x467   : >> { %4539 = vsinq.f32 %v3725_v39  ;;  %v4059_v27 = vmin.u32 %v2158_v43, %v2156_v51  ;;  %v3777_v45 = vsel %vm3775_vm10, %v3765_v29, 2102212464  ;;  %vm3773_vm12 = vcmp.lt.s32.totalorder %v3753_v9, 2 }
 0x468   : >> { %v3782_v57 = vsel %vm3774_vm11, %v3765_v29, %v3781_v56  ;;  %v3784_v15 = vsel %vm3772_vm9, %v3762_v38, %v3765_v29  ;;  %v3785_v10 = vsel %vm3775_vm10, %v3771_v36, 1326507024  ;;  %v3776_v6 = vsel %vm3772_vm9, %v3756_v61, %v3759_v17 }
 0x469   : >> { %v2160_v62 = vclz %v4059_v27  ;;  %v3783_v21 = vsel %vm3773_vm12, %v3780_v5, %v3782_v57  ;;  %v3786_v0 = vsel %vm3774_vm11, %v3768_v55, %v3785_v10  ;;  %v3778_v60 = vsel %vm3774_vm11, %v3762_v38, %v3777_v45 }
 0x46a   : >> { %v3787_v20 = vsel %vm3773_vm12, %v3784_v15, %v3786_v0  ;;  %v7657_v30 = vmul.u32.u64.low %v3788_v53, %v3783_v21  ;;  %v7658_v35 = vmul.u32.u64.high %v3788_v53, %v3783_v21, %v7657_v30  ;;  %v3730_v11 = vand.u32 3, %v3726_v19 }
 0x46b   : >> { %v4060_v16 = vadd.s32 4294967294, %v2160_v62  ;;  %v7660_v33 = vmul.u32.u64.low %v3788_v53, %v3787_v20  ;;  %v7661_v48 = vmul.u32.u64.high %v3788_v53, %v3787_v20, %v7660_v33  ;;  %v3779_v28 = vsel %vm3773_vm12, %v3776_v6, %v3778_v60 }
 0x46c   : >> { %v3798_v14 = vadd.s32 1, %v7658_v35  ;;  %vm3735_vm14 = vcmp.eq.s32.totalorder %v3730_v11, 2  ;;  %v2148_v63 = vadd.s32 %v7606_v32, %v7604_v3  ;;  %v3795_v42 = vmul.u32 %v3788_v53, %v3779_v28 }
 0x46d   : >> { %vm4061_vm13 = vcmp.lt.s32.totalorder %v4060_v16, 0  ;;  %vm3797_vm15 = vc.u32 %v7661_v48, %v7657_v30  ;;  %vm3732_vm0 = vcmp.eq.s32.totalorder %v3730_v11, 0  ;;  %vm3731_vm1 = vcmp.lt.s32.totalorder %v3730_v11, 2 }
 0x46e   : >> { %v2163_v1 = vsel %vm4061_vm13, 0, %v4060_v16  ;;  %v3799_v40 = vsel %vm3797_vm15, %v3798_v14, %v7658_v35  ;;  %vm3729_vm2 = vweird.f32 %v7417_v12  ;;  %vm2094_vm3 = vcmp.lt.s32.totalorder %v7486_v49, 0 }
 0x46f   : >> { %v2164_v47 = vsub.s32 32, %v2163_v1  ;;  %v2168_v44 = vsub.s32 4294967266, %v2163_v1  ;;  %v2165_v54 = vshll.u32 %v2156_v51, %v2163_v1  ;;  %v3800_v22 = vadd.s32 %v3799_v40, %v3795_v42 }
 0x470   : >> { %v4538_v8 = vpop.eup %4537  ;;  %vm7674_vm4 = vcmp.le.f32.partialorder %v2092_v25, 0.7853982  ;;  %v2178_v39 = vsub.s32 4, %v7630_v18  ;;  %v3796_v27 = vadd.s32 %v7657_v30, %v7661_v48  ;;  %vm2184_vm9 = vweird.f32 %v7486_v49 }
 0x471   : >> { %v4540_v23 = vpop.eup %4539  ;;  %v3736_v13 = vxor.u32 2147483648, %v4538_v8  ;;  %v2166_v2 = vshrl.u32 %v2148_v63, %v2164_v47  ;;  %v2169_v34 = vadd.s32 127, %v2168_v44  ;;  %v3801_v24 = vadd.s32 536870912, %v3800_v22 }
 0x472   : >> { %v3733_v50 = vxor.u32 2147483648, %v4540_v23  ;;  %v2179_v5 = vsel %vm2094_vm3, %v2178_v39, %v7630_v18  ;;  %vm3742_vm10 = vcmp.lt.s32.totalorder %v7541_v26, 0  ;;  %vm3741_vm11 = vcmp.le.f32.partialorder %v3740_v31, 0.7853982 }
 0x473   : >> { %v3737_v46 = vsel %vm3735_vm14, %v3736_v13, %v4540_v23  ;;  %v2167_v3 = vor.u32 %v2166_v2, %v2165_v54  ;;  %v2170_v32 = vshll.u32 %v2169_v34, 23  ;;  %v3802_v59 = vshrl.u32 %v3801_v24, 30 }
 0x474   : >> { %v3734_v58 = vsel %vm3732_vm0, %v4538_v8, %v3733_v50  ;;  %v2181_v25 = vsel %vm7674_vm4, 0, %v2179_v5  ;;  %vm3832_vm15 = vweird.f32 %v7541_v26 }
 0x475   : >> { %v3738_v52 = vsel %vm3731_vm1, %v3734_v58, %v3737_v46  ;;  %v2171_v9 = vor.u32 4788187, %v2170_v32  ;;  %v2174_v38 = vcvt.s32.f32 %v2167_v3  ;;  %v3803_v55 = vshll.u32 %v3802_v59, 30 }
 0x476   : >> { %v3739_v7 = vsel %vm3729_vm2, nan, %v3738_v52  ;;  %v2185_v57 = vand.u32 3, %v2181_v25  ;;  %v3826_v63 = vsub.s32 4, %v3802_v59 }
 0x477   : >> { %3874 = vst [vmem:[%s5306_s28 + $0xf0] sm:$0xff] %v3739_v7  ;;  %v2172_v17 = vand.u32 2147483647, %v2171_v9  ;;  %v3804_v37 = vsub.s32 %v3800_v22, %v3803_v55 }
 0x478   : >> { %vm2190_vm6 = vcmp.eq.s32.totalorder %v2185_v57, 2  ;;  %vm2187_vm7 = vcmp.eq.s32.totalorder %v2185_v57, 0  ;;  %vm2186_vm8 = vcmp.lt.s32.totalorder %v2185_v57, 2 }
 0x479   : >> { %v2175_v4 = vmul.f32 %v2174_v38, %v2172_v17  ;;  %v3806_v51 = vsub.s32 0, %v3804_v37 }
 0x47b   : >> { %v2176_v41 = vxor.u32 2147483648, %v2175_v4  ;;  %v4123_v36 = vmin.u32 %v3806_v51, %v3804_v37 }
 0x47d   : >> { %v2177_v12 = vsel %vm2094_vm3, %v2176_v41, %v2175_v4  ;;  %v3808_v43 = vclz %v4123_v36 }
 0x47e   : >> { %v2180_v19 = vsel %vm7674_vm4, %v7486_v49, %v2177_v12  ;;  %v3827_v49 = vsel %vm3742_vm10, %v3826_v63, %v3802_v59 }
 0x47f   : >> { %4541 = vcosq.f32 %v2180_v19  ;;  %v4124_v56 = vadd.s32 4294967294, %v3808_v43  ;;  %v3829_v44 = vsel %vm3741_vm11, 0, %v3827_v49 }
 0x480   : >> { %4543 = vsinq.f32 %v2180_v19  ;;  %v3833_v23 = vand.u32 3, %v3829_v44 }
 0x481   : >> { %vm4125_vm5 = vcmp.lt.s32.totalorder %v4124_v56, 0 }
 0x482   : >> { %v3811_v53 = vsel %vm4125_vm5, 0, %v4124_v56  ;;  %vm3838_vm12 = vcmp.eq.s32.totalorder %v3833_v23, 2  ;;  %vm3835_vm13 = vcmp.eq.s32.totalorder %v3833_v23, 0  ;;  %vm3834_vm14 = vcmp.lt.s32.totalorder %v3833_v23, 2 }
 0x483   : >> { %v3812_v61 = vsub.s32 32, %v3811_v53  ;;  %v3816_v45 = vsub.s32 4294967266, %v3811_v53  ;;  %v3813_v15 = vshll.u32 %v3804_v37, %v3811_v53 }
 0x485   : >> { %v3814_v10 = vshrl.u32 %v3796_v27, %v3812_v61  ;;  %v3817_v62 = vadd.s32 127, %v3816_v45 }
 0x487   : >> { %v3815_v60 = vor.u32 %v3814_v10, %v3813_v15  ;;  %v3818_v18 = vshll.u32 %v3817_v62, 23 }
 0x489   : >> { %v4542_v6 = vpop.eup %4541  ;;  %v3819_v11 = vor.u32 4788187, %v3818_v18  ;;  %v3822_v48 = vcvt.s32.f32 %v3815_v60 }
 0x48a   : >> { %v4544_v21 = vpop.eup %4543  ;;  %v2191_v0 = vxor.u32 2147483648, %v4542_v6 }
 0x48b   : >> { %v2188_v20 = vxor.u32 2147483648, %v4544_v21  ;;  %v3820_v33 = vand.u32 2147483647, %v3819_v11 }
 0x48c   : >> { %v2192_v35 = vsel %vm2190_vm6, %v2191_v0, %v4544_v21 }
 0x48d   : >> { %v2189_v16 = vsel %vm2187_vm7, %v4542_v6, %v2188_v20  ;;  %v3823_v1 = vmul.f32 %v3822_v48, %v3820_v33 }
 0x48e   : >> { %v2193_v30 = vsel %vm2186_vm8, %v2189_v16, %v2192_v35 }
 0x48f   : >> { %v2194_v28 = vsel %vm2184_vm9, nan, %v2193_v30  ;;  %v3824_v14 = vxor.u32 2147483648, %v3823_v1 }
 0x490   : >> { %3859 = vst [vmem:[%s5306_s28 + $0x78] sm:$0xff] %v2194_v28 }
 0x491   : >> { %v3825_v8 = vsel %vm3742_vm10, %v3824_v14, %v3823_v1 }
 0x492   : >> { %v3828_v47 = vsel %vm3741_vm11, %v7541_v26, %v3825_v8 }
 0x493   : >> { %4545 = vcosq.f32 %v3828_v47 }
 0x494   : >> { %4547 = vsinq.f32 %v3828_v47 }
 0x49d   : >> { %v4546_v13 = vpop.eup %4545 }
 0x49e   : >> { %v4548_v54 = vpop.eup %4547  ;;  %v3839_v42 = vxor.u32 2147483648, %v4546_v13  ;;  %211 = sbr.rel (!%p209_p4) target bundleno = 88 (0x58), region = 90 }
 0x49f   : >> { %v3836_v50 = vxor.u32 2147483648, %v4548_v54 }
 0x4a0   : >> { %v3840_v2 = vsel %vm3838_vm12, %v3839_v42, %v4548_v54 }
 0x4a1   : >> { %v3837_v34 = vsel %vm3835_vm13, %v4546_v13, %v3836_v50 }
 0x4a2   : >> { %v3841_v31 = vsel %vm3834_vm14, %v3837_v34, %v3840_v2 }
 0x4a3   : >> { %v3842_v40 = vsel %vm3832_vm15, nan, %v3841_v31 }
 0x4a4   : >> { %3875 = vst [vmem:[%s5306_s28 + $0xf8] sm:$0xff] %v3842_v40  ;;  %s3877_s28 = scalar_lea.sflag (%p209_p4), [#allocation4], %s4867_s6 }
 0x4a5   : > { %4625 = shalt.err (!%p4622_p9)
}
 0x4a6   : > { %s4626_s4 = scalar_lea.hbm %s7701_s29, 8192  ;;  %s4630_s8 = scalar_lea.hbm %s7751_s3, 16384 }
 0x4a7   : > { %p4627_p2 = scmp.ne.s32.totalorder %s7701_s29, %s4626_s4  ;;  %p4631_p11 = scmp.lt.u32.totalorder %s7701_s29, %s7751_s3 }
 0x4a8   : > { %p4632_p1 = scmp.lt.u32.totalorder %s4630_s8, %s4626_s4  ;;  %p4634_p6 = scmp.lt.u32.totalorder %s4626_s4, %s7701_s29 }
 0x4a9   : > { %p4628_p0 = pnand %p4627_p2, %p4819_p12 }
 0x4aa   : > { %p4633_p4 = por %p4632_p1, %p4631_p11 }
 0x4ab   : > { %p4629_p5 = pneg %p4628_p0 }
 0x4ac   : > { %p4635_p8 = por %p4634_p6, %p4633_p4 }
 0x4ae   : > { %p4636_p10 = pnand %p4635_p8, %p4629_p5 }
 0x4b0   : > { %4639 = shalt.err (!%p4636_p10)
}
 0x4b1   : > { %s4706_s26 = smov 128   ;;  %s4707_s5 = smov 8  }
 0x4b2   : > { %4349 = dma.vmem_to_hbm [thread:$0]  (%p4819_p12), %s7704_s23, 8192, %s7701_s29, %s3877_s28, %s4706_s26, %s4706_s26, %s4707_s5  }
 0x4b3 PF: > { %s3905_s10 = sand.u32 1, %s4674_s12   ;;  %p7828_p13 = scmp.ne.s32.totalorder %s7756_s19, 0 }
 0x4b4   : > { %p7829_p3 = scmp.ge.s32.totalorder %s4686_s15, 2  ;;  %s3906_s11 = scalar_lea.sflag [#allocation4], %s3905_s10 }
 0x4b6   : > { %p4360_p7 = pnand %p7829_p3, %p7828_p13 }
 0x4b8   : > { %4669 = dma.done.wait (!%p4360_p7), %s3906_s11, 8192  }
 0x4b9   : > { %4671 = vsyncadd (!%p4360_p7), %s3906_s11, 4294959104  ;;  %p17_p9 = scmp.ge.s32.totalorder %s4784_s24, 4   ;;  %s7830_s12 = smov %s4678_s13 }
 0x4ba   : > { %s7831_s13 = smov %s4682_s14  ;;  %s7832_s14 = smov %s4815_s17 }
 0x4bb   : > { %s7833_s15 = smov %s4784_s24  ;;  %19 = sbr.rel (!%p17_p9) target bundleno = 6 (0x6), region = 101 }
 0x4c2   :  { %3911 = vsyncpa [#allocation3], 1 }
 0x4c3   :  { %3913 = vsyncpa [#allocation3 + $0x1], 1 }
 0x4c4   :  { %3914 = vsyncpa [#allocation6], 1 }
 0x4c5   :  { %3915 = vsyncpa [#allocation4], 1 }
 0x4c6   :  { %3917 = vsyncpa [#allocation4 + $0x1], 1 }

</bundles_post_ra>
